<compile_context>
chip_gen: v7x
topology: tpu7x:2x2x1
jax: 0.10.0
libtpu: 0.0.40
codegen_flags: <defaults>
</compile_context>

<pallas_src>
import functools

import jax
import jax.numpy as jnp
import numpy as np
from jax.experimental import pallas as pl
from jax.experimental.pallas import tpu as pltpu


# -----------------------------------------------------------------------------
# Fused Pallas kernel: embedding + all GRU layers + final Linear.
# -----------------------------------------------------------------------------
def _fused_gru_model_kernel(*refs, num_layers, T, Bp, H, GP):
    it = iter(refs)
    x_ref = next(it)                      # (T*Bp, 1)   time-major, batch-padded
    emb_w_ref = next(it)                  # (1, E)
    emb_b_ref = next(it)                  # (1, E)
    wih_refs, whh_refs, bx_refs, bhn_refs = [], [], [], []
    for _ in range(num_layers):
        wih_refs.append(next(it))         # (E_in, 3*GP)  gate blocks lane-aligned
        whh_refs.append(next(it))         # (H,    3*GP)
        bx_refs.append(next(it))          # (1,    3*GP)  b_ih + [b_hh_r, b_hh_z, 0]
        bhn_refs.append(next(it))         # (1, H)        b_hh_n
    fc_w_ref = next(it)                   # (1, H)
    fc_b_ref = next(it)                   # (1, 1)
    out_ref = next(it)                    # (Bp, 1)
    n_gbuf = min(num_layers, 2)
    gates_refs = [next(it) for _ in range(n_gbuf)]     # VMEM (T*Bp, 3*GP), ping-pong
    h_seq_ref = next(it) if num_layers > 1 else None   # VMEM (T*Bp, H)

    f32 = jnp.float32

    # Layer-0 input projection folded through the 1->E embedding Linear:
    #   gx0 = x * (emb_w @ Wih0) + (emb_b @ Wih0 + b_ih0 + [b_hh0_r, b_hh0_z, 0])
    wih0 = wih_refs[0][...]                                              # (E, 3GP)
    w_eff = jnp.dot(emb_w_ref[...], wih0, preferred_element_type=f32)    # (1, 3GP)
    b_eff = (jnp.dot(emb_b_ref[...], wih0, preferred_element_type=f32)
             + bx_refs[0][...])                                          # (1, 3GP)
    gates_refs[0][...] = x_ref[...] * w_eff + b_eff                      # (T*Bp, 3GP)

    for l in range(num_layers):
        cur = gates_refs[l % 2]
        whh = whh_refs[l][...]                                           # (H, 3GP)
        bhn_b = jnp.broadcast_to(bhn_refs[l][...], (Bp, H))              # hoisted
        last = (l + 1 == num_layers)

        h = jnp.zeros((Bp, H), f32)
        for t in range(T):                 # static unroll; tile-aligned row slices
            row = t * Bp
            gx = cur[pl.ds(row, Bp), :]                                  # (Bp, 3GP)
            gh = jnp.dot(h, whh, preferred_element_type=f32)             # (Bp, 3GP)
            # Each gate lives at lane offset 0 of its own 128-lane block -> the
            # slices below need no cross-lane realignment (PyTorch order [r, z, n];
            # r/z hidden biases already folded into gx).
            r = jax.nn.sigmoid(gx[:, 0:H] + gh[:, 0:H])
            z = jax.nn.sigmoid(gx[:, GP:GP + H] + gh[:, GP:GP + H])
            n = jnp.tanh(gx[:, 2 * GP:2 * GP + H]
                         + r * (gh[:, 2 * GP:2 * GP + H] + bhn_b))
            h = n + z * (h - n)            # == (1 - z) * n + z * h
            if not last:
                h_seq_ref[pl.ds(row, Bp), :] = h
        if not last:
            # Deferred next-layer input projection: one (T*Bp, H) @ (H, 3GP) matmul
            # instead of T tiny per-step matmuls + masked stores; the inter-layer
            # sequence never leaves VMEM.
            gates_refs[(l + 1) % 2][...] = (
                jnp.dot(h_seq_ref[...], wih_refs[l + 1][...],
                        preferred_element_type=f32)
                + bx_refs[l + 1][...])

    # Final Linear(H, 1) on the last hidden state (tiny lane reduction).
    out_ref[...] = (jnp.sum(h * fc_w_ref[...], axis=1, keepdims=True)
                    + fc_b_ref[...])


def gru_model_forward(x, params):
    """Fused forward. x: (B, T) float; params from init_params."""
    emb_w, emb_b = params["embedding"]    # (E, 1), (E,)
    fc_w, fc_b = params["fc"]             # (1, H), (1,)
    gru = params["gru"]
    num_layers = len(gru)
    H = gru[0][1].shape[1]
    E = emb_w.shape[0]
    B, T = x.shape
    GP = -(-H // 128) * 128               # per-gate lane-aligned block width
    Bp = -(-B // 8) * 8                   # batch padded to a sublane multiple
    f32 = jnp.float32

    def pad_gate_cols(w):
        """(K, 3H) -> (K, 3*GP), gate g placed at lanes [g*GP, g*GP + H)."""
        K = w.shape[0]
        out = jnp.zeros((K, 3 * GP), f32)
        for g in range(3):
            out = out.at[:, g * GP:g * GP + H].set(
                w[:, g * H:(g + 1) * H].astype(f32))
        return out

    # Time-major, batch padded, flattened to (T*Bp, 1) so every per-step slice of the
    # gate/h_seq scratch starts on an 8-row sublane-tile boundary.
    xt = jnp.pad(jnp.transpose(x).astype(f32), ((0, 0), (0, Bp - B)))    # (T, Bp)
    inputs = [
        xt.reshape(T * Bp, 1),
        jnp.transpose(emb_w).astype(f32),           # (1, E)
        emb_b.reshape(1, E).astype(f32),            # (1, E)
    ]
    for (w_ih, w_hh, b_ih, b_hh) in gru:
        bx = b_ih + jnp.concatenate([b_hh[:2 * H], jnp.zeros((H,), b_hh.dtype)])
        inputs += [
            pad_gate_cols(jnp.transpose(w_ih)),     # (E_in, 3GP)
            pad_gate_cols(jnp.transpose(w_hh)),     # (H, 3GP)
            pad_gate_cols(bx.reshape(1, 3 * H)),    # (1, 3GP)
            b_hh[2 * H:].reshape(1, H).astype(f32), # (1, H)
        ]
    inputs += [
        fc_w.reshape(1, H).astype(f32),             # (1, H)
        fc_b.reshape(1, 1).astype(f32),             # (1, 1)
    ]

    kernel = functools.partial(
        _fused_gru_model_kernel,
        num_layers=num_layers, T=T, Bp=Bp, H=H, GP=GP)

    # Ping-pong gate scratch (depth-independent VMEM footprint) + h sequence scratch.
    scratch = [pltpu.VMEM((T * Bp, 3 * GP), f32) for _ in range(min(num_layers, 2))]
    if num_layers > 1:
        scratch.append(pltpu.VMEM((T * Bp, H), f32))

    out = pl.pallas_call(
        kernel,
        out_shape=jax.ShapeDtypeStruct((Bp, 1), f32),
        in_specs=[pl.BlockSpec(memory_space=pltpu.MemorySpace.VMEM)] * len(inputs),
        out_specs=pl.BlockSpec(memory_space=pltpu.MemorySpace.VMEM),
        scratch_shapes=scratch,
    )(*inputs)
    return out[:B]


# -----------------------------------------------------------------------------
# Pure-JAX reference (for correctness checking).
# -----------------------------------------------------------------------------
def gru_layer_ref(x, w_ih, w_hh, b_ih, b_hh):
    B, T, _ = x.shape
    H = w_hh.shape[1]

    def step(h, x_t):
        gx = x_t @ w_ih.T + b_ih
        gh = h @ w_hh.T + b_hh
        r = jax.nn.sigmoid(gx[:, :H] + gh[:, :H])
        z = jax.nn.sigmoid(gx[:, H:2 * H] + gh[:, H:2 * H])
        n = jnp.tanh(gx[:, 2 * H:] + r * gh[:, 2 * H:])
        h_new = (1.0 - z) * n + z * h
        return h_new, h_new

    h0 = jnp.zeros((B, H), jnp.float32)
    _, ys = jax.lax.scan(step, h0, jnp.transpose(x, (1, 0, 2)))
    return jnp.transpose(ys, (1, 0, 2))


def gru_model_forward_ref(x, params):
    emb_w, emb_b = params["embedding"]
    h = x[..., None] * emb_w[:, 0][None, None, :] + emb_b[None, None, :]  # (B, T, E)
    for (w_ih, w_hh, b_ih, b_hh) in params["gru"]:
        h = gru_layer_ref(h, w_ih, w_hh, b_ih, b_hh)
    last = h[:, -1, :]
    fc_w, fc_b = params["fc"]
    return last @ fc_w.T + fc_b[None, :]


def init_params(key, input_dim, hidden_dim, num_layers, embed_dim):
    ks = jax.random.split(key, 4 + 4 * num_layers)
    emb_w = jax.random.uniform(ks[0], (embed_dim, 1), jnp.float32, -1.0, 1.0)
    emb_b = jax.random.uniform(ks[1], (embed_dim,), jnp.float32, -1.0, 1.0)
    kf = 1.0 / np.sqrt(hidden_dim)
    fc_w = jax.random.uniform(ks[2], (1, hidden_dim), jnp.float32, -kf, kf)
    fc_b = jax.random.uniform(ks[3], (1,), jnp.float32, -kf, kf)
    kg = 1.0 / np.sqrt(hidden_dim)
    gru_params = []
    for layer in range(num_layers):
        in_dim = embed_dim if layer == 0 else hidden_dim
        k0, k1, k2, k3 = ks[4 + 4 * layer:8 + 4 * layer]
        w_ih = jax.random.uniform(k0, (3 * hidden_dim, in_dim), jnp.float32, -kg, kg)
        w_hh = jax.random.uniform(k1, (3 * hidden_dim, hidden_dim), jnp.float32, -kg, kg)
        b_ih = jax.random.uniform(k2, (3 * hidden_dim,), jnp.float32, -kg, kg)
        b_hh = jax.random.uniform(k3, (3 * hidden_dim,), jnp.float32, -kg, kg)
        gru_params.append((w_ih, w_hh, b_ih, b_hh))
    return {"embedding": (emb_w, emb_b), "gru": gru_params, "fc": (fc_w, fc_b)}


if __name__ == "__main__":
    batch = 4
    input_dim = 16      # sequence length T (features-as-sequence)
    hidden_dim = 32
    num_layers = 2
    embed_dim = 8

    key = jax.random.PRNGKey(0)
    k_x, k_p = jax.random.split(key)
    x = jax.random.normal(k_x, (batch, input_dim), jnp.float32)
    params = init_params(k_p, input_dim, hidden_dim, num_layers, embed_dim)

    fwd = jax.jit(gru_model_forward)
    out = jax.block_until_ready(fwd(x, params))
    assert out.shape == (batch, 1), out.shape

    ref = jax.block_until_ready(gru_model_forward_ref(x, params))
    np.testing.assert_allclose(np.asarray(out), np.asarray(ref), rtol=2e-3, atol=2e-3)

    print("KERNEL_OK")
</pallas_src>

<mosaic_0001>
module attributes {stable_mosaic.version = 11 : i64} {
  func.func @_fused_gru_model_kernel(%arg0: memref<128x1xf32, #tpu.memory_space<vmem>>, %arg1: memref<1x8xf32, #tpu.memory_space<vmem>>, %arg2: memref<1x8xf32, #tpu.memory_space<vmem>>, %arg3: memref<8x384xf32, #tpu.memory_space<vmem>>, %arg4: memref<32x384xf32, #tpu.memory_space<vmem>>, %arg5: memref<1x384xf32, #tpu.memory_space<vmem>>, %arg6: memref<1x32xf32, #tpu.memory_space<vmem>>, %arg7: memref<32x384xf32, #tpu.memory_space<vmem>>, %arg8: memref<32x384xf32, #tpu.memory_space<vmem>>, %arg9: memref<1x384xf32, #tpu.memory_space<vmem>>, %arg10: memref<1x32xf32, #tpu.memory_space<vmem>>, %arg11: memref<1x32xf32, #tpu.memory_space<vmem>>, %arg12: memref<1x1xf32, #tpu.memory_space<vmem>>, %arg13: memref<8x1xf32, #tpu.memory_space<vmem>>, %arg14: memref<128x384xf32, #tpu.memory_space<vmem>>, %arg15: memref<128x384xf32, #tpu.memory_space<vmem>>, %arg16: memref<128x32xf32, #tpu.memory_space<vmem>>) attributes {dimension_semantics = [], scalar_prefetch = 0 : i64, scratch_operands = 3 : i64, tpu.core_type = #tpu.core_type<tc>} {
    %c0 = arith.constant 0 : index
    %c0_0 = arith.constant 0 : index
    %0 = vector.load %arg3[%c0, %c0_0] : memref<8x384xf32, #tpu.memory_space<vmem>>, vector<8x384xf32>
    %c0_1 = arith.constant 0 : index
    %c0_2 = arith.constant 0 : index
    %1 = vector.load %arg1[%c0_1, %c0_2] : memref<1x8xf32, #tpu.memory_space<vmem>>, vector<1x8xf32>
    %cst = arith.constant dense<0.000000e+00> : vector<1x384xf32>
    %2 = tpu.matmul %1, %0, %cst {dimension_numbers = #tpu.dot_dimension_numbers<[1], [0], [0], [1], [0, 0, 1, 1], [], []>} : vector<1x8xf32>, vector<8x384xf32>, vector<1x384xf32> -> vector<1x384xf32>
    %c0_3 = arith.constant 0 : index
    %c0_4 = arith.constant 0 : index
    %3 = vector.load %arg2[%c0_3, %c0_4] : memref<1x8xf32, #tpu.memory_space<vmem>>, vector<1x8xf32>
    %cst_5 = arith.constant dense<0.000000e+00> : vector<1x384xf32>
    %4 = tpu.matmul %3, %0, %cst_5 {dimension_numbers = #tpu.dot_dimension_numbers<[1], [0], [0], [1], [0, 0, 1, 1], [], []>} : vector<1x8xf32>, vector<8x384xf32>, vector<1x384xf32> -> vector<1x384xf32>
    %c0_6 = arith.constant 0 : index
    %c0_7 = arith.constant 0 : index
    %5 = vector.load %arg5[%c0_6, %c0_7] : memref<1x384xf32, #tpu.memory_space<vmem>>, vector<1x384xf32>
    %6 = arith.addf %4, %5 : vector<1x384xf32>
    %c0_8 = arith.constant 0 : index
    %c0_9 = arith.constant 0 : index
    %7 = vector.load %arg0[%c0_8, %c0_9] : memref<128x1xf32, #tpu.memory_space<vmem>>, vector<128x1xf32>
    %8 = vector.broadcast %7 : vector<128x1xf32> to vector<128x384xf32>
    %9 = vector.broadcast %2 : vector<1x384xf32> to vector<128x384xf32>
    %10 = arith.mulf %8, %9 : vector<128x384xf32>
    %11 = vector.broadcast %6 : vector<1x384xf32> to vector<128x384xf32>
    %12 = arith.addf %10, %11 : vector<128x384xf32>
    %c0_10 = arith.constant 0 : index
    %c0_11 = arith.constant 0 : index
    %13 = vector.load %arg14[%c0_10, %c0_11] : memref<128x384xf32, #tpu.memory_space<vmem>>, vector<128x384xf32>
    tpu.vector_store %arg14[%c0_10, %c0_11], %12 {strides = array<i32>} : memref<128x384xf32, #tpu.memory_space<vmem>>, vector<128x384xf32>,
    %c0_12 = arith.constant 0 : index
    %c0_13 = arith.constant 0 : index
    %14 = vector.load %arg4[%c0_12, %c0_13] : memref<32x384xf32, #tpu.memory_space<vmem>>, vector<32x384xf32>
    %c0_14 = arith.constant 0 : index
    %c0_15 = arith.constant 0 : index
    %15 = vector.load %arg6[%c0_14, %c0_15] : memref<1x32xf32, #tpu.memory_space<vmem>>, vector<1x32xf32>
    %16 = vector.shape_cast %15 : vector<1x32xf32> to vector<1x32xf32>
    %17 = vector.broadcast %16 : vector<1x32xf32> to vector<8x32xf32>
    %cst_16 = arith.constant 0.000000e+00 : f32
    %18 = vector.broadcast %cst_16 : f32 to vector<8x32xf32>
    %c0_17 = arith.constant 0 : index
    %c0_18 = arith.constant 0 : index
    %19 = vector.load %arg14[%c0_17, %c0_18] : memref<128x384xf32, #tpu.memory_space<vmem>>, vector<8x384xf32>
    %cst_19 = arith.constant dense<0.000000e+00> : vector<8x384xf32>
    %20 = tpu.matmul %18, %14, %cst_19 {dimension_numbers = #tpu.dot_dimension_numbers<[1], [0], [0], [1], [0, 0, 1, 1], [], []>} : vector<8x32xf32>, vector<32x384xf32>, vector<8x384xf32> -> vector<8x384xf32>
    %21 = vector.extract_strided_slice %19 {offsets = [0, 0], sizes = [8, 32], strides = [1, 1]} : vector<8x384xf32> to vector<8x32xf32>
    %22 = vector.extract_strided_slice %20 {offsets = [0, 0], sizes = [8, 32], strides = [1, 1]} : vector<8x384xf32> to vector<8x32xf32>
    %23 = arith.addf %21, %22 : vector<8x32xf32>
    %24 = arith.negf %23 : vector<8x32xf32>
    %25 = math.exp %24 : vector<8x32xf32>
    %cst_20 = arith.constant 1.000000e+00 : f32
    %26 = vector.broadcast %cst_20 : f32 to vector<8x32xf32>
    %27 = arith.addf %26, %25 : vector<8x32xf32>
    %28 = arith.divf %26, %27 : vector<8x32xf32>
    %29 = vector.extract_strided_slice %19 {offsets = [0, 128], sizes = [8, 32], strides = [1, 1]} : vector<8x384xf32> to vector<8x32xf32>
    %30 = vector.extract_strided_slice %20 {offsets = [0, 128], sizes = [8, 32], strides = [1, 1]} : vector<8x384xf32> to vector<8x32xf32>
    %31 = arith.addf %29, %30 : vector<8x32xf32>
    %32 = arith.negf %31 : vector<8x32xf32>
    %33 = math.exp %32 : vector<8x32xf32>
    %cst_21 = arith.constant 1.000000e+00 : f32
    %34 = vector.broadcast %cst_21 : f32 to vector<8x32xf32>
    %35 = arith.addf %34, %33 : vector<8x32xf32>
    %36 = arith.divf %34, %35 : vector<8x32xf32>
    %37 = vector.extract_strided_slice %19 {offsets = [0, 256], sizes = [8, 32], strides = [1, 1]} : vector<8x384xf32> to vector<8x32xf32>
    %38 = vector.extract_strided_slice %20 {offsets = [0, 256], sizes = [8, 32], strides = [1, 1]} : vector<8x384xf32> to vector<8x32xf32>
    %39 = arith.addf %38, %17 : vector<8x32xf32>
    %40 = arith.mulf %28, %39 : vector<8x32xf32>
    %41 = arith.addf %37, %40 : vector<8x32xf32>
    %42 = math.tanh %41 : vector<8x32xf32>
    %43 = arith.subf %18, %42 : vector<8x32xf32>
    %44 = arith.mulf %36, %43 : vector<8x32xf32>
    %45 = arith.addf %42, %44 : vector<8x32xf32>
    %c0_22 = arith.constant 0 : index
    %c0_23 = arith.constant 0 : index
    %46 = vector.load %arg16[%c0_22, %c0_23] : memref<128x32xf32, #tpu.memory_space<vmem>>, vector<8x32xf32>
    tpu.vector_store %arg16[%c0_22, %c0_23], %45 {strides = array<i32>} : memref<128x32xf32, #tpu.memory_space<vmem>>, vector<8x32xf32>,
    %c8 = arith.constant 8 : index
    %c0_24 = arith.constant 0 : index
    %47 = vector.load %arg14[%c8, %c0_24] : memref<128x384xf32, #tpu.memory_space<vmem>>, vector<8x384xf32>
    %cst_25 = arith.constant dense<0.000000e+00> : vector<8x384xf32>
    %48 = tpu.matmul %45, %14, %cst_25 {dimension_numbers = #tpu.dot_dimension_numbers<[1], [0], [0], [1], [0, 0, 1, 1], [], []>} : vector<8x32xf32>, vector<32x384xf32>, vector<8x384xf32> -> vector<8x384xf32>
    %49 = vector.extract_strided_slice %47 {offsets = [0, 0], sizes = [8, 32], strides = [1, 1]} : vector<8x384xf32> to vector<8x32xf32>
    %50 = vector.extract_strided_slice %48 {offsets = [0, 0], sizes = [8, 32], strides = [1, 1]} : vector<8x384xf32> to vector<8x32xf32>
    %51 = arith.addf %49, %50 : vector<8x32xf32>
    %52 = arith.negf %51 : vector<8x32xf32>
    %53 = math.exp %52 : vector<8x32xf32>
    %cst_26 = arith.constant 1.000000e+00 : f32
    %54 = vector.broadcast %cst_26 : f32 to vector<8x32xf32>
    %55 = arith.addf %54, %53 : vector<8x32xf32>
    %56 = arith.divf %54, %55 : vector<8x32xf32>
    %57 = vector.extract_strided_slice %47 {offsets = [0, 128], sizes = [8, 32], strides = [1, 1]} : vector<8x384xf32> to vector<8x32xf32>
    %58 = vector.extract_strided_slice %48 {offsets = [0, 128], sizes = [8, 32], strides = [1, 1]} : vector<8x384xf32> to vector<8x32xf32>
    %59 = arith.addf %57, %58 : vector<8x32xf32>
    %60 = arith.negf %59 : vector<8x32xf32>
    %61 = math.exp %60 : vector<8x32xf32>
    %cst_27 = arith.constant 1.000000e+00 : f32
    %62 = vector.broadcast %cst_27 : f32 to vector<8x32xf32>
    %63 = arith.addf %62, %61 : vector<8x32xf32>
    %64 = arith.divf %62, %63 : vector<8x32xf32>
    %65 = vector.extract_strided_slice %47 {offsets = [0, 256], sizes = [8, 32], strides = [1, 1]} : vector<8x384xf32> to vector<8x32xf32>
    %66 = vector.extract_strided_slice %48 {offsets = [0, 256], sizes = [8, 32], strides = [1, 1]} : vector<8x384xf32> to vector<8x32xf32>
    %67 = arith.addf %66, %17 : vector<8x32xf32>
    %68 = arith.mulf %56, %67 : vector<8x32xf32>
    %69 = arith.addf %65, %68 : vector<8x32xf32>
    %70 = math.tanh %69 : vector<8x32xf32>
    %71 = arith.subf %45, %70 : vector<8x32xf32>
    %72 = arith.mulf %64, %71 : vector<8x32xf32>
    %73 = arith.addf %70, %72 : vector<8x32xf32>
    %c8_28 = arith.constant 8 : index
    %c0_29 = arith.constant 0 : index
    %74 = vector.load %arg16[%c8_28, %c0_29] : memref<128x32xf32, #tpu.memory_space<vmem>>, vector<8x32xf32>
    tpu.vector_store %arg16[%c8_28, %c0_29], %73 {strides = array<i32>} : memref<128x32xf32, #tpu.memory_space<vmem>>, vector<8x32xf32>,
    %c16 = arith.constant 16 : index
    %c0_30 = arith.constant 0 : index
    %75 = vector.load %arg14[%c16, %c0_30] : memref<128x384xf32, #tpu.memory_space<vmem>>, vector<8x384xf32>
    %cst_31 = arith.constant dense<0.000000e+00> : vector<8x384xf32>
    %76 = tpu.matmul %73, %14, %cst_31 {dimension_numbers = #tpu.dot_dimension_numbers<[1], [0], [0], [1], [0, 0, 1, 1], [], []>} : vector<8x32xf32>, vector<32x384xf32>, vector<8x384xf32> -> vector<8x384xf32>
    %77 = vector.extract_strided_slice %75 {offsets = [0, 0], sizes = [8, 32], strides = [1, 1]} : vector<8x384xf32> to vector<8x32xf32>
    %78 = vector.extract_strided_slice %76 {offsets = [0, 0], sizes = [8, 32], strides = [1, 1]} : vector<8x384xf32> to vector<8x32xf32>
    %79 = arith.addf %77, %78 : vector<8x32xf32>
    %80 = arith.negf %79 : vector<8x32xf32>
    %81 = math.exp %80 : vector<8x32xf32>
    %cst_32 = arith.constant 1.000000e+00 : f32
    %82 = vector.broadcast %cst_32 : f32 to vector<8x32xf32>
    %83 = arith.addf %82, %81 : vector<8x32xf32>
    %84 = arith.divf %82, %83 : vector<8x32xf32>
    %85 = vector.extract_strided_slice %75 {offsets = [0, 128], sizes = [8, 32], strides = [1, 1]} : vector<8x384xf32> to vector<8x32xf32>
    %86 = vector.extract_strided_slice %76 {offsets = [0, 128], sizes = [8, 32], strides = [1, 1]} : vector<8x384xf32> to vector<8x32xf32>
    %87 = arith.addf %85, %86 : vector<8x32xf32>
    %88 = arith.negf %87 : vector<8x32xf32>
    %89 = math.exp %88 : vector<8x32xf32>
    %cst_33 = arith.constant 1.000000e+00 : f32
    %90 = vector.broadcast %cst_33 : f32 to vector<8x32xf32>
    %91 = arith.addf %90, %89 : vector<8x32xf32>
    %92 = arith.divf %90, %91 : vector<8x32xf32>
    %93 = vector.extract_strided_slice %75 {offsets = [0, 256], sizes = [8, 32], strides = [1, 1]} : vector<8x384xf32> to vector<8x32xf32>
    %94 = vector.extract_strided_slice %76 {offsets = [0, 256], sizes = [8, 32], strides = [1, 1]} : vector<8x384xf32> to vector<8x32xf32>
    %95 = arith.addf %94, %17 : vector<8x32xf32>
    %96 = arith.mulf %84, %95 : vector<8x32xf32>
    %97 = arith.addf %93, %96 : vector<8x32xf32>
    %98 = math.tanh %97 : vector<8x32xf32>
    %99 = arith.subf %73, %98 : vector<8x32xf32>
    %100 = arith.mulf %92, %99 : vector<8x32xf32>
    %101 = arith.addf %98, %100 : vector<8x32xf32>
    %c16_34 = arith.constant 16 : index
    %c0_35 = arith.constant 0 : index
    %102 = vector.load %arg16[%c16_34, %c0_35] : memref<128x32xf32, #tpu.memory_space<vmem>>, vector<8x32xf32>
    tpu.vector_store %arg16[%c16_34, %c0_35], %101 {strides = array<i32>} : memref<128x32xf32, #tpu.memory_space<vmem>>, vector<8x32xf32>,
    %c24 = arith.constant 24 : index
    %c0_36 = arith.constant 0 : index
    %103 = vector.load %arg14[%c24, %c0_36] : memref<128x384xf32, #tpu.memory_space<vmem>>, vector<8x384xf32>
    %cst_37 = arith.constant dense<0.000000e+00> : vector<8x384xf32>
    %104 = tpu.matmul %101, %14, %cst_37 {dimension_numbers = #tpu.dot_dimension_numbers<[1], [0], [0], [1], [0, 0, 1, 1], [], []>} : vector<8x32xf32>, vector<32x384xf32>, vector<8x384xf32> -> vector<8x384xf32>
    %105 = vector.extract_strided_slice %103 {offsets = [0, 0], sizes = [8, 32], strides = [1, 1]} : vector<8x384xf32> to vector<8x32xf32>
    %106 = vector.extract_strided_slice %104 {offsets = [0, 0], sizes = [8, 32], strides = [1, 1]} : vector<8x384xf32> to vector<8x32xf32>
    %107 = arith.addf %105, %106 : vector<8x32xf32>
    %108 = arith.negf %107 : vector<8x32xf32>
    %109 = math.exp %108 : vector<8x32xf32>
    %cst_38 = arith.constant 1.000000e+00 : f32
    %110 = vector.broadcast %cst_38 : f32 to vector<8x32xf32>
    %111 = arith.addf %110, %109 : vector<8x32xf32>
    %112 = arith.divf %110, %111 : vector<8x32xf32>
    %113 = vector.extract_strided_slice %103 {offsets = [0, 128], sizes = [8, 32], strides = [1, 1]} : vector<8x384xf32> to vector<8x32xf32>
    %114 = vector.extract_strided_slice %104 {offsets = [0, 128], sizes = [8, 32], strides = [1, 1]} : vector<8x384xf32> to vector<8x32xf32>
    %115 = arith.addf %113, %114 : vector<8x32xf32>
    %116 = arith.negf %115 : vector<8x32xf32>
    %117 = math.exp %116 : vector<8x32xf32>
    %cst_39 = arith.constant 1.000000e+00 : f32
    %118 = vector.broadcast %cst_39 : f32 to vector<8x32xf32>
    %119 = arith.addf %118, %117 : vector<8x32xf32>
    %120 = arith.divf %118, %119 : vector<8x32xf32>
    %121 = vector.extract_strided_slice %103 {offsets = [0, 256], sizes = [8, 32], strides = [1, 1]} : vector<8x384xf32> to vector<8x32xf32>
    %122 = vector.extract_strided_slice %104 {offsets = [0, 256], sizes = [8, 32], strides = [1, 1]} : vector<8x384xf32> to vector<8x32xf32>
    %123 = arith.addf %122, %17 : vector<8x32xf32>
    %124 = arith.mulf %112, %123 : vector<8x32xf32>
    %125 = arith.addf %121, %124 : vector<8x32xf32>
    %126 = math.tanh %125 : vector<8x32xf32>
    %127 = arith.subf %101, %126 : vector<8x32xf32>
    %128 = arith.mulf %120, %127 : vector<8x32xf32>
    %129 = arith.addf %126, %128 : vector<8x32xf32>
    %c24_40 = arith.constant 24 : index
    %c0_41 = arith.constant 0 : index
    %130 = vector.load %arg16[%c24_40, %c0_41] : memref<128x32xf32, #tpu.memory_space<vmem>>, vector<8x32xf32>
    tpu.vector_store %arg16[%c24_40, %c0_41], %129 {strides = array<i32>} : memref<128x32xf32, #tpu.memory_space<vmem>>, vector<8x32xf32>,
    %c32 = arith.constant 32 : index
    %c0_42 = arith.constant 0 : index
    %131 = vector.load %arg14[%c32, %c0_42] : memref<128x384xf32, #tpu.memory_space<vmem>>, vector<8x384xf32>
    %cst_43 = arith.constant dense<0.000000e+00> : vector<8x384xf32>
    %132 = tpu.matmul %129, %14, %cst_43 {dimension_numbers = #tpu.dot_dimension_numbers<[1], [0], [0], [1], [0, 0, 1, 1], [], []>} : vector<8x32xf32>, vector<32x384xf32>, vector<8x384xf32> -> vector<8x384xf32>
    %133 = vector.extract_strided_slice %131 {offsets = [0, 0], sizes = [8, 32], strides = [1, 1]} : vector<8x384xf32> to vector<8x32xf32>
    %134 = vector.extract_strided_slice %132 {offsets = [0, 0], sizes = [8, 32], strides = [1, 1]} : vector<8x384xf32> to vector<8x32xf32>
    %135 = arith.addf %133, %134 : vector<8x32xf32>
    %136 = arith.negf %135 : vector<8x32xf32>
    %137 = math.exp %136 : vector<8x32xf32>
    %cst_44 = arith.constant 1.000000e+00 : f32
    %138 = vector.broadcast %cst_44 : f32 to vector<8x32xf32>
    %139 = arith.addf %138, %137 : vector<8x32xf32>
    %140 = arith.divf %138, %139 : vector<8x32xf32>
    %141 = vector.extract_strided_slice %131 {offsets = [0, 128], sizes = [8, 32], strides = [1, 1]} : vector<8x384xf32> to vector<8x32xf32>
    %142 = vector.extract_strided_slice %132 {offsets = [0, 128], sizes = [8, 32], strides = [1, 1]} : vector<8x384xf32> to vector<8x32xf32>
    %143 = arith.addf %141, %142 : vector<8x32xf32>
    %144 = arith.negf %143 : vector<8x32xf32>
    %145 = math.exp %144 : vector<8x32xf32>
    %cst_45 = arith.constant 1.000000e+00 : f32
    %146 = vector.broadcast %cst_45 : f32 to vector<8x32xf32>
    %147 = arith.addf %146, %145 : vector<8x32xf32>
    %148 = arith.divf %146, %147 : vector<8x32xf32>
    %149 = vector.extract_strided_slice %131 {offsets = [0, 256], sizes = [8, 32], strides = [1, 1]} : vector<8x384xf32> to vector<8x32xf32>
    %150 = vector.extract_strided_slice %132 {offsets = [0, 256], sizes = [8, 32], strides = [1, 1]} : vector<8x384xf32> to vector<8x32xf32>
    %151 = arith.addf %150, %17 : vector<8x32xf32>
    %152 = arith.mulf %140, %151 : vector<8x32xf32>
    %153 = arith.addf %149, %152 : vector<8x32xf32>
    %154 = math.tanh %153 : vector<8x32xf32>
    %155 = arith.subf %129, %154 : vector<8x32xf32>
    %156 = arith.mulf %148, %155 : vector<8x32xf32>
    %157 = arith.addf %154, %156 : vector<8x32xf32>
    %c32_46 = arith.constant 32 : index
    %c0_47 = arith.constant 0 : index
    %158 = vector.load %arg16[%c32_46, %c0_47] : memref<128x32xf32, #tpu.memory_space<vmem>>, vector<8x32xf32>
    tpu.vector_store %arg16[%c32_46, %c0_47], %157 {strides = array<i32>} : memref<128x32xf32, #tpu.memory_space<vmem>>, vector<8x32xf32>,
    %c40 = arith.constant 40 : index
    %c0_48 = arith.constant 0 : index
    %159 = vector.load %arg14[%c40, %c0_48] : memref<128x384xf32, #tpu.memory_space<vmem>>, vector<8x384xf32>
    %cst_49 = arith.constant dense<0.000000e+00> : vector<8x384xf32>
    %160 = tpu.matmul %157, %14, %cst_49 {dimension_numbers = #tpu.dot_dimension_numbers<[1], [0], [0], [1], [0, 0, 1, 1], [], []>} : vector<8x32xf32>, vector<32x384xf32>, vector<8x384xf32> -> vector<8x384xf32>
    %161 = vector.extract_strided_slice %159 {offsets = [0, 0], sizes = [8, 32], strides = [1, 1]} : vector<8x384xf32> to vector<8x32xf32>
    %162 = vector.extract_strided_slice %160 {offsets = [0, 0], sizes = [8, 32], strides = [1, 1]} : vector<8x384xf32> to vector<8x32xf32>
    %163 = arith.addf %161, %162 : vector<8x32xf32>
    %164 = arith.negf %163 : vector<8x32xf32>
    %165 = math.exp %164 : vector<8x32xf32>
    %cst_50 = arith.constant 1.000000e+00 : f32
    %166 = vector.broadcast %cst_50 : f32 to vector<8x32xf32>
    %167 = arith.addf %166, %165 : vector<8x32xf32>
    %168 = arith.divf %166, %167 : vector<8x32xf32>
    %169 = vector.extract_strided_slice %159 {offsets = [0, 128], sizes = [8, 32], strides = [1, 1]} : vector<8x384xf32> to vector<8x32xf32>
    %170 = vector.extract_strided_slice %160 {offsets = [0, 128], sizes = [8, 32], strides = [1, 1]} : vector<8x384xf32> to vector<8x32xf32>
    %171 = arith.addf %169, %170 : vector<8x32xf32>
    %172 = arith.negf %171 : vector<8x32xf32>
    %173 = math.exp %172 : vector<8x32xf32>
    %cst_51 = arith.constant 1.000000e+00 : f32
    %174 = vector.broadcast %cst_51 : f32 to vector<8x32xf32>
    %175 = arith.addf %174, %173 : vector<8x32xf32>
    %176 = arith.divf %174, %175 : vector<8x32xf32>
    %177 = vector.extract_strided_slice %159 {offsets = [0, 256], sizes = [8, 32], strides = [1, 1]} : vector<8x384xf32> to vector<8x32xf32>
    %178 = vector.extract_strided_slice %160 {offsets = [0, 256], sizes = [8, 32], strides = [1, 1]} : vector<8x384xf32> to vector<8x32xf32>
    %179 = arith.addf %178, %17 : vector<8x32xf32>
    %180 = arith.mulf %168, %179 : vector<8x32xf32>
    %181 = arith.addf %177, %180 : vector<8x32xf32>
    %182 = math.tanh %181 : vector<8x32xf32>
    %183 = arith.subf %157, %182 : vector<8x32xf32>
    %184 = arith.mulf %176, %183 : vector<8x32xf32>
    %185 = arith.addf %182, %184 : vector<8x32xf32>
    %c40_52 = arith.constant 40 : index
    %c0_53 = arith.constant 0 : index
    %186 = vector.load %arg16[%c40_52, %c0_53] : memref<128x32xf32, #tpu.memory_space<vmem>>, vector<8x32xf32>
    tpu.vector_store %arg16[%c40_52, %c0_53], %185 {strides = array<i32>} : memref<128x32xf32, #tpu.memory_space<vmem>>, vector<8x32xf32>,
    %c48 = arith.constant 48 : index
    %c0_54 = arith.constant 0 : index
    %187 = vector.load %arg14[%c48, %c0_54] : memref<128x384xf32, #tpu.memory_space<vmem>>, vector<8x384xf32>
    %cst_55 = arith.constant dense<0.000000e+00> : vector<8x384xf32>
    %188 = tpu.matmul %185, %14, %cst_55 {dimension_numbers = #tpu.dot_dimension_numbers<[1], [0], [0], [1], [0, 0, 1, 1], [], []>} : vector<8x32xf32>, vector<32x384xf32>, vector<8x384xf32> -> vector<8x384xf32>
    %189 = vector.extract_strided_slice %187 {offsets = [0, 0], sizes = [8, 32], strides = [1, 1]} : vector<8x384xf32> to vector<8x32xf32>
    %190 = vector.extract_strided_slice %188 {offsets = [0, 0], sizes = [8, 32], strides = [1, 1]} : vector<8x384xf32> to vector<8x32xf32>
    %191 = arith.addf %189, %190 : vector<8x32xf32>
    %192 = arith.negf %191 : vector<8x32xf32>
    %193 = math.exp %192 : vector<8x32xf32>
    %cst_56 = arith.constant 1.000000e+00 : f32
    %194 = vector.broadcast %cst_56 : f32 to vector<8x32xf32>
    %195 = arith.addf %194, %193 : vector<8x32xf32>
    %196 = arith.divf %194, %195 : vector<8x32xf32>
    %197 = vector.extract_strided_slice %187 {offsets = [0, 128], sizes = [8, 32], strides = [1, 1]} : vector<8x384xf32> to vector<8x32xf32>
    %198 = vector.extract_strided_slice %188 {offsets = [0, 128], sizes = [8, 32], strides = [1, 1]} : vector<8x384xf32> to vector<8x32xf32>
    %199 = arith.addf %197, %198 : vector<8x32xf32>
    %200 = arith.negf %199 : vector<8x32xf32>
    %201 = math.exp %200 : vector<8x32xf32>
    %cst_57 = arith.constant 1.000000e+00 : f32
    %202 = vector.broadcast %cst_57 : f32 to vector<8x32xf32>
    %203 = arith.addf %202, %201 : vector<8x32xf32>
    %204 = arith.divf %202, %203 : vector<8x32xf32>
    %205 = vector.extract_strided_slice %187 {offsets = [0, 256], sizes = [8, 32], strides = [1, 1]} : vector<8x384xf32> to vector<8x32xf32>
    %206 = vector.extract_strided_slice %188 {offsets = [0, 256], sizes = [8, 32], strides = [1, 1]} : vector<8x384xf32> to vector<8x32xf32>
    %207 = arith.addf %206, %17 : vector<8x32xf32>
    %208 = arith.mulf %196, %207 : vector<8x32xf32>
    %209 = arith.addf %205, %208 : vector<8x32xf32>
    %210 = math.tanh %209 : vector<8x32xf32>
    %211 = arith.subf %185, %210 : vector<8x32xf32>
    %212 = arith.mulf %204, %211 : vector<8x32xf32>
    %213 = arith.addf %210, %212 : vector<8x32xf32>
    %c48_58 = arith.constant 48 : index
    %c0_59 = arith.constant 0 : index
    %214 = vector.load %arg16[%c48_58, %c0_59] : memref<128x32xf32, #tpu.memory_space<vmem>>, vector<8x32xf32>
    tpu.vector_store %arg16[%c48_58, %c0_59], %213 {strides = array<i32>} : memref<128x32xf32, #tpu.memory_space<vmem>>, vector<8x32xf32>,
    %c56 = arith.constant 56 : index
    %c0_60 = arith.constant 0 : index
    %215 = vector.load %arg14[%c56, %c0_60] : memref<128x384xf32, #tpu.memory_space<vmem>>, vector<8x384xf32>
    %cst_61 = arith.constant dense<0.000000e+00> : vector<8x384xf32>
    %216 = tpu.matmul %213, %14, %cst_61 {dimension_numbers = #tpu.dot_dimension_numbers<[1], [0], [0], [1], [0, 0, 1, 1], [], []>} : vector<8x32xf32>, vector<32x384xf32>, vector<8x384xf32> -> vector<8x384xf32>
    %217 = vector.extract_strided_slice %215 {offsets = [0, 0], sizes = [8, 32], strides = [1, 1]} : vector<8x384xf32> to vector<8x32xf32>
    %218 = vector.extract_strided_slice %216 {offsets = [0, 0], sizes = [8, 32], strides = [1, 1]} : vector<8x384xf32> to vector<8x32xf32>
    %219 = arith.addf %217, %218 : vector<8x32xf32>
    %220 = arith.negf %219 : vector<8x32xf32>
    %221 = math.exp %220 : vector<8x32xf32>
    %cst_62 = arith.constant 1.000000e+00 : f32
    %222 = vector.broadcast %cst_62 : f32 to vector<8x32xf32>
    %223 = arith.addf %222, %221 : vector<8x32xf32>
    %224 = arith.divf %222, %223 : vector<8x32xf32>
    %225 = vector.extract_strided_slice %215 {offsets = [0, 128], sizes = [8, 32], strides = [1, 1]} : vector<8x384xf32> to vector<8x32xf32>
    %226 = vector.extract_strided_slice %216 {offsets = [0, 128], sizes = [8, 32], strides = [1, 1]} : vector<8x384xf32> to vector<8x32xf32>
    %227 = arith.addf %225, %226 : vector<8x32xf32>
    %228 = arith.negf %227 : vector<8x32xf32>
    %229 = math.exp %228 : vector<8x32xf32>
    %cst_63 = arith.constant 1.000000e+00 : f32
    %230 = vector.broadcast %cst_63 : f32 to vector<8x32xf32>
    %231 = arith.addf %230, %229 : vector<8x32xf32>
    %232 = arith.divf %230, %231 : vector<8x32xf32>
    %233 = vector.extract_strided_slice %215 {offsets = [0, 256], sizes = [8, 32], strides = [1, 1]} : vector<8x384xf32> to vector<8x32xf32>
    %234 = vector.extract_strided_slice %216 {offsets = [0, 256], sizes = [8, 32], strides = [1, 1]} : vector<8x384xf32> to vector<8x32xf32>
    %235 = arith.addf %234, %17 : vector<8x32xf32>
    %236 = arith.mulf %224, %235 : vector<8x32xf32>
    %237 = arith.addf %233, %236 : vector<8x32xf32>
    %238 = math.tanh %237 : vector<8x32xf32>
    %239 = arith.subf %213, %238 : vector<8x32xf32>
    %240 = arith.mulf %232, %239 : vector<8x32xf32>
    %241 = arith.addf %238, %240 : vector<8x32xf32>
    %c56_64 = arith.constant 56 : index
    %c0_65 = arith.constant 0 : index
    %242 = vector.load %arg16[%c56_64, %c0_65] : memref<128x32xf32, #tpu.memory_space<vmem>>, vector<8x32xf32>
    tpu.vector_store %arg16[%c56_64, %c0_65], %241 {strides = array<i32>} : memref<128x32xf32, #tpu.memory_space<vmem>>, vector<8x32xf32>,
    %c64 = arith.constant 64 : index
    %c0_66 = arith.constant 0 : index
    %243 = vector.load %arg14[%c64, %c0_66] : memref<128x384xf32, #tpu.memory_space<vmem>>, vector<8x384xf32>
    %cst_67 = arith.constant dense<0.000000e+00> : vector<8x384xf32>
    %244 = tpu.matmul %241, %14, %cst_67 {dimension_numbers = #tpu.dot_dimension_numbers<[1], [0], [0], [1], [0, 0, 1, 1], [], []>} : vector<8x32xf32>, vector<32x384xf32>, vector<8x384xf32> -> vector<8x384xf32>
    %245 = vector.extract_strided_slice %243 {offsets = [0, 0], sizes = [8, 32], strides = [1, 1]} : vector<8x384xf32> to vector<8x32xf32>
    %246 = vector.extract_strided_slice %244 {offsets = [0, 0], sizes = [8, 32], strides = [1, 1]} : vector<8x384xf32> to vector<8x32xf32>
    %247 = arith.addf %245, %246 : vector<8x32xf32>
    %248 = arith.negf %247 : vector<8x32xf32>
    %249 = math.exp %248 : vector<8x32xf32>
    %cst_68 = arith.constant 1.000000e+00 : f32
    %250 = vector.broadcast %cst_68 : f32 to vector<8x32xf32>
    %251 = arith.addf %250, %249 : vector<8x32xf32>
    %252 = arith.divf %250, %251 : vector<8x32xf32>
    %253 = vector.extract_strided_slice %243 {offsets = [0, 128], sizes = [8, 32], strides = [1, 1]} : vector<8x384xf32> to vector<8x32xf32>
    %254 = vector.extract_strided_slice %244 {offsets = [0, 128], sizes = [8, 32], strides = [1, 1]} : vector<8x384xf32> to vector<8x32xf32>
    %255 = arith.addf %253, %254 : vector<8x32xf32>
    %256 = arith.negf %255 : vector<8x32xf32>
    %257 = math.exp %256 : vector<8x32xf32>
    %cst_69 = arith.constant 1.000000e+00 : f32
    %258 = vector.broadcast %cst_69 : f32 to vector<8x32xf32>
    %259 = arith.addf %258, %257 : vector<8x32xf32>
    %260 = arith.divf %258, %259 : vector<8x32xf32>
    %261 = vector.extract_strided_slice %243 {offsets = [0, 256], sizes = [8, 32], strides = [1, 1]} : vector<8x384xf32> to vector<8x32xf32>
    %262 = vector.extract_strided_slice %244 {offsets = [0, 256], sizes = [8, 32], strides = [1, 1]} : vector<8x384xf32> to vector<8x32xf32>
    %263 = arith.addf %262, %17 : vector<8x32xf32>
    %264 = arith.mulf %252, %263 : vector<8x32xf32>
    %265 = arith.addf %261, %264 : vector<8x32xf32>
    %266 = math.tanh %265 : vector<8x32xf32>
    %267 = arith.subf %241, %266 : vector<8x32xf32>
    %268 = arith.mulf %260, %267 : vector<8x32xf32>
    %269 = arith.addf %266, %268 : vector<8x32xf32>
    %c64_70 = arith.constant 64 : index
    %c0_71 = arith.constant 0 : index
    %270 = vector.load %arg16[%c64_70, %c0_71] : memref<128x32xf32, #tpu.memory_space<vmem>>, vector<8x32xf32>
    tpu.vector_store %arg16[%c64_70, %c0_71], %269 {strides = array<i32>} : memref<128x32xf32, #tpu.memory_space<vmem>>, vector<8x32xf32>,
    %c72 = arith.constant 72 : index
    %c0_72 = arith.constant 0 : index
    %271 = vector.load %arg14[%c72, %c0_72] : memref<128x384xf32, #tpu.memory_space<vmem>>, vector<8x384xf32>
    %cst_73 = arith.constant dense<0.000000e+00> : vector<8x384xf32>
    %272 = tpu.matmul %269, %14, %cst_73 {dimension_numbers = #tpu.dot_dimension_numbers<[1], [0], [0], [1], [0, 0, 1, 1], [], []>} : vector<8x32xf32>, vector<32x384xf32>, vector<8x384xf32> -> vector<8x384xf32>
    %273 = vector.extract_strided_slice %271 {offsets = [0, 0], sizes = [8, 32], strides = [1, 1]} : vector<8x384xf32> to vector<8x32xf32>
    %274 = vector.extract_strided_slice %272 {offsets = [0, 0], sizes = [8, 32], strides = [1, 1]} : vector<8x384xf32> to vector<8x32xf32>
    %275 = arith.addf %273, %274 : vector<8x32xf32>
    %276 = arith.negf %275 : vector<8x32xf32>
    %277 = math.exp %276 : vector<8x32xf32>
    %cst_74 = arith.constant 1.000000e+00 : f32
    %278 = vector.broadcast %cst_74 : f32 to vector<8x32xf32>
    %279 = arith.addf %278, %277 : vector<8x32xf32>
    %280 = arith.divf %278, %279 : vector<8x32xf32>
    %281 = vector.extract_strided_slice %271 {offsets = [0, 128], sizes = [8, 32], strides = [1, 1]} : vector<8x384xf32> to vector<8x32xf32>
    %282 = vector.extract_strided_slice %272 {offsets = [0, 128], sizes = [8, 32], strides = [1, 1]} : vector<8x384xf32> to vector<8x32xf32>
    %283 = arith.addf %281, %282 : vector<8x32xf32>
    %284 = arith.negf %283 : vector<8x32xf32>
    %285 = math.exp %284 : vector<8x32xf32>
    %cst_75 = arith.constant 1.000000e+00 : f32
    %286 = vector.broadcast %cst_75 : f32 to vector<8x32xf32>
    %287 = arith.addf %286, %285 : vector<8x32xf32>
    %288 = arith.divf %286, %287 : vector<8x32xf32>
    %289 = vector.extract_strided_slice %271 {offsets = [0, 256], sizes = [8, 32], strides = [1, 1]} : vector<8x384xf32> to vector<8x32xf32>
    %290 = vector.extract_strided_slice %272 {offsets = [0, 256], sizes = [8, 32], strides = [1, 1]} : vector<8x384xf32> to vector<8x32xf32>
    %291 = arith.addf %290, %17 : vector<8x32xf32>
    %292 = arith.mulf %280, %291 : vector<8x32xf32>
    %293 = arith.addf %289, %292 : vector<8x32xf32>
    %294 = math.tanh %293 : vector<8x32xf32>
    %295 = arith.subf %269, %294 : vector<8x32xf32>
    %296 = arith.mulf %288, %295 : vector<8x32xf32>
    %297 = arith.addf %294, %296 : vector<8x32xf32>
    %c72_76 = arith.constant 72 : index
    %c0_77 = arith.constant 0 : index
    %298 = vector.load %arg16[%c72_76, %c0_77] : memref<128x32xf32, #tpu.memory_space<vmem>>, vector<8x32xf32>
    tpu.vector_store %arg16[%c72_76, %c0_77], %297 {strides = array<i32>} : memref<128x32xf32, #tpu.memory_space<vmem>>, vector<8x32xf32>,
    %c80 = arith.constant 80 : index
    %c0_78 = arith.constant 0 : index
    %299 = vector.load %arg14[%c80, %c0_78] : memref<128x384xf32, #tpu.memory_space<vmem>>, vector<8x384xf32>
    %cst_79 = arith.constant dense<0.000000e+00> : vector<8x384xf32>
    %300 = tpu.matmul %297, %14, %cst_79 {dimension_numbers = #tpu.dot_dimension_numbers<[1], [0], [0], [1], [0, 0, 1, 1], [], []>} : vector<8x32xf32>, vector<32x384xf32>, vector<8x384xf32> -> vector<8x384xf32>
    %301 = vector.extract_strided_slice %299 {offsets = [0, 0], sizes = [8, 32], strides = [1, 1]} : vector<8x384xf32> to vector<8x32xf32>
    %302 = vector.extract_strided_slice %300 {offsets = [0, 0], sizes = [8, 32], strides = [1, 1]} : vector<8x384xf32> to vector<8x32xf32>
    %303 = arith.addf %301, %302 : vector<8x32xf32>
    %304 = arith.negf %303 : vector<8x32xf32>
    %305 = math.exp %304 : vector<8x32xf32>
    %cst_80 = arith.constant 1.000000e+00 : f32
    %306 = vector.broadcast %cst_80 : f32 to vector<8x32xf32>
    %307 = arith.addf %306, %305 : vector<8x32xf32>
    %308 = arith.divf %306, %307 : vector<8x32xf32>
    %309 = vector.extract_strided_slice %299 {offsets = [0, 128], sizes = [8, 32], strides = [1, 1]} : vector<8x384xf32> to vector<8x32xf32>
    %310 = vector.extract_strided_slice %300 {offsets = [0, 128], sizes = [8, 32], strides = [1, 1]} : vector<8x384xf32> to vector<8x32xf32>
    %311 = arith.addf %309, %310 : vector<8x32xf32>
    %312 = arith.negf %311 : vector<8x32xf32>
    %313 = math.exp %312 : vector<8x32xf32>
    %cst_81 = arith.constant 1.000000e+00 : f32
    %314 = vector.broadcast %cst_81 : f32 to vector<8x32xf32>
    %315 = arith.addf %314, %313 : vector<8x32xf32>
    %316 = arith.divf %314, %315 : vector<8x32xf32>
    %317 = vector.extract_strided_slice %299 {offsets = [0, 256], sizes = [8, 32], strides = [1, 1]} : vector<8x384xf32> to vector<8x32xf32>
    %318 = vector.extract_strided_slice %300 {offsets = [0, 256], sizes = [8, 32], strides = [1, 1]} : vector<8x384xf32> to vector<8x32xf32>
    %319 = arith.addf %318, %17 : vector<8x32xf32>
    %320 = arith.mulf %308, %319 : vector<8x32xf32>
    %321 = arith.addf %317, %320 : vector<8x32xf32>
    %322 = math.tanh %321 : vector<8x32xf32>
    %323 = arith.subf %297, %322 : vector<8x32xf32>
    %324 = arith.mulf %316, %323 : vector<8x32xf32>
    %325 = arith.addf %322, %324 : vector<8x32xf32>
    %c80_82 = arith.constant 80 : index
    %c0_83 = arith.constant 0 : index
    %326 = vector.load %arg16[%c80_82, %c0_83] : memref<128x32xf32, #tpu.memory_space<vmem>>, vector<8x32xf32>
    tpu.vector_store %arg16[%c80_82, %c0_83], %325 {strides = array<i32>} : memref<128x32xf32, #tpu.memory_space<vmem>>, vector<8x32xf32>,
    %c88 = arith.constant 88 : index
    %c0_84 = arith.constant 0 : index
    %327 = vector.load %arg14[%c88, %c0_84] : memref<128x384xf32, #tpu.memory_space<vmem>>, vector<8x384xf32>
    %cst_85 = arith.constant dense<0.000000e+00> : vector<8x384xf32>
    %328 = tpu.matmul %325, %14, %cst_85 {dimension_numbers = #tpu.dot_dimension_numbers<[1], [0], [0], [1], [0, 0, 1, 1], [], []>} : vector<8x32xf32>, vector<32x384xf32>, vector<8x384xf32> -> vector<8x384xf32>
    %329 = vector.extract_strided_slice %327 {offsets = [0, 0], sizes = [8, 32], strides = [1, 1]} : vector<8x384xf32> to vector<8x32xf32>
    %330 = vector.extract_strided_slice %328 {offsets = [0, 0], sizes = [8, 32], strides = [1, 1]} : vector<8x384xf32> to vector<8x32xf32>
    %331 = arith.addf %329, %330 : vector<8x32xf32>
    %332 = arith.negf %331 : vector<8x32xf32>
    %333 = math.exp %332 : vector<8x32xf32>
    %cst_86 = arith.constant 1.000000e+00 : f32
    %334 = vector.broadcast %cst_86 : f32 to vector<8x32xf32>
    %335 = arith.addf %334, %333 : vector<8x32xf32>
    %336 = arith.divf %334, %335 : vector<8x32xf32>
    %337 = vector.extract_strided_slice %327 {offsets = [0, 128], sizes = [8, 32], strides = [1, 1]} : vector<8x384xf32> to vector<8x32xf32>
    %338 = vector.extract_strided_slice %328 {offsets = [0, 128], sizes = [8, 32], strides = [1, 1]} : vector<8x384xf32> to vector<8x32xf32>
    %339 = arith.addf %337, %338 : vector<8x32xf32>
    %340 = arith.negf %339 : vector<8x32xf32>
    %341 = math.exp %340 : vector<8x32xf32>
    %cst_87 = arith.constant 1.000000e+00 : f32
    %342 = vector.broadcast %cst_87 : f32 to vector<8x32xf32>
    %343 = arith.addf %342, %341 : vector<8x32xf32>
    %344 = arith.divf %342, %343 : vector<8x32xf32>
    %345 = vector.extract_strided_slice %327 {offsets = [0, 256], sizes = [8, 32], strides = [1, 1]} : vector<8x384xf32> to vector<8x32xf32>
    %346 = vector.extract_strided_slice %328 {offsets = [0, 256], sizes = [8, 32], strides = [1, 1]} : vector<8x384xf32> to vector<8x32xf32>
    %347 = arith.addf %346, %17 : vector<8x32xf32>
    %348 = arith.mulf %336, %347 : vector<8x32xf32>
    %349 = arith.addf %345, %348 : vector<8x32xf32>
    %350 = math.tanh %349 : vector<8x32xf32>
    %351 = arith.subf %325, %350 : vector<8x32xf32>
    %352 = arith.mulf %344, %351 : vector<8x32xf32>
    %353 = arith.addf %350, %352 : vector<8x32xf32>
    %c88_88 = arith.constant 88 : index
    %c0_89 = arith.constant 0 : index
    %354 = vector.load %arg16[%c88_88, %c0_89] : memref<128x32xf32, #tpu.memory_space<vmem>>, vector<8x32xf32>
    tpu.vector_store %arg16[%c88_88, %c0_89], %353 {strides = array<i32>} : memref<128x32xf32, #tpu.memory_space<vmem>>, vector<8x32xf32>,
    %c96 = arith.constant 96 : index
    %c0_90 = arith.constant 0 : index
    %355 = vector.load %arg14[%c96, %c0_90] : memref<128x384xf32, #tpu.memory_space<vmem>>, vector<8x384xf32>
    %cst_91 = arith.constant dense<0.000000e+00> : vector<8x384xf32>
    %356 = tpu.matmul %353, %14, %cst_91 {dimension_numbers = #tpu.dot_dimension_numbers<[1], [0], [0], [1], [0, 0, 1, 1], [], []>} : vector<8x32xf32>, vector<32x384xf32>, vector<8x384xf32> -> vector<8x384xf32>
    %357 = vector.extract_strided_slice %355 {offsets = [0, 0], sizes = [8, 32], strides = [1, 1]} : vector<8x384xf32> to vector<8x32xf32>
    %358 = vector.extract_strided_slice %356 {offsets = [0, 0], sizes = [8, 32], strides = [1, 1]} : vector<8x384xf32> to vector<8x32xf32>
    %359 = arith.addf %357, %358 : vector<8x32xf32>
    %360 = arith.negf %359 : vector<8x32xf32>
    %361 = math.exp %360 : vector<8x32xf32>
    %cst_92 = arith.constant 1.000000e+00 : f32
    %362 = vector.broadcast %cst_92 : f32 to vector<8x32xf32>
    %363 = arith.addf %362, %361 : vector<8x32xf32>
    %364 = arith.divf %362, %363 : vector<8x32xf32>
    %365 = vector.extract_strided_slice %355 {offsets = [0, 128], sizes = [8, 32], strides = [1, 1]} : vector<8x384xf32> to vector<8x32xf32>
    %366 = vector.extract_strided_slice %356 {offsets = [0, 128], sizes = [8, 32], strides = [1, 1]} : vector<8x384xf32> to vector<8x32xf32>
    %367 = arith.addf %365, %366 : vector<8x32xf32>
    %368 = arith.negf %367 : vector<8x32xf32>
    %369 = math.exp %368 : vector<8x32xf32>
    %cst_93 = arith.constant 1.000000e+00 : f32
    %370 = vector.broadcast %cst_93 : f32 to vector<8x32xf32>
    %371 = arith.addf %370, %369 : vector<8x32xf32>
    %372 = arith.divf %370, %371 : vector<8x32xf32>
    %373 = vector.extract_strided_slice %355 {offsets = [0, 256], sizes = [8, 32], strides = [1, 1]} : vector<8x384xf32> to vector<8x32xf32>
    %374 = vector.extract_strided_slice %356 {offsets = [0, 256], sizes = [8, 32], strides = [1, 1]} : vector<8x384xf32> to vector<8x32xf32>
    %375 = arith.addf %374, %17 : vector<8x32xf32>
    %376 = arith.mulf %364, %375 : vector<8x32xf32>
    %377 = arith.addf %373, %376 : vector<8x32xf32>
    %378 = math.tanh %377 : vector<8x32xf32>
    %379 = arith.subf %353, %378 : vector<8x32xf32>
    %380 = arith.mulf %372, %379 : vector<8x32xf32>
    %381 = arith.addf %378, %380 : vector<8x32xf32>
    %c96_94 = arith.constant 96 : index
    %c0_95 = arith.constant 0 : index
    %382 = vector.load %arg16[%c96_94, %c0_95] : memref<128x32xf32, #tpu.memory_space<vmem>>, vector<8x32xf32>
    tpu.vector_store %arg16[%c96_94, %c0_95], %381 {strides = array<i32>} : memref<128x32xf32, #tpu.memory_space<vmem>>, vector<8x32xf32>,
    %c104 = arith.constant 104 : index
    %c0_96 = arith.constant 0 : index
    %383 = vector.load %arg14[%c104, %c0_96] : memref<128x384xf32, #tpu.memory_space<vmem>>, vector<8x384xf32>
    %cst_97 = arith.constant dense<0.000000e+00> : vector<8x384xf32>
    %384 = tpu.matmul %381, %14, %cst_97 {dimension_numbers = #tpu.dot_dimension_numbers<[1], [0], [0], [1], [0, 0, 1, 1], [], []>} : vector<8x32xf32>, vector<32x384xf32>, vector<8x384xf32> -> vector<8x384xf32>
    %385 = vector.extract_strided_slice %383 {offsets = [0, 0], sizes = [8, 32], strides = [1, 1]} : vector<8x384xf32> to vector<8x32xf32>
    %386 = vector.extract_strided_slice %384 {offsets = [0, 0], sizes = [8, 32], strides = [1, 1]} : vector<8x384xf32> to vector<8x32xf32>
    %387 = arith.addf %385, %386 : vector<8x32xf32>
    %388 = arith.negf %387 : vector<8x32xf32>
    %389 = math.exp %388 : vector<8x32xf32>
    %cst_98 = arith.constant 1.000000e+00 : f32
    %390 = vector.broadcast %cst_98 : f32 to vector<8x32xf32>
    %391 = arith.addf %390, %389 : vector<8x32xf32>
    %392 = arith.divf %390, %391 : vector<8x32xf32>
    %393 = vector.extract_strided_slice %383 {offsets = [0, 128], sizes = [8, 32], strides = [1, 1]} : vector<8x384xf32> to vector<8x32xf32>
    %394 = vector.extract_strided_slice %384 {offsets = [0, 128], sizes = [8, 32], strides = [1, 1]} : vector<8x384xf32> to vector<8x32xf32>
    %395 = arith.addf %393, %394 : vector<8x32xf32>
    %396 = arith.negf %395 : vector<8x32xf32>
    %397 = math.exp %396 : vector<8x32xf32>
    %cst_99 = arith.constant 1.000000e+00 : f32
    %398 = vector.broadcast %cst_99 : f32 to vector<8x32xf32>
    %399 = arith.addf %398, %397 : vector<8x32xf32>
    %400 = arith.divf %398, %399 : vector<8x32xf32>
    %401 = vector.extract_strided_slice %383 {offsets = [0, 256], sizes = [8, 32], strides = [1, 1]} : vector<8x384xf32> to vector<8x32xf32>
    %402 = vector.extract_strided_slice %384 {offsets = [0, 256], sizes = [8, 32], strides = [1, 1]} : vector<8x384xf32> to vector<8x32xf32>
    %403 = arith.addf %402, %17 : vector<8x32xf32>
    %404 = arith.mulf %392, %403 : vector<8x32xf32>
    %405 = arith.addf %401, %404 : vector<8x32xf32>
    %406 = math.tanh %405 : vector<8x32xf32>
    %407 = arith.subf %381, %406 : vector<8x32xf32>
    %408 = arith.mulf %400, %407 : vector<8x32xf32>
    %409 = arith.addf %406, %408 : vector<8x32xf32>
    %c104_100 = arith.constant 104 : index
    %c0_101 = arith.constant 0 : index
    %410 = vector.load %arg16[%c104_100, %c0_101] : memref<128x32xf32, #tpu.memory_space<vmem>>, vector<8x32xf32>
    tpu.vector_store %arg16[%c104_100, %c0_101], %409 {strides = array<i32>} : memref<128x32xf32, #tpu.memory_space<vmem>>, vector<8x32xf32>,
    %c112 = arith.constant 112 : index
    %c0_102 = arith.constant 0 : index
    %411 = vector.load %arg14[%c112, %c0_102] : memref<128x384xf32, #tpu.memory_space<vmem>>, vector<8x384xf32>
    %cst_103 = arith.constant dense<0.000000e+00> : vector<8x384xf32>
    %412 = tpu.matmul %409, %14, %cst_103 {dimension_numbers = #tpu.dot_dimension_numbers<[1], [0], [0], [1], [0, 0, 1, 1], [], []>} : vector<8x32xf32>, vector<32x384xf32>, vector<8x384xf32> -> vector<8x384xf32>
    %413 = vector.extract_strided_slice %411 {offsets = [0, 0], sizes = [8, 32], strides = [1, 1]} : vector<8x384xf32> to vector<8x32xf32>
    %414 = vector.extract_strided_slice %412 {offsets = [0, 0], sizes = [8, 32], strides = [1, 1]} : vector<8x384xf32> to vector<8x32xf32>
    %415 = arith.addf %413, %414 : vector<8x32xf32>
    %416 = arith.negf %415 : vector<8x32xf32>
    %417 = math.exp %416 : vector<8x32xf32>
    %cst_104 = arith.constant 1.000000e+00 : f32
    %418 = vector.broadcast %cst_104 : f32 to vector<8x32xf32>
    %419 = arith.addf %418, %417 : vector<8x32xf32>
    %420 = arith.divf %418, %419 : vector<8x32xf32>
    %421 = vector.extract_strided_slice %411 {offsets = [0, 128], sizes = [8, 32], strides = [1, 1]} : vector<8x384xf32> to vector<8x32xf32>
    %422 = vector.extract_strided_slice %412 {offsets = [0, 128], sizes = [8, 32], strides = [1, 1]} : vector<8x384xf32> to vector<8x32xf32>
    %423 = arith.addf %421, %422 : vector<8x32xf32>
    %424 = arith.negf %423 : vector<8x32xf32>
    %425 = math.exp %424 : vector<8x32xf32>
    %cst_105 = arith.constant 1.000000e+00 : f32
    %426 = vector.broadcast %cst_105 : f32 to vector<8x32xf32>
    %427 = arith.addf %426, %425 : vector<8x32xf32>
    %428 = arith.divf %426, %427 : vector<8x32xf32>
    %429 = vector.extract_strided_slice %411 {offsets = [0, 256], sizes = [8, 32], strides = [1, 1]} : vector<8x384xf32> to vector<8x32xf32>
    %430 = vector.extract_strided_slice %412 {offsets = [0, 256], sizes = [8, 32], strides = [1, 1]} : vector<8x384xf32> to vector<8x32xf32>
    %431 = arith.addf %430, %17 : vector<8x32xf32>
    %432 = arith.mulf %420, %431 : vector<8x32xf32>
    %433 = arith.addf %429, %432 : vector<8x32xf32>
    %434 = math.tanh %433 : vector<8x32xf32>
    %435 = arith.subf %409, %434 : vector<8x32xf32>
    %436 = arith.mulf %428, %435 : vector<8x32xf32>
    %437 = arith.addf %434, %436 : vector<8x32xf32>
    %c112_106 = arith.constant 112 : index
    %c0_107 = arith.constant 0 : index
    %438 = vector.load %arg16[%c112_106, %c0_107] : memref<128x32xf32, #tpu.memory_space<vmem>>, vector<8x32xf32>
    tpu.vector_store %arg16[%c112_106, %c0_107], %437 {strides = array<i32>} : memref<128x32xf32, #tpu.memory_space<vmem>>, vector<8x32xf32>,
    %c120 = arith.constant 120 : index
    %c0_108 = arith.constant 0 : index
    %439 = vector.load %arg14[%c120, %c0_108] : memref<128x384xf32, #tpu.memory_space<vmem>>, vector<8x384xf32>
    %cst_109 = arith.constant dense<0.000000e+00> : vector<8x384xf32>
    %440 = tpu.matmul %437, %14, %cst_109 {dimension_numbers = #tpu.dot_dimension_numbers<[1], [0], [0], [1], [0, 0, 1, 1], [], []>} : vector<8x32xf32>, vector<32x384xf32>, vector<8x384xf32> -> vector<8x384xf32>
    %441 = vector.extract_strided_slice %439 {offsets = [0, 0], sizes = [8, 32], strides = [1, 1]} : vector<8x384xf32> to vector<8x32xf32>
    %442 = vector.extract_strided_slice %440 {offsets = [0, 0], sizes = [8, 32], strides = [1, 1]} : vector<8x384xf32> to vector<8x32xf32>
    %443 = arith.addf %441, %442 : vector<8x32xf32>
    %444 = arith.negf %443 : vector<8x32xf32>
    %445 = math.exp %444 : vector<8x32xf32>
    %cst_110 = arith.constant 1.000000e+00 : f32
    %446 = vector.broadcast %cst_110 : f32 to vector<8x32xf32>
    %447 = arith.addf %446, %445 : vector<8x32xf32>
    %448 = arith.divf %446, %447 : vector<8x32xf32>
    %449 = vector.extract_strided_slice %439 {offsets = [0, 128], sizes = [8, 32], strides = [1, 1]} : vector<8x384xf32> to vector<8x32xf32>
    %450 = vector.extract_strided_slice %440 {offsets = [0, 128], sizes = [8, 32], strides = [1, 1]} : vector<8x384xf32> to vector<8x32xf32>
    %451 = arith.addf %449, %450 : vector<8x32xf32>
    %452 = arith.negf %451 : vector<8x32xf32>
    %453 = math.exp %452 : vector<8x32xf32>
    %cst_111 = arith.constant 1.000000e+00 : f32
    %454 = vector.broadcast %cst_111 : f32 to vector<8x32xf32>
    %455 = arith.addf %454, %453 : vector<8x32xf32>
    %456 = arith.divf %454, %455 : vector<8x32xf32>
    %457 = vector.extract_strided_slice %439 {offsets = [0, 256], sizes = [8, 32], strides = [1, 1]} : vector<8x384xf32> to vector<8x32xf32>
    %458 = vector.extract_strided_slice %440 {offsets = [0, 256], sizes = [8, 32], strides = [1, 1]} : vector<8x384xf32> to vector<8x32xf32>
    %459 = arith.addf %458, %17 : vector<8x32xf32>
    %460 = arith.mulf %448, %459 : vector<8x32xf32>
    %461 = arith.addf %457, %460 : vector<8x32xf32>
    %462 = math.tanh %461 : vector<8x32xf32>
    %463 = arith.subf %437, %462 : vector<8x32xf32>
    %464 = arith.mulf %456, %463 : vector<8x32xf32>
    %465 = arith.addf %462, %464 : vector<8x32xf32>
    %c120_112 = arith.constant 120 : index
    %c0_113 = arith.constant 0 : index
    %466 = vector.load %arg16[%c120_112, %c0_113] : memref<128x32xf32, #tpu.memory_space<vmem>>, vector<8x32xf32>
    tpu.vector_store %arg16[%c120_112, %c0_113], %465 {strides = array<i32>} : memref<128x32xf32, #tpu.memory_space<vmem>>, vector<8x32xf32>,
    %c0_114 = arith.constant 0 : index
    %c0_115 = arith.constant 0 : index
    %467 = vector.load %arg16[%c0_114, %c0_115] : memref<128x32xf32, #tpu.memory_space<vmem>>, vector<128x32xf32>
    %c0_116 = arith.constant 0 : index
    %c0_117 = arith.constant 0 : index
    %468 = vector.load %arg7[%c0_116, %c0_117] : memref<32x384xf32, #tpu.memory_space<vmem>>, vector<32x384xf32>
    %cst_118 = arith.constant dense<0.000000e+00> : vector<128x384xf32>
    %469 = tpu.matmul %467, %468, %cst_118 {dimension_numbers = #tpu.dot_dimension_numbers<[1], [0], [0], [1], [0, 0, 1, 1], [], []>} : vector<128x32xf32>, vector<32x384xf32>, vector<128x384xf32> -> vector<128x384xf32>
    %c0_119 = arith.constant 0 : index
    %c0_120 = arith.constant 0 : index
    %470 = vector.load %arg9[%c0_119, %c0_120] : memref<1x384xf32, #tpu.memory_space<vmem>>, vector<1x384xf32>
    %471 = vector.broadcast %470 : vector<1x384xf32> to vector<128x384xf32>
    %472 = arith.addf %469, %471 : vector<128x384xf32>
    %c0_121 = arith.constant 0 : index
    %c0_122 = arith.constant 0 : index
    %473 = vector.load %arg15[%c0_121, %c0_122] : memref<128x384xf32, #tpu.memory_space<vmem>>, vector<128x384xf32>
    tpu.vector_store %arg15[%c0_121, %c0_122], %472 {strides = array<i32>} : memref<128x384xf32, #tpu.memory_space<vmem>>, vector<128x384xf32>,
    %c0_123 = arith.constant 0 : index
    %c0_124 = arith.constant 0 : index
    %474 = vector.load %arg8[%c0_123, %c0_124] : memref<32x384xf32, #tpu.memory_space<vmem>>, vector<32x384xf32>
    %c0_125 = arith.constant 0 : index
    %c0_126 = arith.constant 0 : index
    %475 = vector.load %arg10[%c0_125, %c0_126] : memref<1x32xf32, #tpu.memory_space<vmem>>, vector<1x32xf32>
    %476 = vector.shape_cast %475 : vector<1x32xf32> to vector<1x32xf32>
    %477 = vector.broadcast %476 : vector<1x32xf32> to vector<8x32xf32>
    %cst_127 = arith.constant 0.000000e+00 : f32
    %478 = vector.broadcast %cst_127 : f32 to vector<8x32xf32>
    %c0_128 = arith.constant 0 : index
    %c0_129 = arith.constant 0 : index
    %479 = vector.load %arg15[%c0_128, %c0_129] : memref<128x384xf32, #tpu.memory_space<vmem>>, vector<8x384xf32>
    %cst_130 = arith.constant dense<0.000000e+00> : vector<8x384xf32>
    %480 = tpu.matmul %478, %474, %cst_130 {dimension_numbers = #tpu.dot_dimension_numbers<[1], [0], [0], [1], [0, 0, 1, 1], [], []>} : vector<8x32xf32>, vector<32x384xf32>, vector<8x384xf32> -> vector<8x384xf32>
    %481 = vector.extract_strided_slice %479 {offsets = [0, 0], sizes = [8, 32], strides = [1, 1]} : vector<8x384xf32> to vector<8x32xf32>
    %482 = vector.extract_strided_slice %480 {offsets = [0, 0], sizes = [8, 32], strides = [1, 1]} : vector<8x384xf32> to vector<8x32xf32>
    %483 = arith.addf %481, %482 : vector<8x32xf32>
    %484 = arith.negf %483 : vector<8x32xf32>
    %485 = math.exp %484 : vector<8x32xf32>
    %cst_131 = arith.constant 1.000000e+00 : f32
    %486 = vector.broadcast %cst_131 : f32 to vector<8x32xf32>
    %487 = arith.addf %486, %485 : vector<8x32xf32>
    %488 = arith.divf %486, %487 : vector<8x32xf32>
    %489 = vector.extract_strided_slice %479 {offsets = [0, 128], sizes = [8, 32], strides = [1, 1]} : vector<8x384xf32> to vector<8x32xf32>
    %490 = vector.extract_strided_slice %480 {offsets = [0, 128], sizes = [8, 32], strides = [1, 1]} : vector<8x384xf32> to vector<8x32xf32>
    %491 = arith.addf %489, %490 : vector<8x32xf32>
    %492 = arith.negf %491 : vector<8x32xf32>
    %493 = math.exp %492 : vector<8x32xf32>
    %cst_132 = arith.constant 1.000000e+00 : f32
    %494 = vector.broadcast %cst_132 : f32 to vector<8x32xf32>
    %495 = arith.addf %494, %493 : vector<8x32xf32>
    %496 = arith.divf %494, %495 : vector<8x32xf32>
    %497 = vector.extract_strided_slice %479 {offsets = [0, 256], sizes = [8, 32], strides = [1, 1]} : vector<8x384xf32> to vector<8x32xf32>
    %498 = vector.extract_strided_slice %480 {offsets = [0, 256], sizes = [8, 32], strides = [1, 1]} : vector<8x384xf32> to vector<8x32xf32>
    %499 = arith.addf %498, %477 : vector<8x32xf32>
    %500 = arith.mulf %488, %499 : vector<8x32xf32>
    %501 = arith.addf %497, %500 : vector<8x32xf32>
    %502 = math.tanh %501 : vector<8x32xf32>
    %503 = arith.subf %478, %502 : vector<8x32xf32>
    %504 = arith.mulf %496, %503 : vector<8x32xf32>
    %505 = arith.addf %502, %504 : vector<8x32xf32>
    %c8_133 = arith.constant 8 : index
    %c0_134 = arith.constant 0 : index
    %506 = vector.load %arg15[%c8_133, %c0_134] : memref<128x384xf32, #tpu.memory_space<vmem>>, vector<8x384xf32>
    %cst_135 = arith.constant dense<0.000000e+00> : vector<8x384xf32>
    %507 = tpu.matmul %505, %474, %cst_135 {dimension_numbers = #tpu.dot_dimension_numbers<[1], [0], [0], [1], [0, 0, 1, 1], [], []>} : vector<8x32xf32>, vector<32x384xf32>, vector<8x384xf32> -> vector<8x384xf32>
    %508 = vector.extract_strided_slice %506 {offsets = [0, 0], sizes = [8, 32], strides = [1, 1]} : vector<8x384xf32> to vector<8x32xf32>
    %509 = vector.extract_strided_slice %507 {offsets = [0, 0], sizes = [8, 32], strides = [1, 1]} : vector<8x384xf32> to vector<8x32xf32>
    %510 = arith.addf %508, %509 : vector<8x32xf32>
    %511 = arith.negf %510 : vector<8x32xf32>
    %512 = math.exp %511 : vector<8x32xf32>
    %cst_136 = arith.constant 1.000000e+00 : f32
    %513 = vector.broadcast %cst_136 : f32 to vector<8x32xf32>
    %514 = arith.addf %513, %512 : vector<8x32xf32>
    %515 = arith.divf %513, %514 : vector<8x32xf32>
    %516 = vector.extract_strided_slice %506 {offsets = [0, 128], sizes = [8, 32], strides = [1, 1]} : vector<8x384xf32> to vector<8x32xf32>
    %517 = vector.extract_strided_slice %507 {offsets = [0, 128], sizes = [8, 32], strides = [1, 1]} : vector<8x384xf32> to vector<8x32xf32>
    %518 = arith.addf %516, %517 : vector<8x32xf32>
    %519 = arith.negf %518 : vector<8x32xf32>
    %520 = math.exp %519 : vector<8x32xf32>
    %cst_137 = arith.constant 1.000000e+00 : f32
    %521 = vector.broadcast %cst_137 : f32 to vector<8x32xf32>
    %522 = arith.addf %521, %520 : vector<8x32xf32>
    %523 = arith.divf %521, %522 : vector<8x32xf32>
    %524 = vector.extract_strided_slice %506 {offsets = [0, 256], sizes = [8, 32], strides = [1, 1]} : vector<8x384xf32> to vector<8x32xf32>
    %525 = vector.extract_strided_slice %507 {offsets = [0, 256], sizes = [8, 32], strides = [1, 1]} : vector<8x384xf32> to vector<8x32xf32>
    %526 = arith.addf %525, %477 : vector<8x32xf32>
    %527 = arith.mulf %515, %526 : vector<8x32xf32>
    %528 = arith.addf %524, %527 : vector<8x32xf32>
    %529 = math.tanh %528 : vector<8x32xf32>
    %530 = arith.subf %505, %529 : vector<8x32xf32>
    %531 = arith.mulf %523, %530 : vector<8x32xf32>
    %532 = arith.addf %529, %531 : vector<8x32xf32>
    %c16_138 = arith.constant 16 : index
    %c0_139 = arith.constant 0 : index
    %533 = vector.load %arg15[%c16_138, %c0_139] : memref<128x384xf32, #tpu.memory_space<vmem>>, vector<8x384xf32>
    %cst_140 = arith.constant dense<0.000000e+00> : vector<8x384xf32>
    %534 = tpu.matmul %532, %474, %cst_140 {dimension_numbers = #tpu.dot_dimension_numbers<[1], [0], [0], [1], [0, 0, 1, 1], [], []>} : vector<8x32xf32>, vector<32x384xf32>, vector<8x384xf32> -> vector<8x384xf32>
    %535 = vector.extract_strided_slice %533 {offsets = [0, 0], sizes = [8, 32], strides = [1, 1]} : vector<8x384xf32> to vector<8x32xf32>
    %536 = vector.extract_strided_slice %534 {offsets = [0, 0], sizes = [8, 32], strides = [1, 1]} : vector<8x384xf32> to vector<8x32xf32>
    %537 = arith.addf %535, %536 : vector<8x32xf32>
    %538 = arith.negf %537 : vector<8x32xf32>
    %539 = math.exp %538 : vector<8x32xf32>
    %cst_141 = arith.constant 1.000000e+00 : f32
    %540 = vector.broadcast %cst_141 : f32 to vector<8x32xf32>
    %541 = arith.addf %540, %539 : vector<8x32xf32>
    %542 = arith.divf %540, %541 : vector<8x32xf32>
    %543 = vector.extract_strided_slice %533 {offsets = [0, 128], sizes = [8, 32], strides = [1, 1]} : vector<8x384xf32> to vector<8x32xf32>
    %544 = vector.extract_strided_slice %534 {offsets = [0, 128], sizes = [8, 32], strides = [1, 1]} : vector<8x384xf32> to vector<8x32xf32>
    %545 = arith.addf %543, %544 : vector<8x32xf32>
    %546 = arith.negf %545 : vector<8x32xf32>
    %547 = math.exp %546 : vector<8x32xf32>
    %cst_142 = arith.constant 1.000000e+00 : f32
    %548 = vector.broadcast %cst_142 : f32 to vector<8x32xf32>
    %549 = arith.addf %548, %547 : vector<8x32xf32>
    %550 = arith.divf %548, %549 : vector<8x32xf32>
    %551 = vector.extract_strided_slice %533 {offsets = [0, 256], sizes = [8, 32], strides = [1, 1]} : vector<8x384xf32> to vector<8x32xf32>
    %552 = vector.extract_strided_slice %534 {offsets = [0, 256], sizes = [8, 32], strides = [1, 1]} : vector<8x384xf32> to vector<8x32xf32>
    %553 = arith.addf %552, %477 : vector<8x32xf32>
    %554 = arith.mulf %542, %553 : vector<8x32xf32>
    %555 = arith.addf %551, %554 : vector<8x32xf32>
    %556 = math.tanh %555 : vector<8x32xf32>
    %557 = arith.subf %532, %556 : vector<8x32xf32>
    %558 = arith.mulf %550, %557 : vector<8x32xf32>
    %559 = arith.addf %556, %558 : vector<8x32xf32>
    %c24_143 = arith.constant 24 : index
    %c0_144 = arith.constant 0 : index
    %560 = vector.load %arg15[%c24_143, %c0_144] : memref<128x384xf32, #tpu.memory_space<vmem>>, vector<8x384xf32>
    %cst_145 = arith.constant dense<0.000000e+00> : vector<8x384xf32>
    %561 = tpu.matmul %559, %474, %cst_145 {dimension_numbers = #tpu.dot_dimension_numbers<[1], [0], [0], [1], [0, 0, 1, 1], [], []>} : vector<8x32xf32>, vector<32x384xf32>, vector<8x384xf32> -> vector<8x384xf32>
    %562 = vector.extract_strided_slice %560 {offsets = [0, 0], sizes = [8, 32], strides = [1, 1]} : vector<8x384xf32> to vector<8x32xf32>
    %563 = vector.extract_strided_slice %561 {offsets = [0, 0], sizes = [8, 32], strides = [1, 1]} : vector<8x384xf32> to vector<8x32xf32>
    %564 = arith.addf %562, %563 : vector<8x32xf32>
    %565 = arith.negf %564 : vector<8x32xf32>
    %566 = math.exp %565 : vector<8x32xf32>
    %cst_146 = arith.constant 1.000000e+00 : f32
    %567 = vector.broadcast %cst_146 : f32 to vector<8x32xf32>
    %568 = arith.addf %567, %566 : vector<8x32xf32>
    %569 = arith.divf %567, %568 : vector<8x32xf32>
    %570 = vector.extract_strided_slice %560 {offsets = [0, 128], sizes = [8, 32], strides = [1, 1]} : vector<8x384xf32> to vector<8x32xf32>
    %571 = vector.extract_strided_slice %561 {offsets = [0, 128], sizes = [8, 32], strides = [1, 1]} : vector<8x384xf32> to vector<8x32xf32>
    %572 = arith.addf %570, %571 : vector<8x32xf32>
    %573 = arith.negf %572 : vector<8x32xf32>
    %574 = math.exp %573 : vector<8x32xf32>
    %cst_147 = arith.constant 1.000000e+00 : f32
    %575 = vector.broadcast %cst_147 : f32 to vector<8x32xf32>
    %576 = arith.addf %575, %574 : vector<8x32xf32>
    %577 = arith.divf %575, %576 : vector<8x32xf32>
    %578 = vector.extract_strided_slice %560 {offsets = [0, 256], sizes = [8, 32], strides = [1, 1]} : vector<8x384xf32> to vector<8x32xf32>
    %579 = vector.extract_strided_slice %561 {offsets = [0, 256], sizes = [8, 32], strides = [1, 1]} : vector<8x384xf32> to vector<8x32xf32>
    %580 = arith.addf %579, %477 : vector<8x32xf32>
    %581 = arith.mulf %569, %580 : vector<8x32xf32>
    %582 = arith.addf %578, %581 : vector<8x32xf32>
    %583 = math.tanh %582 : vector<8x32xf32>
    %584 = arith.subf %559, %583 : vector<8x32xf32>
    %585 = arith.mulf %577, %584 : vector<8x32xf32>
    %586 = arith.addf %583, %585 : vector<8x32xf32>
    %c32_148 = arith.constant 32 : index
    %c0_149 = arith.constant 0 : index
    %587 = vector.load %arg15[%c32_148, %c0_149] : memref<128x384xf32, #tpu.memory_space<vmem>>, vector<8x384xf32>
    %cst_150 = arith.constant dense<0.000000e+00> : vector<8x384xf32>
    %588 = tpu.matmul %586, %474, %cst_150 {dimension_numbers = #tpu.dot_dimension_numbers<[1], [0], [0], [1], [0, 0, 1, 1], [], []>} : vector<8x32xf32>, vector<32x384xf32>, vector<8x384xf32> -> vector<8x384xf32>
    %589 = vector.extract_strided_slice %587 {offsets = [0, 0], sizes = [8, 32], strides = [1, 1]} : vector<8x384xf32> to vector<8x32xf32>
    %590 = vector.extract_strided_slice %588 {offsets = [0, 0], sizes = [8, 32], strides = [1, 1]} : vector<8x384xf32> to vector<8x32xf32>
    %591 = arith.addf %589, %590 : vector<8x32xf32>
    %592 = arith.negf %591 : vector<8x32xf32>
    %593 = math.exp %592 : vector<8x32xf32>
    %cst_151 = arith.constant 1.000000e+00 : f32
    %594 = vector.broadcast %cst_151 : f32 to vector<8x32xf32>
    %595 = arith.addf %594, %593 : vector<8x32xf32>
    %596 = arith.divf %594, %595 : vector<8x32xf32>
    %597 = vector.extract_strided_slice %587 {offsets = [0, 128], sizes = [8, 32], strides = [1, 1]} : vector<8x384xf32> to vector<8x32xf32>
    %598 = vector.extract_strided_slice %588 {offsets = [0, 128], sizes = [8, 32], strides = [1, 1]} : vector<8x384xf32> to vector<8x32xf32>
    %599 = arith.addf %597, %598 : vector<8x32xf32>
    %600 = arith.negf %599 : vector<8x32xf32>
    %601 = math.exp %600 : vector<8x32xf32>
    %cst_152 = arith.constant 1.000000e+00 : f32
    %602 = vector.broadcast %cst_152 : f32 to vector<8x32xf32>
    %603 = arith.addf %602, %601 : vector<8x32xf32>
    %604 = arith.divf %602, %603 : vector<8x32xf32>
    %605 = vector.extract_strided_slice %587 {offsets = [0, 256], sizes = [8, 32], strides = [1, 1]} : vector<8x384xf32> to vector<8x32xf32>
    %606 = vector.extract_strided_slice %588 {offsets = [0, 256], sizes = [8, 32], strides = [1, 1]} : vector<8x384xf32> to vector<8x32xf32>
    %607 = arith.addf %606, %477 : vector<8x32xf32>
    %608 = arith.mulf %596, %607 : vector<8x32xf32>
    %609 = arith.addf %605, %608 : vector<8x32xf32>
    %610 = math.tanh %609 : vector<8x32xf32>
    %611 = arith.subf %586, %610 : vector<8x32xf32>
    %612 = arith.mulf %604, %611 : vector<8x32xf32>
    %613 = arith.addf %610, %612 : vector<8x32xf32>
    %c40_153 = arith.constant 40 : index
    %c0_154 = arith.constant 0 : index
    %614 = vector.load %arg15[%c40_153, %c0_154] : memref<128x384xf32, #tpu.memory_space<vmem>>, vector<8x384xf32>
    %cst_155 = arith.constant dense<0.000000e+00> : vector<8x384xf32>
    %615 = tpu.matmul %613, %474, %cst_155 {dimension_numbers = #tpu.dot_dimension_numbers<[1], [0], [0], [1], [0, 0, 1, 1], [], []>} : vector<8x32xf32>, vector<32x384xf32>, vector<8x384xf32> -> vector<8x384xf32>
    %616 = vector.extract_strided_slice %614 {offsets = [0, 0], sizes = [8, 32], strides = [1, 1]} : vector<8x384xf32> to vector<8x32xf32>
    %617 = vector.extract_strided_slice %615 {offsets = [0, 0], sizes = [8, 32], strides = [1, 1]} : vector<8x384xf32> to vector<8x32xf32>
    %618 = arith.addf %616, %617 : vector<8x32xf32>
    %619 = arith.negf %618 : vector<8x32xf32>
    %620 = math.exp %619 : vector<8x32xf32>
    %cst_156 = arith.constant 1.000000e+00 : f32
    %621 = vector.broadcast %cst_156 : f32 to vector<8x32xf32>
    %622 = arith.addf %621, %620 : vector<8x32xf32>
    %623 = arith.divf %621, %622 : vector<8x32xf32>
    %624 = vector.extract_strided_slice %614 {offsets = [0, 128], sizes = [8, 32], strides = [1, 1]} : vector<8x384xf32> to vector<8x32xf32>
    %625 = vector.extract_strided_slice %615 {offsets = [0, 128], sizes = [8, 32], strides = [1, 1]} : vector<8x384xf32> to vector<8x32xf32>
    %626 = arith.addf %624, %625 : vector<8x32xf32>
    %627 = arith.negf %626 : vector<8x32xf32>
    %628 = math.exp %627 : vector<8x32xf32>
    %cst_157 = arith.constant 1.000000e+00 : f32
    %629 = vector.broadcast %cst_157 : f32 to vector<8x32xf32>
    %630 = arith.addf %629, %628 : vector<8x32xf32>
    %631 = arith.divf %629, %630 : vector<8x32xf32>
    %632 = vector.extract_strided_slice %614 {offsets = [0, 256], sizes = [8, 32], strides = [1, 1]} : vector<8x384xf32> to vector<8x32xf32>
    %633 = vector.extract_strided_slice %615 {offsets = [0, 256], sizes = [8, 32], strides = [1, 1]} : vector<8x384xf32> to vector<8x32xf32>
    %634 = arith.addf %633, %477 : vector<8x32xf32>
    %635 = arith.mulf %623, %634 : vector<8x32xf32>
    %636 = arith.addf %632, %635 : vector<8x32xf32>
    %637 = math.tanh %636 : vector<8x32xf32>
    %638 = arith.subf %613, %637 : vector<8x32xf32>
    %639 = arith.mulf %631, %638 : vector<8x32xf32>
    %640 = arith.addf %637, %639 : vector<8x32xf32>
    %c48_158 = arith.constant 48 : index
    %c0_159 = arith.constant 0 : index
    %641 = vector.load %arg15[%c48_158, %c0_159] : memref<128x384xf32, #tpu.memory_space<vmem>>, vector<8x384xf32>
    %cst_160 = arith.constant dense<0.000000e+00> : vector<8x384xf32>
    %642 = tpu.matmul %640, %474, %cst_160 {dimension_numbers = #tpu.dot_dimension_numbers<[1], [0], [0], [1], [0, 0, 1, 1], [], []>} : vector<8x32xf32>, vector<32x384xf32>, vector<8x384xf32> -> vector<8x384xf32>
    %643 = vector.extract_strided_slice %641 {offsets = [0, 0], sizes = [8, 32], strides = [1, 1]} : vector<8x384xf32> to vector<8x32xf32>
    %644 = vector.extract_strided_slice %642 {offsets = [0, 0], sizes = [8, 32], strides = [1, 1]} : vector<8x384xf32> to vector<8x32xf32>
    %645 = arith.addf %643, %644 : vector<8x32xf32>
    %646 = arith.negf %645 : vector<8x32xf32>
    %647 = math.exp %646 : vector<8x32xf32>
    %cst_161 = arith.constant 1.000000e+00 : f32
    %648 = vector.broadcast %cst_161 : f32 to vector<8x32xf32>
    %649 = arith.addf %648, %647 : vector<8x32xf32>
    %650 = arith.divf %648, %649 : vector<8x32xf32>
    %651 = vector.extract_strided_slice %641 {offsets = [0, 128], sizes = [8, 32], strides = [1, 1]} : vector<8x384xf32> to vector<8x32xf32>
    %652 = vector.extract_strided_slice %642 {offsets = [0, 128], sizes = [8, 32], strides = [1, 1]} : vector<8x384xf32> to vector<8x32xf32>
    %653 = arith.addf %651, %652 : vector<8x32xf32>
    %654 = arith.negf %653 : vector<8x32xf32>
    %655 = math.exp %654 : vector<8x32xf32>
    %cst_162 = arith.constant 1.000000e+00 : f32
    %656 = vector.broadcast %cst_162 : f32 to vector<8x32xf32>
    %657 = arith.addf %656, %655 : vector<8x32xf32>
    %658 = arith.divf %656, %657 : vector<8x32xf32>
    %659 = vector.extract_strided_slice %641 {offsets = [0, 256], sizes = [8, 32], strides = [1, 1]} : vector<8x384xf32> to vector<8x32xf32>
    %660 = vector.extract_strided_slice %642 {offsets = [0, 256], sizes = [8, 32], strides = [1, 1]} : vector<8x384xf32> to vector<8x32xf32>
    %661 = arith.addf %660, %477 : vector<8x32xf32>
    %662 = arith.mulf %650, %661 : vector<8x32xf32>
    %663 = arith.addf %659, %662 : vector<8x32xf32>
    %664 = math.tanh %663 : vector<8x32xf32>
    %665 = arith.subf %640, %664 : vector<8x32xf32>
    %666 = arith.mulf %658, %665 : vector<8x32xf32>
    %667 = arith.addf %664, %666 : vector<8x32xf32>
    %c56_163 = arith.constant 56 : index
    %c0_164 = arith.constant 0 : index
    %668 = vector.load %arg15[%c56_163, %c0_164] : memref<128x384xf32, #tpu.memory_space<vmem>>, vector<8x384xf32>
    %cst_165 = arith.constant dense<0.000000e+00> : vector<8x384xf32>
    %669 = tpu.matmul %667, %474, %cst_165 {dimension_numbers = #tpu.dot_dimension_numbers<[1], [0], [0], [1], [0, 0, 1, 1], [], []>} : vector<8x32xf32>, vector<32x384xf32>, vector<8x384xf32> -> vector<8x384xf32>
    %670 = vector.extract_strided_slice %668 {offsets = [0, 0], sizes = [8, 32], strides = [1, 1]} : vector<8x384xf32> to vector<8x32xf32>
    %671 = vector.extract_strided_slice %669 {offsets = [0, 0], sizes = [8, 32], strides = [1, 1]} : vector<8x384xf32> to vector<8x32xf32>
    %672 = arith.addf %670, %671 : vector<8x32xf32>
    %673 = arith.negf %672 : vector<8x32xf32>
    %674 = math.exp %673 : vector<8x32xf32>
    %cst_166 = arith.constant 1.000000e+00 : f32
    %675 = vector.broadcast %cst_166 : f32 to vector<8x32xf32>
    %676 = arith.addf %675, %674 : vector<8x32xf32>
    %677 = arith.divf %675, %676 : vector<8x32xf32>
    %678 = vector.extract_strided_slice %668 {offsets = [0, 128], sizes = [8, 32], strides = [1, 1]} : vector<8x384xf32> to vector<8x32xf32>
    %679 = vector.extract_strided_slice %669 {offsets = [0, 128], sizes = [8, 32], strides = [1, 1]} : vector<8x384xf32> to vector<8x32xf32>
    %680 = arith.addf %678, %679 : vector<8x32xf32>
    %681 = arith.negf %680 : vector<8x32xf32>
    %682 = math.exp %681 : vector<8x32xf32>
    %cst_167 = arith.constant 1.000000e+00 : f32
    %683 = vector.broadcast %cst_167 : f32 to vector<8x32xf32>
    %684 = arith.addf %683, %682 : vector<8x32xf32>
    %685 = arith.divf %683, %684 : vector<8x32xf32>
    %686 = vector.extract_strided_slice %668 {offsets = [0, 256], sizes = [8, 32], strides = [1, 1]} : vector<8x384xf32> to vector<8x32xf32>
    %687 = vector.extract_strided_slice %669 {offsets = [0, 256], sizes = [8, 32], strides = [1, 1]} : vector<8x384xf32> to vector<8x32xf32>
    %688 = arith.addf %687, %477 : vector<8x32xf32>
    %689 = arith.mulf %677, %688 : vector<8x32xf32>
    %690 = arith.addf %686, %689 : vector<8x32xf32>
    %691 = math.tanh %690 : vector<8x32xf32>
    %692 = arith.subf %667, %691 : vector<8x32xf32>
    %693 = arith.mulf %685, %692 : vector<8x32xf32>
    %694 = arith.addf %691, %693 : vector<8x32xf32>
    %c64_168 = arith.constant 64 : index
    %c0_169 = arith.constant 0 : index
    %695 = vector.load %arg15[%c64_168, %c0_169] : memref<128x384xf32, #tpu.memory_space<vmem>>, vector<8x384xf32>
    %cst_170 = arith.constant dense<0.000000e+00> : vector<8x384xf32>
    %696 = tpu.matmul %694, %474, %cst_170 {dimension_numbers = #tpu.dot_dimension_numbers<[1], [0], [0], [1], [0, 0, 1, 1], [], []>} : vector<8x32xf32>, vector<32x384xf32>, vector<8x384xf32> -> vector<8x384xf32>
    %697 = vector.extract_strided_slice %695 {offsets = [0, 0], sizes = [8, 32], strides = [1, 1]} : vector<8x384xf32> to vector<8x32xf32>
    %698 = vector.extract_strided_slice %696 {offsets = [0, 0], sizes = [8, 32], strides = [1, 1]} : vector<8x384xf32> to vector<8x32xf32>
    %699 = arith.addf %697, %698 : vector<8x32xf32>
    %700 = arith.negf %699 : vector<8x32xf32>
    %701 = math.exp %700 : vector<8x32xf32>
    %cst_171 = arith.constant 1.000000e+00 : f32
    %702 = vector.broadcast %cst_171 : f32 to vector<8x32xf32>
    %703 = arith.addf %702, %701 : vector<8x32xf32>
    %704 = arith.divf %702, %703 : vector<8x32xf32>
    %705 = vector.extract_strided_slice %695 {offsets = [0, 128], sizes = [8, 32], strides = [1, 1]} : vector<8x384xf32> to vector<8x32xf32>
    %706 = vector.extract_strided_slice %696 {offsets = [0, 128], sizes = [8, 32], strides = [1, 1]} : vector<8x384xf32> to vector<8x32xf32>
    %707 = arith.addf %705, %706 : vector<8x32xf32>
    %708 = arith.negf %707 : vector<8x32xf32>
    %709 = math.exp %708 : vector<8x32xf32>
    %cst_172 = arith.constant 1.000000e+00 : f32
    %710 = vector.broadcast %cst_172 : f32 to vector<8x32xf32>
    %711 = arith.addf %710, %709 : vector<8x32xf32>
    %712 = arith.divf %710, %711 : vector<8x32xf32>
    %713 = vector.extract_strided_slice %695 {offsets = [0, 256], sizes = [8, 32], strides = [1, 1]} : vector<8x384xf32> to vector<8x32xf32>
    %714 = vector.extract_strided_slice %696 {offsets = [0, 256], sizes = [8, 32], strides = [1, 1]} : vector<8x384xf32> to vector<8x32xf32>
    %715 = arith.addf %714, %477 : vector<8x32xf32>
    %716 = arith.mulf %704, %715 : vector<8x32xf32>
    %717 = arith.addf %713, %716 : vector<8x32xf32>
    %718 = math.tanh %717 : vector<8x32xf32>
    %719 = arith.subf %694, %718 : vector<8x32xf32>
    %720 = arith.mulf %712, %719 : vector<8x32xf32>
    %721 = arith.addf %718, %720 : vector<8x32xf32>
    %c72_173 = arith.constant 72 : index
    %c0_174 = arith.constant 0 : index
    %722 = vector.load %arg15[%c72_173, %c0_174] : memref<128x384xf32, #tpu.memory_space<vmem>>, vector<8x384xf32>
    %cst_175 = arith.constant dense<0.000000e+00> : vector<8x384xf32>
    %723 = tpu.matmul %721, %474, %cst_175 {dimension_numbers = #tpu.dot_dimension_numbers<[1], [0], [0], [1], [0, 0, 1, 1], [], []>} : vector<8x32xf32>, vector<32x384xf32>, vector<8x384xf32> -> vector<8x384xf32>
    %724 = vector.extract_strided_slice %722 {offsets = [0, 0], sizes = [8, 32], strides = [1, 1]} : vector<8x384xf32> to vector<8x32xf32>
    %725 = vector.extract_strided_slice %723 {offsets = [0, 0], sizes = [8, 32], strides = [1, 1]} : vector<8x384xf32> to vector<8x32xf32>
    %726 = arith.addf %724, %725 : vector<8x32xf32>
    %727 = arith.negf %726 : vector<8x32xf32>
    %728 = math.exp %727 : vector<8x32xf32>
    %cst_176 = arith.constant 1.000000e+00 : f32
    %729 = vector.broadcast %cst_176 : f32 to vector<8x32xf32>
    %730 = arith.addf %729, %728 : vector<8x32xf32>
    %731 = arith.divf %729, %730 : vector<8x32xf32>
    %732 = vector.extract_strided_slice %722 {offsets = [0, 128], sizes = [8, 32], strides = [1, 1]} : vector<8x384xf32> to vector<8x32xf32>
    %733 = vector.extract_strided_slice %723 {offsets = [0, 128], sizes = [8, 32], strides = [1, 1]} : vector<8x384xf32> to vector<8x32xf32>
    %734 = arith.addf %732, %733 : vector<8x32xf32>
    %735 = arith.negf %734 : vector<8x32xf32>
    %736 = math.exp %735 : vector<8x32xf32>
    %cst_177 = arith.constant 1.000000e+00 : f32
    %737 = vector.broadcast %cst_177 : f32 to vector<8x32xf32>
    %738 = arith.addf %737, %736 : vector<8x32xf32>
    %739 = arith.divf %737, %738 : vector<8x32xf32>
    %740 = vector.extract_strided_slice %722 {offsets = [0, 256], sizes = [8, 32], strides = [1, 1]} : vector<8x384xf32> to vector<8x32xf32>
    %741 = vector.extract_strided_slice %723 {offsets = [0, 256], sizes = [8, 32], strides = [1, 1]} : vector<8x384xf32> to vector<8x32xf32>
    %742 = arith.addf %741, %477 : vector<8x32xf32>
    %743 = arith.mulf %731, %742 : vector<8x32xf32>
    %744 = arith.addf %740, %743 : vector<8x32xf32>
    %745 = math.tanh %744 : vector<8x32xf32>
    %746 = arith.subf %721, %745 : vector<8x32xf32>
    %747 = arith.mulf %739, %746 : vector<8x32xf32>
    %748 = arith.addf %745, %747 : vector<8x32xf32>
    %c80_178 = arith.constant 80 : index
    %c0_179 = arith.constant 0 : index
    %749 = vector.load %arg15[%c80_178, %c0_179] : memref<128x384xf32, #tpu.memory_space<vmem>>, vector<8x384xf32>
    %cst_180 = arith.constant dense<0.000000e+00> : vector<8x384xf32>
    %750 = tpu.matmul %748, %474, %cst_180 {dimension_numbers = #tpu.dot_dimension_numbers<[1], [0], [0], [1], [0, 0, 1, 1], [], []>} : vector<8x32xf32>, vector<32x384xf32>, vector<8x384xf32> -> vector<8x384xf32>
    %751 = vector.extract_strided_slice %749 {offsets = [0, 0], sizes = [8, 32], strides = [1, 1]} : vector<8x384xf32> to vector<8x32xf32>
    %752 = vector.extract_strided_slice %750 {offsets = [0, 0], sizes = [8, 32], strides = [1, 1]} : vector<8x384xf32> to vector<8x32xf32>
    %753 = arith.addf %751, %752 : vector<8x32xf32>
    %754 = arith.negf %753 : vector<8x32xf32>
    %755 = math.exp %754 : vector<8x32xf32>
    %cst_181 = arith.constant 1.000000e+00 : f32
    %756 = vector.broadcast %cst_181 : f32 to vector<8x32xf32>
    %757 = arith.addf %756, %755 : vector<8x32xf32>
    %758 = arith.divf %756, %757 : vector<8x32xf32>
    %759 = vector.extract_strided_slice %749 {offsets = [0, 128], sizes = [8, 32], strides = [1, 1]} : vector<8x384xf32> to vector<8x32xf32>
    %760 = vector.extract_strided_slice %750 {offsets = [0, 128], sizes = [8, 32], strides = [1, 1]} : vector<8x384xf32> to vector<8x32xf32>
    %761 = arith.addf %759, %760 : vector<8x32xf32>
    %762 = arith.negf %761 : vector<8x32xf32>
    %763 = math.exp %762 : vector<8x32xf32>
    %cst_182 = arith.constant 1.000000e+00 : f32
    %764 = vector.broadcast %cst_182 : f32 to vector<8x32xf32>
    %765 = arith.addf %764, %763 : vector<8x32xf32>
    %766 = arith.divf %764, %765 : vector<8x32xf32>
    %767 = vector.extract_strided_slice %749 {offsets = [0, 256], sizes = [8, 32], strides = [1, 1]} : vector<8x384xf32> to vector<8x32xf32>
    %768 = vector.extract_strided_slice %750 {offsets = [0, 256], sizes = [8, 32], strides = [1, 1]} : vector<8x384xf32> to vector<8x32xf32>
    %769 = arith.addf %768, %477 : vector<8x32xf32>
    %770 = arith.mulf %758, %769 : vector<8x32xf32>
    %771 = arith.addf %767, %770 : vector<8x32xf32>
    %772 = math.tanh %771 : vector<8x32xf32>
    %773 = arith.subf %748, %772 : vector<8x32xf32>
    %774 = arith.mulf %766, %773 : vector<8x32xf32>
    %775 = arith.addf %772, %774 : vector<8x32xf32>
    %c88_183 = arith.constant 88 : index
    %c0_184 = arith.constant 0 : index
    %776 = vector.load %arg15[%c88_183, %c0_184] : memref<128x384xf32, #tpu.memory_space<vmem>>, vector<8x384xf32>
    %cst_185 = arith.constant dense<0.000000e+00> : vector<8x384xf32>
    %777 = tpu.matmul %775, %474, %cst_185 {dimension_numbers = #tpu.dot_dimension_numbers<[1], [0], [0], [1], [0, 0, 1, 1], [], []>} : vector<8x32xf32>, vector<32x384xf32>, vector<8x384xf32> -> vector<8x384xf32>
    %778 = vector.extract_strided_slice %776 {offsets = [0, 0], sizes = [8, 32], strides = [1, 1]} : vector<8x384xf32> to vector<8x32xf32>
    %779 = vector.extract_strided_slice %777 {offsets = [0, 0], sizes = [8, 32], strides = [1, 1]} : vector<8x384xf32> to vector<8x32xf32>
    %780 = arith.addf %778, %779 : vector<8x32xf32>
    %781 = arith.negf %780 : vector<8x32xf32>
    %782 = math.exp %781 : vector<8x32xf32>
    %cst_186 = arith.constant 1.000000e+00 : f32
    %783 = vector.broadcast %cst_186 : f32 to vector<8x32xf32>
    %784 = arith.addf %783, %782 : vector<8x32xf32>
    %785 = arith.divf %783, %784 : vector<8x32xf32>
    %786 = vector.extract_strided_slice %776 {offsets = [0, 128], sizes = [8, 32], strides = [1, 1]} : vector<8x384xf32> to vector<8x32xf32>
    %787 = vector.extract_strided_slice %777 {offsets = [0, 128], sizes = [8, 32], strides = [1, 1]} : vector<8x384xf32> to vector<8x32xf32>
    %788 = arith.addf %786, %787 : vector<8x32xf32>
    %789 = arith.negf %788 : vector<8x32xf32>
    %790 = math.exp %789 : vector<8x32xf32>
    %cst_187 = arith.constant 1.000000e+00 : f32
    %791 = vector.broadcast %cst_187 : f32 to vector<8x32xf32>
    %792 = arith.addf %791, %790 : vector<8x32xf32>
    %793 = arith.divf %791, %792 : vector<8x32xf32>
    %794 = vector.extract_strided_slice %776 {offsets = [0, 256], sizes = [8, 32], strides = [1, 1]} : vector<8x384xf32> to vector<8x32xf32>
    %795 = vector.extract_strided_slice %777 {offsets = [0, 256], sizes = [8, 32], strides = [1, 1]} : vector<8x384xf32> to vector<8x32xf32>
    %796 = arith.addf %795, %477 : vector<8x32xf32>
    %797 = arith.mulf %785, %796 : vector<8x32xf32>
    %798 = arith.addf %794, %797 : vector<8x32xf32>
    %799 = math.tanh %798 : vector<8x32xf32>
    %800 = arith.subf %775, %799 : vector<8x32xf32>
    %801 = arith.mulf %793, %800 : vector<8x32xf32>
    %802 = arith.addf %799, %801 : vector<8x32xf32>
    %c96_188 = arith.constant 96 : index
    %c0_189 = arith.constant 0 : index
    %803 = vector.load %arg15[%c96_188, %c0_189] : memref<128x384xf32, #tpu.memory_space<vmem>>, vector<8x384xf32>
    %cst_190 = arith.constant dense<0.000000e+00> : vector<8x384xf32>
    %804 = tpu.matmul %802, %474, %cst_190 {dimension_numbers = #tpu.dot_dimension_numbers<[1], [0], [0], [1], [0, 0, 1, 1], [], []>} : vector<8x32xf32>, vector<32x384xf32>, vector<8x384xf32> -> vector<8x384xf32>
    %805 = vector.extract_strided_slice %803 {offsets = [0, 0], sizes = [8, 32], strides = [1, 1]} : vector<8x384xf32> to vector<8x32xf32>
    %806 = vector.extract_strided_slice %804 {offsets = [0, 0], sizes = [8, 32], strides = [1, 1]} : vector<8x384xf32> to vector<8x32xf32>
    %807 = arith.addf %805, %806 : vector<8x32xf32>
    %808 = arith.negf %807 : vector<8x32xf32>
    %809 = math.exp %808 : vector<8x32xf32>
    %cst_191 = arith.constant 1.000000e+00 : f32
    %810 = vector.broadcast %cst_191 : f32 to vector<8x32xf32>
    %811 = arith.addf %810, %809 : vector<8x32xf32>
    %812 = arith.divf %810, %811 : vector<8x32xf32>
    %813 = vector.extract_strided_slice %803 {offsets = [0, 128], sizes = [8, 32], strides = [1, 1]} : vector<8x384xf32> to vector<8x32xf32>
    %814 = vector.extract_strided_slice %804 {offsets = [0, 128], sizes = [8, 32], strides = [1, 1]} : vector<8x384xf32> to vector<8x32xf32>
    %815 = arith.addf %813, %814 : vector<8x32xf32>
    %816 = arith.negf %815 : vector<8x32xf32>
    %817 = math.exp %816 : vector<8x32xf32>
    %cst_192 = arith.constant 1.000000e+00 : f32
    %818 = vector.broadcast %cst_192 : f32 to vector<8x32xf32>
    %819 = arith.addf %818, %817 : vector<8x32xf32>
    %820 = arith.divf %818, %819 : vector<8x32xf32>
    %821 = vector.extract_strided_slice %803 {offsets = [0, 256], sizes = [8, 32], strides = [1, 1]} : vector<8x384xf32> to vector<8x32xf32>
    %822 = vector.extract_strided_slice %804 {offsets = [0, 256], sizes = [8, 32], strides = [1, 1]} : vector<8x384xf32> to vector<8x32xf32>
    %823 = arith.addf %822, %477 : vector<8x32xf32>
    %824 = arith.mulf %812, %823 : vector<8x32xf32>
    %825 = arith.addf %821, %824 : vector<8x32xf32>
    %826 = math.tanh %825 : vector<8x32xf32>
    %827 = arith.subf %802, %826 : vector<8x32xf32>
    %828 = arith.mulf %820, %827 : vector<8x32xf32>
    %829 = arith.addf %826, %828 : vector<8x32xf32>
    %c104_193 = arith.constant 104 : index
    %c0_194 = arith.constant 0 : index
    %830 = vector.load %arg15[%c104_193, %c0_194] : memref<128x384xf32, #tpu.memory_space<vmem>>, vector<8x384xf32>
    %cst_195 = arith.constant dense<0.000000e+00> : vector<8x384xf32>
    %831 = tpu.matmul %829, %474, %cst_195 {dimension_numbers = #tpu.dot_dimension_numbers<[1], [0], [0], [1], [0, 0, 1, 1], [], []>} : vector<8x32xf32>, vector<32x384xf32>, vector<8x384xf32> -> vector<8x384xf32>
    %832 = vector.extract_strided_slice %830 {offsets = [0, 0], sizes = [8, 32], strides = [1, 1]} : vector<8x384xf32> to vector<8x32xf32>
    %833 = vector.extract_strided_slice %831 {offsets = [0, 0], sizes = [8, 32], strides = [1, 1]} : vector<8x384xf32> to vector<8x32xf32>
    %834 = arith.addf %832, %833 : vector<8x32xf32>
    %835 = arith.negf %834 : vector<8x32xf32>
    %836 = math.exp %835 : vector<8x32xf32>
    %cst_196 = arith.constant 1.000000e+00 : f32
    %837 = vector.broadcast %cst_196 : f32 to vector<8x32xf32>
    %838 = arith.addf %837, %836 : vector<8x32xf32>
    %839 = arith.divf %837, %838 : vector<8x32xf32>
    %840 = vector.extract_strided_slice %830 {offsets = [0, 128], sizes = [8, 32], strides = [1, 1]} : vector<8x384xf32> to vector<8x32xf32>
    %841 = vector.extract_strided_slice %831 {offsets = [0, 128], sizes = [8, 32], strides = [1, 1]} : vector<8x384xf32> to vector<8x32xf32>
    %842 = arith.addf %840, %841 : vector<8x32xf32>
    %843 = arith.negf %842 : vector<8x32xf32>
    %844 = math.exp %843 : vector<8x32xf32>
    %cst_197 = arith.constant 1.000000e+00 : f32
    %845 = vector.broadcast %cst_197 : f32 to vector<8x32xf32>
    %846 = arith.addf %845, %844 : vector<8x32xf32>
    %847 = arith.divf %845, %846 : vector<8x32xf32>
    %848 = vector.extract_strided_slice %830 {offsets = [0, 256], sizes = [8, 32], strides = [1, 1]} : vector<8x384xf32> to vector<8x32xf32>
    %849 = vector.extract_strided_slice %831 {offsets = [0, 256], sizes = [8, 32], strides = [1, 1]} : vector<8x384xf32> to vector<8x32xf32>
    %850 = arith.addf %849, %477 : vector<8x32xf32>
    %851 = arith.mulf %839, %850 : vector<8x32xf32>
    %852 = arith.addf %848, %851 : vector<8x32xf32>
    %853 = math.tanh %852 : vector<8x32xf32>
    %854 = arith.subf %829, %853 : vector<8x32xf32>
    %855 = arith.mulf %847, %854 : vector<8x32xf32>
    %856 = arith.addf %853, %855 : vector<8x32xf32>
    %c112_198 = arith.constant 112 : index
    %c0_199 = arith.constant 0 : index
    %857 = vector.load %arg15[%c112_198, %c0_199] : memref<128x384xf32, #tpu.memory_space<vmem>>, vector<8x384xf32>
    %cst_200 = arith.constant dense<0.000000e+00> : vector<8x384xf32>
    %858 = tpu.matmul %856, %474, %cst_200 {dimension_numbers = #tpu.dot_dimension_numbers<[1], [0], [0], [1], [0, 0, 1, 1], [], []>} : vector<8x32xf32>, vector<32x384xf32>, vector<8x384xf32> -> vector<8x384xf32>
    %859 = vector.extract_strided_slice %857 {offsets = [0, 0], sizes = [8, 32], strides = [1, 1]} : vector<8x384xf32> to vector<8x32xf32>
    %860 = vector.extract_strided_slice %858 {offsets = [0, 0], sizes = [8, 32], strides = [1, 1]} : vector<8x384xf32> to vector<8x32xf32>
    %861 = arith.addf %859, %860 : vector<8x32xf32>
    %862 = arith.negf %861 : vector<8x32xf32>
    %863 = math.exp %862 : vector<8x32xf32>
    %cst_201 = arith.constant 1.000000e+00 : f32
    %864 = vector.broadcast %cst_201 : f32 to vector<8x32xf32>
    %865 = arith.addf %864, %863 : vector<8x32xf32>
    %866 = arith.divf %864, %865 : vector<8x32xf32>
    %867 = vector.extract_strided_slice %857 {offsets = [0, 128], sizes = [8, 32], strides = [1, 1]} : vector<8x384xf32> to vector<8x32xf32>
    %868 = vector.extract_strided_slice %858 {offsets = [0, 128], sizes = [8, 32], strides = [1, 1]} : vector<8x384xf32> to vector<8x32xf32>
    %869 = arith.addf %867, %868 : vector<8x32xf32>
    %870 = arith.negf %869 : vector<8x32xf32>
    %871 = math.exp %870 : vector<8x32xf32>
    %cst_202 = arith.constant 1.000000e+00 : f32
    %872 = vector.broadcast %cst_202 : f32 to vector<8x32xf32>
    %873 = arith.addf %872, %871 : vector<8x32xf32>
    %874 = arith.divf %872, %873 : vector<8x32xf32>
    %875 = vector.extract_strided_slice %857 {offsets = [0, 256], sizes = [8, 32], strides = [1, 1]} : vector<8x384xf32> to vector<8x32xf32>
    %876 = vector.extract_strided_slice %858 {offsets = [0, 256], sizes = [8, 32], strides = [1, 1]} : vector<8x384xf32> to vector<8x32xf32>
    %877 = arith.addf %876, %477 : vector<8x32xf32>
    %878 = arith.mulf %866, %877 : vector<8x32xf32>
    %879 = arith.addf %875, %878 : vector<8x32xf32>
    %880 = math.tanh %879 : vector<8x32xf32>
    %881 = arith.subf %856, %880 : vector<8x32xf32>
    %882 = arith.mulf %874, %881 : vector<8x32xf32>
    %883 = arith.addf %880, %882 : vector<8x32xf32>
    %c120_203 = arith.constant 120 : index
    %c0_204 = arith.constant 0 : index
    %884 = vector.load %arg15[%c120_203, %c0_204] : memref<128x384xf32, #tpu.memory_space<vmem>>, vector<8x384xf32>
    %cst_205 = arith.constant dense<0.000000e+00> : vector<8x384xf32>
    %885 = tpu.matmul %883, %474, %cst_205 {dimension_numbers = #tpu.dot_dimension_numbers<[1], [0], [0], [1], [0, 0, 1, 1], [], []>} : vector<8x32xf32>, vector<32x384xf32>, vector<8x384xf32> -> vector<8x384xf32>
    %886 = vector.extract_strided_slice %884 {offsets = [0, 0], sizes = [8, 32], strides = [1, 1]} : vector<8x384xf32> to vector<8x32xf32>
    %887 = vector.extract_strided_slice %885 {offsets = [0, 0], sizes = [8, 32], strides = [1, 1]} : vector<8x384xf32> to vector<8x32xf32>
    %888 = arith.addf %886, %887 : vector<8x32xf32>
    %889 = arith.negf %888 : vector<8x32xf32>
    %890 = math.exp %889 : vector<8x32xf32>
    %cst_206 = arith.constant 1.000000e+00 : f32
    %891 = vector.broadcast %cst_206 : f32 to vector<8x32xf32>
    %892 = arith.addf %891, %890 : vector<8x32xf32>
    %893 = arith.divf %891, %892 : vector<8x32xf32>
    %894 = vector.extract_strided_slice %884 {offsets = [0, 128], sizes = [8, 32], strides = [1, 1]} : vector<8x384xf32> to vector<8x32xf32>
    %895 = vector.extract_strided_slice %885 {offsets = [0, 128], sizes = [8, 32], strides = [1, 1]} : vector<8x384xf32> to vector<8x32xf32>
    %896 = arith.addf %894, %895 : vector<8x32xf32>
    %897 = arith.negf %896 : vector<8x32xf32>
    %898 = math.exp %897 : vector<8x32xf32>
    %cst_207 = arith.constant 1.000000e+00 : f32
    %899 = vector.broadcast %cst_207 : f32 to vector<8x32xf32>
    %900 = arith.addf %899, %898 : vector<8x32xf32>
    %901 = arith.divf %899, %900 : vector<8x32xf32>
    %902 = vector.extract_strided_slice %884 {offsets = [0, 256], sizes = [8, 32], strides = [1, 1]} : vector<8x384xf32> to vector<8x32xf32>
    %903 = vector.extract_strided_slice %885 {offsets = [0, 256], sizes = [8, 32], strides = [1, 1]} : vector<8x384xf32> to vector<8x32xf32>
    %904 = arith.addf %903, %477 : vector<8x32xf32>
    %905 = arith.mulf %893, %904 : vector<8x32xf32>
    %906 = arith.addf %902, %905 : vector<8x32xf32>
    %907 = math.tanh %906 : vector<8x32xf32>
    %908 = arith.subf %883, %907 : vector<8x32xf32>
    %909 = arith.mulf %901, %908 : vector<8x32xf32>
    %910 = arith.addf %907, %909 : vector<8x32xf32>
    %c0_208 = arith.constant 0 : index
    %c0_209 = arith.constant 0 : index
    %911 = vector.load %arg11[%c0_208, %c0_209] : memref<1x32xf32, #tpu.memory_space<vmem>>, vector<1x32xf32>
    %912 = vector.broadcast %911 : vector<1x32xf32> to vector<8x32xf32>
    %913 = arith.mulf %910, %912 : vector<8x32xf32>
    %cst_210 = arith.constant dense<0.000000e+00> : vector<8xf32>
    %914 = vector.multi_reduction <add>, %913, %cst_210 [1] : vector<8x32xf32> to vector<8xf32>
    %915 = vector.shape_cast %914 : vector<8xf32> to vector<8x1xf32>
    %c0_211 = arith.constant 0 : index
    %c0_212 = arith.constant 0 : index
    %916 = vector.load %arg12[%c0_211, %c0_212] : memref<1x1xf32, #tpu.memory_space<vmem>>, vector<1x1xf32>
    %917 = vector.broadcast %916 : vector<1x1xf32> to vector<8x1xf32>
    %918 = arith.addf %915, %917 : vector<8x1xf32>
    %c0_213 = arith.constant 0 : index
    %c0_214 = arith.constant 0 : index
    %919 = vector.load %arg13[%c0_213, %c0_214] : memref<8x1xf32, #tpu.memory_space<vmem>>, vector<8x1xf32>
    tpu.vector_store %arg13[%c0_213, %c0_214], %918 {strides = array<i32>} : memref<8x1xf32, #tpu.memory_space<vmem>>, vector<8x1xf32>,
    return
  }
}

</mosaic_0001>

<bundles_post_ra>
// kernel: gru_model_forward.1
= control target key start
LH: loop header
LB: loop body
LE: loop exit
PB: predicated region body
PF: predicated region fallthrough
CT: control target
= control target key end

     0   :  { %v9473_v2 = vmov 0.0   ;;  %vm50_vm0 = vcmask 64512   ;;  %vm8124_vm1 = vmmov 0   ;;  %v9475_v23 = vmov 0.0|0.0   ;;  %s9457_s3 = inlined_call_operand.vmem [shape: f32[8,384], index: 3, kind: input, shape index: {}]   ;;  %s9458_s1 = inlined_call_operand.vmem [shape: f32[1,8], index: 1, kind: input, shape index: {}]   ;;  %s9459_s4 = inlined_call_operand.vmem [shape: f32[32,384], index: 4, kind: input, shape index: {}]   ;;  %s9460_s2 = inlined_call_operand.vmem [shape: f32[1,8], index: 2, kind: input, shape index: {}]   ;;  %s9461_s0 = inlined_call_operand.vmem [shape: f32[128,1], index: 0, kind: input, shape index: {}]   ;;  %s9462_s5 = inlined_call_operand.vmem [shape: f32[1,384], index: 5, kind: input, shape index: {}]   ;;  %s9463_s6 = inlined_call_operand.vmem [shape: f32[1,32], index: 6, kind: input, shape index: {}]   ;;  %s9464_s7 = inlined_call_operand.vmem [shape: f32[32,384], index: 7, kind: input, shape index: {}]   ;;  %s9465_s8 = inlined_call_operand.vmem [shape: f32[32,384], index: 8, kind: input, shape index: {}]   ;;  %s9466_s9 = inlined_call_operand.vmem [shape: f32[1,384], index: 9, kind: input, shape index: {}]   ;;  %s9467_s10 = inlined_call_operand.vmem [shape: f32[1,32], index: 10, kind: input, shape index: {}]   ;;  %s9468_s12 = inlined_call_operand.<no memory space> [shape: f32[1,1], index: 12, kind: input, shape index: {}]   ;;  %s9469_s11 = inlined_call_operand.vmem [shape: f32[1,32], index: 11, kind: input, shape index: {}]   ;;  %s9470_s13 = inlined_call_operand.vmem [shape: f32[8,1], index: 13, kind: output, shape index: {}]  }
   0x1   :  { %v47_v0 = vld [vmem:[%s9457_s3 + $0x8] sm:$0xff]  ;;  %v46_v1 = vld [vmem:[%s9457_s3] sm:$0xff]  ;;  %118 = vmatprep.mubr.f32.mxu0 %v9473_v2  ;;  %6869 = vmatprep.subr.mxu1 %v9473_v2  ;;  %v48_v4 = vld [vmem:[%s9457_s3 + $0x10] sm:$0xff]  ;;  %v8126_v26 = vmov 0   ;;  %v198_v54 = vlaneseq  ;;  %vm643_vm2 = vcmask 261120   ;;  %vm6515_vm3 = vcmask 7168  }
   0x2   :  { %v49_v3 = vld [vmem:[%s9458_s1] sm:$0x1]  ;;  %54 = vmatprep.subr.mxu0 %v47_v0  ;;  %6871 = vmatprep.mubr.msk.f32.mxu1 %vm8124_vm1, %v9473_v2  ;;  %v622_v5 = vld [vmem:[%s9459_s4 + $0x8] sm:$0xff]  ;;  %v624_v9 = vld [vmem:[%s9459_s4 + $0x18] sm:$0xff] }
   0x3   :  { %v625_v6 = vld [vmem:[%s9459_s4 + $0x20] sm:$0xff]  ;;  %55 = vmatpush1.msra.mxu0 %v46_v1  ;;  %6870 = vmatpush3.msra.mxu1 %v48_v4  ;;  %v628_v10 = vld [vmem:[%s9459_s4 + $0x38] sm:$0xff]  ;;  %v631_v11 = vld [vmem:[%s9459_s4 + $0x50] sm:$0xff]  ;;  %v8364_v56 = vshrl.u32 %v198_v54, 7 }
   0x4   :  { %v8219_v7 = vpack.c.bf16 %v625_v6, %v622_v5  ;;  %v621_v8 = vld [vmem:[%s9459_s4] sm:$0xff]  ;;  %6521 = vmatmul.mubr.msk.f32.vlgmr.msra.gmra.mrb[0].mxu0 %vm50_vm0, %v49_v3  ;;  %216 = vmatprep.subr.mxu0 %v47_v0  ;;  %v623_v14 = vld [vmem:[%s9459_s4 + $0x10] sm:$0xff]  ;;  %v626_v15 = vld [vmem:[%s9459_s4 + $0x28] sm:$0xff]  ;;  %v8248_v16 = vpack.c.bf16 %v631_v11, %v628_v10 }
   0x5   :  { %217 = vmatpush1.msra.mxu0 %v46_v1  ;;  %6872 = vmatmul.mubr.msk.f32.vlgmr.msra.gmra.mrb[0].mxu1 %vm50_vm0, %v49_v3  ;;  %v195_v12 = vld [vmem:[%s9460_s2] sm:$0x1]  ;;  %v8238_v13 = vpack.c.bf16 %v624_v9, %v621_v8  ;;  %v627_v17 = vld [vmem:[%s9459_s4 + $0x30] sm:$0xff]  ;;  %v630_v18 = vld [vmem:[%s9459_s4 + $0x48] sm:$0xff]  ;;  %v8260_v19 = vpack.c.bf16 %v626_v15, %v623_v14  ;;  %9480 = vst [vmem:[#allocation6_spill] sm:$0xff] %v8364_v56  ;;  %v8369_v58 = vsub.s32 0, %v8364_v56 }
   0x6   :  { %280 = vmatprep.mubr.f32.mxu0 %v9473_v2  ;;  %7264 = vmatprep.subr.bf16.mxu0 %v8219_v7  ;;  %v8264_v20 = vpack.c.bf16 %v630_v18, %v627_v17  ;;  %v629_v21 = vld [vmem:[%s9459_s4 + $0x40] sm:$0xff]  ;;  %v632_v22 = vld [vmem:[%s9459_s4 + $0x58] sm:$0xff]  ;;  %v359_v24 = vld [vmem:[%s9461_s0 + $0x10] sm:$0xff]  ;;  %v9471_v60 = vsub.s32 1, %v8364_v56  ;;  %v9472_v61 = vsub.s32 2, %v8364_v56 }
   0x7   :  { %6874 = vmatprep.subr.mxu1 %v9473_v2  ;;  %6876 = vmatprep.mubr.msk.f32.mxu1 %vm8124_vm1, %v9473_v2  ;;  %v8281_v25 = vpack.c.bf16 %v632_v22, %v629_v21  ;;  %v357_v27 = vld [vmem:[%s9461_s0] sm:$0xff]  ;;  %v360_v28 = vld [vmem:[%s9461_s0 + $0x18] sm:$0xff]  ;;  %v358_v29 = vld [vmem:[%s9461_s0 + $0x8] sm:$0xff]  ;;  %9481 = vst [vmem:[#allocation7_spill] sm:$0xff] %v8369_v58 }
   0x8   :  { %6523 = vmatmul.mubr.msk.f32.vlgmr.msra.gmra.mrb[2].mxu0 %vm50_vm0, %v195_v12  ;;  %6875 = vmatpush3.msra.mxu1 %v48_v4  ;;  %v362_v30 = vld [vmem:[%s9461_s0 + $0x28] sm:$0xff]  ;;  %v361_v31 = vld [vmem:[%s9461_s0 + $0x20] sm:$0xff]  ;;  %v364_v32 = vld [vmem:[%s9461_s0 + $0x38] sm:$0xff] }
   0x9   :  { %7266 = vmatpush1.bf16.msra.mxu0 %v8238_v13  ;;  %6877 = vmatmul.mubr.msk.f32.vlgmr.msra.gmra.mrb[2].mxu1 %vm50_vm0, %v195_v12  ;;  %v363_v33 = vld [vmem:[%s9461_s0 + $0x30] sm:$0xff]  ;;  %v366_v34 = vld [vmem:[%s9461_s0 + $0x48] sm:$0xff]  ;;  %v365_v35 = vld [vmem:[%s9461_s0 + $0x40] sm:$0xff] }
   0xa   :  { %7268 = vmatprep.subr.bf16.mxu0 %v8248_v16  ;;  %711 = vmatprep.mubr.f32.mxu0 %v9473_v2  ;;  %v368_v36 = vld [vmem:[%s9461_s0 + $0x58] sm:$0xff]  ;;  %v367_v37 = vld [vmem:[%s9461_s0 + $0x50] sm:$0xff]  ;;  %v370_v38 = vld [vmem:[%s9461_s0 + $0x68] sm:$0xff] }
   0xb   :  { %7271 = vmatprep.subr.bf16.mxu1 %v9475_v23  ;;  %6887 = vmatprep.mubr.msk.f32.mxu1 %vm8124_vm1, %v9473_v2  ;;  %v369_v39 = vld [vmem:[%s9461_s0 + $0x60] sm:$0xff]  ;;  %v372_v40 = vld [vmem:[%s9461_s0 + $0x78] sm:$0xff]  ;;  %v371_v41 = vld [vmem:[%s9461_s0 + $0x70] sm:$0xff] }
   0xc   :  { %7273 = vmatpush3.bf16.msra.mxu1 %v8260_v19  ;;  %7800 = vset.pattern.permute.xlu1 %v8126_v26  ;;  %v196_v59 = vld [vmem:[%s9462_s5] sm:$0x7] }
   0xd   :  { %7270 = vmatpush1.bf16.msra.mxu0 %v8264_v20  ;;  %7274 = vmatprep.subr.bf16.mxu1 %v9475_v23  ;;  %v201_v5 = vrot.slane %v196_v59, %v8369_v58  ;;  %v205_v10 = vrot.slane %v196_v59, %v9471_v60  ;;  %v209_v11 = vrot.slane %v196_v59, %v9472_v61 }
   0xe   :  { %7799 = vset.pattern.permute.xlu0 %v8126_v26  ;;  %385 = vperm.xlu1 %7800, %v359_v24  }
   0xf   :  { %375 = vperm.xlu0 %7799, %v357_v27   ;;  %7278 = vmatprep.subr.bf16.mxu0 %v8219_v7 }
  0x10   :  { %712 = vmatmul.mubr.f32.vlgmr.msra.gmra.mrb[4].mxu0 %v9473_v2  ;;  %7276 = vmatpush3.bf16.msra.mxu1 %v8281_v25 }
  0x11   :  { %7285 = vmatprep.subr.bf16.mxu1 %v9475_v23  ;;  %7280 = vmatpush1.bf16.msra.mxu0 %v8238_v13 }
  0x12   :  { %390 = vperm.xlu1 %7800, %v360_v28   ;;  %7282 = vmatprep.subr.bf16.mxu0 %v8248_v16 }
  0x13   :  { %6888 = vmatmul.mubr.f32.vlgmr.msra.gmra.mrb[4].mxu1 %v9473_v2  ;;  %380 = vperm.xlu0 %7799, %v358_v29  }
  0x14   :  { %7287 = vmatpush3.bf16.msra.mxu1 %v8260_v19  ;;  %880 = vmatprep.mubr.f32.mxu0 %v9473_v2 }
  0x15   :  { %7288 = vmatprep.subr.bf16.mxu1 %v9475_v23  ;;  %7284 = vmatpush1.bf16.msra.mxu0 %v8264_v20 }
  0x16   :  { %400 = vperm.xlu1 %7800, %v362_v30   ;;  %6898 = vmatprep.mubr.msk.f32.mxu1 %vm8124_vm1, %v9473_v2 }
  0x17   :  { %395 = vperm.xlu0 %7799, %v361_v31   ;;  %7292 = vmatprep.subr.bf16.mxu0 %v8219_v7 }
  0x18   :  { %7290 = vmatpush3.bf16.msra.mxu1 %v8281_v25 }
  0x19   :  { %7299 = vmatprep.subr.bf16.mxu1 %v9475_v23 }
  0x1a   :  { %410 = vperm.xlu1 %7800, %v364_v32  }
  0x1b   :  { %405 = vperm.xlu0 %7799, %v363_v33  }
  0x1e   :  { %420 = vperm.xlu1 %7800, %v366_v34  }
  0x1f   :  { %415 = vperm.xlu0 %7799, %v365_v35  }
  0x22   :  { %430 = vperm.xlu1 %7800, %v368_v36  }
  0x23   :  { %425 = vperm.xlu0 %7799, %v367_v37  }
  0x26   :  { %440 = vperm.xlu1 %7800, %v370_v38  }
  0x27   :  { %435 = vperm.xlu0 %7799, %v369_v39  }
  0x2a   :  { %450 = vperm.xlu1 %7800, %v372_v40  }
  0x2b   :  { %445 = vperm.xlu0 %7799, %v371_v41  }
  0x8d   :  { %v386_v42 = vpop.permute.xlu1 %385 }
  0x8e   :  { %v376_v43 = vpop.permute.xlu0 %375 }
  0x91   :  { %v391_v44 = vpop.permute.xlu1 %390 }
  0x92   :  { %v381_v45 = vpop.permute.xlu0 %380 }
  0x95   :  { %v8346_v46 = vpop.permute.xlu1 %400 }
  0x96   :  { %v8348_v47 = vpop.permute.xlu0 %395 }
  0x99   :  { %v8350_v48 = vpop.permute.xlu1 %410 }
  0x9a   :  { %v8352_v49 = vpop.permute.xlu0 %405 }
  0x9d   :  { %v8354_v50 = vpop.permute.xlu1 %420 }
  0x9e   :  { %v8356_v51 = vpop.permute.xlu0 %415 }
  0xa1   :  { %v8358_v52 = vpop.permute.xlu1 %430 }
  0xa2   :  { %v8360_v53 = vpop.permute.xlu0 %425 }
  0xa5   :  { %v8362_v55 = vpop.permute.xlu1 %440 }
  0xa6   :  { %v8366_v57 = vpop.permute.xlu0 %435 }
  0xa9   :  { %v8376_v62 = vpop.permute.xlu1 %450 }
  0xaa   :  { %v8378_v0 = vpop.permute.xlu0 %445 }
  0xd7   :  { %v120_v63 = vpop.f32.mrb[0].mxu0 }
  0xd8   :  { %v8381_v1 = vrot.slane %v120_v63, %v8369_v58  ;;  %v122_v3 = vpop.f32.mrb[1].mxu0  ;;  %v191_v4 = vpop.f32.mrb[0].mxu1 }
  0xd9   :  { %v8385_v6 = vrot.slane %v122_v3, %v8369_v58  ;;  %v8388_v8 = vrot.slane %v191_v4, %v8369_v58  ;;  %v6873_v9 = vpop.f32.mrb[1].mxu1 }
  0xda   :  { %v8396_v12 = vmul.f32 %v8381_v1, %v8376_v62  ;;  %v8400_v14 = vmul.f32 %v8381_v1, %v8378_v0  ;;  %v465_v17 = vmul.f32 %v8381_v1, %v376_v43  ;;  %v468_v22 = vmul.f32 %v8381_v1, %v381_v45 }
  0xdb   :  { %v282_v15 = vpop.f32.mrb[2].mxu0  ;;  %v466_v18 = vmul.f32 %v8385_v6, %v376_v43  ;;  %v467_v21 = vmul.f32 %v8388_v8, %v376_v43  ;;  %v470_v28 = vmul.f32 %v8388_v8, %v381_v45  ;;  %v469_v29 = vmul.f32 %v8385_v6, %v381_v45 }
  0xdc   :  { %v283_v24 = vadd.f32 %v282_v15, %v201_v5  ;;  %v284_v26 = vpop.f32.mrb[3].mxu0  ;;  %v353_v27 = vpop.f32.mrb[2].mxu1  ;;  %v471_v30 = vmul.f32 %v8381_v1, %v386_v42  ;;  %v473_v34 = vmul.f32 %v8388_v8, %v386_v42  ;;  %v472_v35 = vmul.f32 %v8385_v6, %v386_v42 }
  0xdd   :  { %v285_v31 = vadd.f32 %v284_v26, %v205_v10  ;;  %v354_v32 = vadd.f32 %v353_v27, %v209_v11  ;;  %v6878_v33 = vpop.f32.mrb[3].mxu1  ;;  %v474_v37 = vmul.f32 %v8381_v1, %v391_v44  ;;  %v476_v38 = vmul.f32 %v8388_v8, %v391_v44 }
  0xde   :  { %v8412_v36 = vrot.slane %v283_v24, %v8369_v58  ;;  %v475_v39 = vmul.f32 %v8385_v6, %v391_v44  ;;  %v477_v43 = vmul.f32 %v8381_v1, %v8348_v47  ;;  %v479_v42 = vmul.f32 %v8388_v8, %v8348_v47 }
  0xdf   :  { %v8418_v40 = vrot.slane %v285_v31, %v8369_v58  ;;  %v8421_v41 = vrot.slane %v354_v32, %v8369_v58  ;;  %v480_v24 = vmul.f32 %v8381_v1, %v8346_v46  ;;  %v485_v33 = vmul.f32 %v8388_v8, %v8352_v49 }
  0xe0   :  { %v525_v45 = vadd.f32 %v8412_v36, %v465_v17  ;;  %v8429_v54 = vadd.f32 %v8412_v36, %v468_v22  ;;  %v8432_v59 = vadd.f32 %v8412_v36, %v471_v30  ;;  %v8435_v44 = vadd.f32 %v8412_v36, %v474_v37 }
  0xe1   :  { %v526_v63 = vadd.f32 %v8418_v40, %v466_v18  ;;  %v8439_v3 = vadd.f32 %v8421_v41, %v467_v21  ;;  %v8442_v4 = vadd.f32 %v8421_v41, %v470_v28  ;;  %v8445_v5 = vadd.f32 %v8418_v40, %v469_v29 }
  0xe2   :  { %v8448_v9 = vadd.f32 %v8421_v41, %v473_v34  ;;  %v8451_v10 = vadd.f32 %v8418_v40, %v472_v35  ;;  %v8454_v11 = vadd.f32 %v8421_v41, %v476_v38  ;;  %v8457_v15 = vadd.f32 %v8418_v40, %v475_v39 }
  0xe3   :  { %v713_v17 = vpop.f32.mrb[4].mxu0  ;;  %v8460_v18 = vadd.f32 %v8412_v36, %v477_v43  ;;  %v8463_v21 = vadd.f32 %v8421_v41, %v479_v42  ;;  %v478_v22 = vmul.f32 %v8385_v6, %v8348_v47  ;;  %v482_v28 = vmul.f32 %v8388_v8, %v8346_v46 }
  0xe4   :  { %v788_v26 = vadd.f32 %v713_v17, %v525_v45  ;;  %v715_v27 = vpop.f32.mrb[5].mxu0  ;;  %v481_v29 = vmul.f32 %v8385_v6, %v8346_v46  ;;  %v483_v30 = vmul.f32 %v8381_v1, %v8352_v49  ;;  %v8479_v47 = vadd.f32 %v8412_v36, %v480_v24 }
  0xe5   :  { %v795_v31 = vadd.f32 %v715_v27, %v526_v63  ;;  %v8476_v32 = vadd.f32 %v8418_v40, %v478_v22  ;;  %v8486_v37 = vadd.f32 %v8421_v41, %v482_v28  ;;  %v511_v39 = vmul.f32 %v8385_v6, %v8376_v62 }
  0xe6   :  { %v6526_v34 = vmul.f32 -1.442695, %v788_v26  ;;  %v8483_v35 = vpop.f32.mrb[4].mxu1  ;;  %v8489_v46 = vadd.f32 %v8418_v40, %v481_v29  ;;  %v8492_v38 = vadd.f32 %v8412_v36, %v483_v30  ;;  %v508_v43 = vmul.f32 %v8385_v6, %v8378_v0 }
  0xe7   :  { %v6889_v42 = vpop.f32.mrb[5].mxu1  ;;  %v8499_v45 = vadd.f32 %v8421_v41, %v485_v33  ;;  %v484_v63 = vmul.f32 %v8385_v6, %v8352_v49  ;;  %v486_v17 = vmul.f32 %v8381_v1, %v8350_v48  ;;  %v488_v22 = vmul.f32 %v8388_v8, %v8350_v48 }
  0xe8   :  { %7801 = vpow2.f32 %v6526_v34  ;;  %v487_v24 = vmul.f32 %v8385_v6, %v8350_v48  ;;  %v6527_v26 = vmul.f32 -1.442695, %v795_v31  ;;  %v489_v28 = vmul.f32 %v8381_v1, %v8356_v51 }
  0xe9   :  { %v8510_v27 = vadd.f32 %v8418_v40, %v484_v63  ;;  %v491_v49 = vmul.f32 %v8388_v8, %v8356_v51  ;;  %v8517_v29 = vadd.f32 %v8412_v36, %v486_v17  ;;  %v8520_v30 = vadd.f32 %v8421_v41, %v488_v22 }
  0xea   :  { %v8523_v33 = vadd.f32 %v8418_v40, %v487_v24  ;;  %v490_v48 = vmul.f32 %v8385_v6, %v8356_v51  ;;  %v8528_v31 = vadd.f32 %v8412_v36, %v489_v28  ;;  %v492_v42 = vmul.f32 %v8381_v1, %v8354_v50 }
  0xeb   :  { %v8531_v34 = vadd.f32 %v8421_v41, %v491_v49  ;;  %v494_v63 = vmul.f32 %v8388_v8, %v8354_v50  ;;  %v493_v22 = vmul.f32 %v8385_v6, %v8354_v50  ;;  %v495_v51 = vmul.f32 %v8381_v1, %v8360_v53 }
  0xec   :  { %v8538_v17 = vadd.f32 %v8418_v40, %v490_v48  ;;  %v497_v24 = vmul.f32 %v8388_v8, %v8360_v53  ;;  %v8547_v28 = vadd.f32 %v8412_v36, %v492_v42  ;;  %v496_v60 = vmul.f32 %v8385_v6, %v8360_v53 }
  0xed   :  { %v8550_v49 = vadd.f32 %v8421_v41, %v494_v63  ;;  %v498_v48 = vmul.f32 %v8381_v1, %v8358_v52  ;;  %v8557_v50 = vadd.f32 %v8418_v40, %v493_v22  ;;  %v8560_v61 = vadd.f32 %v8412_v36, %v495_v51 }
  0xee   :  { %v8563_v2 = vadd.f32 %v8421_v41, %v497_v24  ;;  %v500_v42 = vmul.f32 %v8388_v8, %v8358_v52  ;;  %v8568_v63 = vadd.f32 %v8418_v40, %v496_v60  ;;  %v499_v23 = vmul.f32 %v8385_v6, %v8358_v52 }
  0xef   :  { %v8571_v53 = vadd.f32 %v8412_v36, %v498_v48  ;;  %v501_v22 = vmul.f32 %v8381_v1, %v8366_v57  ;;  %v503_v24 = vmul.f32 %v8388_v8, %v8366_v57  ;;  %v502_v56 = vmul.f32 %v8385_v6, %v8366_v57 }
  0xf0   :  { %v8578_v51 = vadd.f32 %v8421_v41, %v500_v42  ;;  %v504_v60 = vmul.f32 %v8381_v1, %v8362_v55  ;;  %v8587_v48 = vadd.f32 %v8418_v40, %v499_v23  ;;  %v506_v58 = vmul.f32 %v8388_v8, %v8362_v55 }
  0xf1   :  { %9482 = vst [vmem:[#allocation8_spill] sm:$0xff] %v8571_v53  ;;  %v8590_v52 = vadd.f32 %v8412_v36, %v501_v22  ;;  %v505_v42 = vmul.f32 %v8385_v6, %v8362_v55  ;;  %v8597_v53 = vadd.f32 %v8421_v41, %v503_v24  ;;  %v8600_v57 = vadd.f32 %v8418_v40, %v502_v56 }
  0xf2   :  { %9483 = vst [vmem:[#allocation9_spill] sm:$0xff] %v8578_v51  ;;  %v7802_v51 = vpop.eup %7801  ;;  %v8603_v1 = vadd.f32 %v8412_v36, %v504_v60  ;;  %v8607_v23 = vadd.f32 %v8412_v36, %v8400_v14  ;;  %v509_v6 = vmul.f32 %v8388_v8, %v8378_v0  ;;  %7803 = vpow2.f32 %v6527_v26 }
  0xf3   :  { %9484 = vst [vmem:[#allocation10_spill] sm:$0xff] %v8590_v52  ;;  %v792_v22 = vadd.f32 1.0, %v7802_v51  ;;  %v8610_v52 = vadd.f32 %v8421_v41, %v506_v58  ;;  %v8613_v55 = vadd.f32 %v8418_v40, %v505_v42  ;;  %v8618_v56 = vadd.f32 %v8418_v40, %v508_v43  ;;  %v8638_v43 = vld [vmem:[%s9463_s6] ss:$0 sm:$0xff] }
  0xf4   :  { %v8622_v24 = vadd.f32 %v8412_v36, %v8396_v12  ;;  %v512_v14 = vmul.f32 %v8388_v8, %v8376_v62  ;;  %v8627_v58 = vadd.f32 %v8421_v41, %v509_v6  ;;  %v8630_v51 = vadd.f32 %v8418_v40, %v511_v39 }
  0xf5   :  { %7805 = vrcp.f32 %v792_v22  ;;  %v802_v12 = vadd.f32 %v8638_v43, %v8483_v35  ;;  %v9490_v35 = vmov 0.0  }
  0xf6   :  { %9485 = vst [vmem:[#allocation11_spill] sm:$0xff] %v8622_v24  ;;  %9486 = vst [vmem:[#allocation12_spill] sm:$0xff] %v8627_v58  ;;  %v8633_v0 = vadd.f32 %v8421_v41, %v512_v14 }
  0xf7   :  { %9487 = vst [vmem:[#allocation13_spill] sm:$0xff] %v8630_v51 }
  0xf8   :  { %9488 = vst [vmem:[#allocation14_spill] sm:$0xff] %v8633_v0 }
  0xfc   :  { %v7804_v36 = vpop.eup %7803 }
  0xfd   :  { %v799_v26 = vadd.f32 1.0, %v7804_v36 }
  0xff   :  { %v7806_v62 = vpop.eup %7805 }
 0x100   :  { %v803_v8 = vmul.f32 %v7806_v62, %v802_v12 }
 0x102   :  { %v804_v60 = vadd.f32 %v803_v8, %v8439_v3  ;;  %v9489_v3 = vmov 0.0|0.0  }
 0x104   :  { %7807 = vtanh.f32 %v804_v60 }
 0x105   :  { %7809 = vrcp.f32 %v799_v26 }
 0x10e   :  { %v7808_v40 = vpop.eup %7807 }
 0x10f   :  { %v806_v39 = vsub.f32 0.0, %v7808_v40  ;;  %v7810_v41 = vpop.eup %7809 }
 0x111   :  { %v807_v42 = vmul.f32 %v7810_v41, %v806_v39 }
 0x113   :  { %v808_v22 = vadd.f32 %v7808_v40, %v807_v42 }
 0x115   :  { %809 = vst.msk [vmem:[#allocation4] sm:$0xff] %vm643_vm2, %v808_v22  ;;  %6528 = vmatmul.mubr.msk.f32.vlgmr.msra.gmra.mrb[6].mxu0 %vm643_vm2, %v808_v22  ;;  %6899 = vmatmul.mubr.msk.f32.vlgmr.msra.gmra.mrb[6].mxu1 %vm643_vm2, %v808_v22 }
 0x116   :  { %7294 = vmatpush1.bf16.msra.mxu0 %v8238_v13  ;;  %7301 = vmatpush3.bf16.msra.mxu1 %v8260_v19 }
 0x117   :  { %7296 = vmatprep.subr.bf16.mxu0 %v8248_v16  ;;  %7302 = vmatprep.subr.bf16.mxu1 %v9489_v3 }
 0x118   :  { %1049 = vmatprep.mubr.f32.mxu0 %v9490_v35  ;;  %6909 = vmatprep.mubr.msk.f32.mxu1 %vm8124_vm1, %v9490_v35 }
 0x11a   :  { %7298 = vmatpush1.bf16.msra.mxu0 %v8264_v20  ;;  %7304 = vmatpush3.bf16.msra.mxu1 %v8281_v25 }
 0x11b   :  { %7306 = vmatprep.subr.bf16.mxu0 %v8219_v7  ;;  %7313 = vmatprep.subr.bf16.mxu1 %v9489_v3 }
 0x1e8   :  { %v882_v6 = vpop.f32.mrb[6].mxu0  ;;  %v953_v14 = vpop.f32.mrb[6].mxu1 }
 0x1e9   :  { %v957_v12 = vadd.f32 %v882_v6, %v8429_v54  ;;  %v884_v36 = vpop.f32.mrb[7].mxu0  ;;  %v6900_v62 = vpop.f32.mrb[7].mxu1  ;;  %v971_v42 = vadd.f32 %v8638_v43, %v953_v14 }
 0x1ea   :  { %v964_v8 = vadd.f32 %v884_v36, %v8445_v5 }
 0x1eb   :  { %v6530_v26 = vmul.f32 -1.442695, %v957_v12 }
 0x1ec   :  { %v6531_v60 = vmul.f32 -1.442695, %v964_v8 }
 0x1ed   :  { %7811 = vpow2.f32 %v6530_v26 }
 0x1ee   :  { %7813 = vpow2.f32 %v6531_v60 }
 0x1f7   :  { %v7812_v40 = vpop.eup %7811 }
 0x1f8   :  { %v961_v39 = vadd.f32 1.0, %v7812_v40  ;;  %v7814_v41 = vpop.eup %7813 }
 0x1f9   :  { %v968_v58 = vadd.f32 1.0, %v7814_v41 }
 0x1fa   :  { %7815 = vrcp.f32 %v961_v39 }
 0x204   :  { %v7816_v0 = vpop.eup %7815 }
 0x205   :  { %v972_v51 = vmul.f32 %v7816_v0, %v971_v42 }
 0x207   :  { %v973_v24 = vadd.f32 %v972_v51, %v8442_v4 }
 0x209   :  { %7817 = vtanh.f32 %v973_v24 }
 0x20a   :  { %7819 = vrcp.f32 %v968_v58 }
 0x213   :  { %v7818_v54 = vpop.eup %7817 }
 0x214   :  { %v975_v6 = vsub.f32 %v808_v22, %v7818_v54  ;;  %v7820_v5 = vpop.eup %7819 }
 0x216   :  { %v976_v12 = vmul.f32 %v7820_v5, %v975_v6 }
 0x218   :  { %v977_v36 = vadd.f32 %v7818_v54, %v976_v12 }
 0x21a   :  { %978 = vst.msk [vmem:[#allocation4 + $0x8] sm:$0xff] %vm643_vm2, %v977_v36  ;;  %6532 = vmatmul.mubr.msk.f32.vlgmr.msra.gmra.mrb[8].mxu0 %vm643_vm2, %v977_v36  ;;  %6910 = vmatmul.mubr.msk.f32.vlgmr.msra.gmra.mrb[8].mxu1 %vm643_vm2, %v977_v36 }
 0x21b   :  { %7308 = vmatpush1.bf16.msra.mxu0 %v8238_v13  ;;  %7315 = vmatpush3.bf16.msra.mxu1 %v8260_v19 }
 0x21c   :  { %7310 = vmatprep.subr.bf16.mxu0 %v8248_v16  ;;  %7316 = vmatprep.subr.bf16.mxu1 %v9489_v3 }
 0x21d   :  { %1218 = vmatprep.mubr.f32.mxu0 %v9490_v35  ;;  %6920 = vmatprep.mubr.msk.f32.mxu1 %vm8124_vm1, %v9490_v35 }
 0x21f   :  { %7312 = vmatpush1.bf16.msra.mxu0 %v8264_v20  ;;  %7318 = vmatpush3.bf16.msra.mxu1 %v8281_v25 }
 0x220   :  { %7320 = vmatprep.subr.bf16.mxu0 %v8219_v7  ;;  %7327 = vmatprep.subr.bf16.mxu1 %v9489_v3 }
 0x2ed   :  { %v1051_v4 = vpop.f32.mrb[8].mxu0  ;;  %v1122_v24 = vpop.f32.mrb[8].mxu1 }
 0x2ee   :  { %v1126_v58 = vadd.f32 %v1051_v4, %v8432_v59  ;;  %v1053_v51 = vpop.f32.mrb[9].mxu0  ;;  %v6911_v0 = vpop.f32.mrb[9].mxu1  ;;  %v1140_v40 = vadd.f32 %v8638_v43, %v1122_v24 }
 0x2ef   :  { %v1133_v22 = vadd.f32 %v1053_v51, %v8451_v10 }
 0x2f0   :  { %v6534_v14 = vmul.f32 -1.442695, %v1126_v58 }
 0x2f1   :  { %v6535_v62 = vmul.f32 -1.442695, %v1133_v22 }
 0x2f2   :  { %7821 = vpow2.f32 %v6534_v14 }
 0x2f3   :  { %7823 = vpow2.f32 %v6535_v62 }
 0x2fc   :  { %v7822_v8 = vpop.eup %7821 }
 0x2fd   :  { %v1130_v26 = vadd.f32 1.0, %v7822_v8  ;;  %v7824_v60 = vpop.eup %7823 }
 0x2fe   :  { %v1137_v54 = vadd.f32 1.0, %v7824_v60 }
 0x2ff   :  { %7825 = vrcp.f32 %v1130_v26 }
 0x309   :  { %v7826_v39 = vpop.eup %7825 }
 0x30a   :  { %v1141_v41 = vmul.f32 %v7826_v39, %v1140_v40 }
 0x30c   :  { %v1142_v42 = vadd.f32 %v1141_v41, %v8448_v9 }
 0x30e   :  { %7827 = vtanh.f32 %v1142_v42 }
 0x30f   :  { %7829 = vrcp.f32 %v1137_v54 }
 0x318   :  { %v7828_v59 = vpop.eup %7827 }
 0x319   :  { %v1144_v6 = vsub.f32 %v977_v36, %v7828_v59  ;;  %v7830_v10 = vpop.eup %7829 }
 0x31b   :  { %v1145_v5 = vmul.f32 %v7830_v10, %v1144_v6 }
 0x31d   :  { %v1146_v12 = vadd.f32 %v7828_v59, %v1145_v5 }
 0x31f   :  { %1147 = vst.msk [vmem:[#allocation4 + $0x10] sm:$0xff] %vm643_vm2, %v1146_v12  ;;  %6536 = vmatmul.mubr.msk.f32.vlgmr.msra.gmra.mrb[10].mxu0 %vm643_vm2, %v1146_v12  ;;  %6921 = vmatmul.mubr.msk.f32.vlgmr.msra.gmra.mrb[10].mxu1 %vm643_vm2, %v1146_v12 }
 0x320   :  { %7322 = vmatpush1.bf16.msra.mxu0 %v8238_v13  ;;  %7329 = vmatpush3.bf16.msra.mxu1 %v8260_v19 }
 0x321   :  { %7324 = vmatprep.subr.bf16.mxu0 %v8248_v16  ;;  %7330 = vmatprep.subr.bf16.mxu1 %v9489_v3 }
 0x322   :  { %1387 = vmatprep.mubr.f32.mxu0 %v9490_v35  ;;  %6931 = vmatprep.mubr.msk.f32.mxu1 %vm8124_vm1, %v9490_v35 }
 0x324   :  { %7326 = vmatpush1.bf16.msra.mxu0 %v8264_v20  ;;  %7332 = vmatpush3.bf16.msra.mxu1 %v8281_v25 }
 0x325   :  { %7334 = vmatprep.subr.bf16.mxu0 %v8219_v7  ;;  %7341 = vmatprep.subr.bf16.mxu1 %v9489_v3 }
 0x3f2   :  { %v1220_v9 = vpop.f32.mrb[10].mxu0  ;;  %v1291_v36 = vpop.f32.mrb[10].mxu1 }
 0x3f3   :  { %v1295_v4 = vadd.f32 %v1220_v9, %v8435_v44  ;;  %v1222_v24 = vpop.f32.mrb[11].mxu0  ;;  %v6922_v58 = vpop.f32.mrb[11].mxu1  ;;  %v1309_v26 = vadd.f32 %v8638_v43, %v1291_v36 }
 0x3f4   :  { %v1302_v51 = vadd.f32 %v1222_v24, %v8457_v15 }
 0x3f5   :  { %v6538_v0 = vmul.f32 -1.442695, %v1295_v4 }
 0x3f6   :  { %v6539_v22 = vmul.f32 -1.442695, %v1302_v51 }
 0x3f7   :  { %7831 = vpow2.f32 %v6538_v0 }
 0x3f8   :  { %7833 = vpow2.f32 %v6539_v22 }
 0x401   :  { %v7832_v14 = vpop.eup %7831 }
 0x402   :  { %v1299_v62 = vadd.f32 1.0, %v7832_v14  ;;  %v7834_v8 = vpop.eup %7833 }
 0x403   :  { %v1306_v41 = vadd.f32 1.0, %v7834_v8 }
 0x404   :  { %7835 = vrcp.f32 %v1299_v62 }
 0x40e   :  { %v7836_v60 = vpop.eup %7835 }
 0x40f   :  { %v1310_v40 = vmul.f32 %v7836_v60, %v1309_v26 }
 0x411   :  { %v1311_v39 = vadd.f32 %v1310_v40, %v8454_v11 }
 0x413   :  { %7837 = vtanh.f32 %v1311_v39 }
 0x414   :  { %7839 = vrcp.f32 %v1306_v41 }
 0x41d   :  { %v7838_v44 = vpop.eup %7837 }
 0x41e   :  { %v1313_v42 = vsub.f32 %v1146_v12, %v7838_v44  ;;  %v7840_v15 = vpop.eup %7839 }
 0x420   :  { %v1314_v54 = vmul.f32 %v7840_v15, %v1313_v42 }
 0x422   :  { %v1315_v59 = vadd.f32 %v7838_v44, %v1314_v54 }
 0x424   :  { %1316 = vst.msk [vmem:[#allocation4 + $0x18] sm:$0xff] %vm643_vm2, %v1315_v59  ;;  %6540 = vmatmul.mubr.msk.f32.vlgmr.msra.gmra.mrb[12].mxu0 %vm643_vm2, %v1315_v59  ;;  %6932 = vmatmul.mubr.msk.f32.vlgmr.msra.gmra.mrb[12].mxu1 %vm643_vm2, %v1315_v59 }
 0x425   :  { %7336 = vmatpush1.bf16.msra.mxu0 %v8238_v13  ;;  %7343 = vmatpush3.bf16.msra.mxu1 %v8260_v19 }
 0x426   :  { %7338 = vmatprep.subr.bf16.mxu0 %v8248_v16  ;;  %7344 = vmatprep.subr.bf16.mxu1 %v9489_v3 }
 0x427   :  { %1556 = vmatprep.mubr.f32.mxu0 %v9490_v35  ;;  %6942 = vmatprep.mubr.msk.f32.mxu1 %vm8124_vm1, %v9490_v35 }
 0x429   :  { %7340 = vmatpush1.bf16.msra.mxu0 %v8264_v20  ;;  %7346 = vmatpush3.bf16.msra.mxu1 %v8281_v25 }
 0x42a   :  { %7348 = vmatprep.subr.bf16.mxu0 %v8219_v7  ;;  %7355 = vmatprep.subr.bf16.mxu1 %v9489_v3 }
 0x4f7   :  { %v1389_v11 = vpop.f32.mrb[12].mxu0  ;;  %v1460_v6 = vpop.f32.mrb[12].mxu1 }
 0x4f8   :  { %v1464_v10 = vadd.f32 %v1389_v11, %v8460_v18  ;;  %v1391_v5 = vpop.f32.mrb[13].mxu0  ;;  %v6933_v12 = vpop.f32.mrb[13].mxu1  ;;  %v1478_v0 = vadd.f32 %v8638_v43, %v1460_v6 }
 0x4f9   :  { %v1471_v9 = vadd.f32 %v1391_v5, %v8476_v32 }
 0x4fa   :  { %v6542_v36 = vmul.f32 -1.442695, %v1464_v10 }
 0x4fb   :  { %v6543_v4 = vmul.f32 -1.442695, %v1471_v9 }
 0x4fc   :  { %7841 = vpow2.f32 %v6542_v36 }
 0x4fd   :  { %7843 = vpow2.f32 %v6543_v4 }
 0x506   :  { %v7842_v24 = vpop.eup %7841 }
 0x507   :  { %v1468_v58 = vadd.f32 1.0, %v7842_v24  ;;  %v7844_v51 = vpop.eup %7843 }
 0x508   :  { %v1475_v8 = vadd.f32 1.0, %v7844_v51 }
 0x509   :  { %7845 = vrcp.f32 %v1468_v58 }
 0x513   :  { %v7846_v22 = vpop.eup %7845 }
 0x514   :  { %v1479_v14 = vmul.f32 %v7846_v22, %v1478_v0 }
 0x516   :  { %v1480_v62 = vadd.f32 %v1479_v14, %v8463_v21 }
 0x518   :  { %7847 = vtanh.f32 %v1480_v62 }
 0x519   :  { %7849 = vrcp.f32 %v1475_v8 }
 0x522   :  { %v7848_v18 = vpop.eup %7847 }
 0x523   :  { %v1482_v26 = vsub.f32 %v1315_v59, %v7848_v18  ;;  %v7850_v32 = vpop.eup %7849 }
 0x525   :  { %v1483_v60 = vmul.f32 %v7850_v32, %v1482_v26 }
 0x527   :  { %v1484_v40 = vadd.f32 %v7848_v18, %v1483_v60 }
 0x529   :  { %1485 = vst.msk [vmem:[#allocation4 + $0x20] sm:$0xff] %vm643_vm2, %v1484_v40  ;;  %6544 = vmatmul.mubr.msk.f32.vlgmr.msra.gmra.mrb[14].mxu0 %vm643_vm2, %v1484_v40  ;;  %6943 = vmatmul.mubr.msk.f32.vlgmr.msra.gmra.mrb[14].mxu1 %vm643_vm2, %v1484_v40 }
 0x52a   :  { %7350 = vmatpush1.bf16.msra.mxu0 %v8238_v13  ;;  %7357 = vmatpush3.bf16.msra.mxu1 %v8260_v19 }
 0x52b   :  { %7352 = vmatprep.subr.bf16.mxu0 %v8248_v16  ;;  %7358 = vmatprep.subr.bf16.mxu1 %v9489_v3 }
 0x52c   :  { %1725 = vmatprep.mubr.f32.mxu0 %v9490_v35  ;;  %6953 = vmatprep.mubr.msk.f32.mxu1 %vm8124_vm1, %v9490_v35 }
 0x52e   :  { %7354 = vmatpush1.bf16.msra.mxu0 %v8264_v20  ;;  %7360 = vmatpush3.bf16.msra.mxu1 %v8281_v25 }
 0x52f   :  { %7362 = vmatprep.subr.bf16.mxu0 %v8219_v7  ;;  %7369 = vmatprep.subr.bf16.mxu1 %v9489_v3 }
 0x5fc   :  { %v1558_v21 = vpop.f32.mrb[14].mxu0  ;;  %v1629_v39 = vpop.f32.mrb[14].mxu1 }
 0x5fd   :  { %v1633_v41 = vadd.f32 %v1558_v21, %v8479_v47  ;;  %v1560_v44 = vpop.f32.mrb[15].mxu0  ;;  %v6944_v42 = vpop.f32.mrb[15].mxu1  ;;  %v1647_v5 = vadd.f32 %v8638_v43, %v1629_v39 }
 0x5fe   :  { %v1640_v15 = vadd.f32 %v1560_v44, %v8489_v46 }
 0x5ff   :  { %v6546_v54 = vmul.f32 -1.442695, %v1633_v41 }
 0x600   :  { %v6547_v59 = vmul.f32 -1.442695, %v1640_v15 }
 0x601   :  { %7851 = vpow2.f32 %v6546_v54 }
 0x602   :  { %7853 = vpow2.f32 %v6547_v59 }
 0x60b   :  { %v7852_v11 = vpop.eup %7851 }
 0x60c   :  { %v1637_v6 = vadd.f32 1.0, %v7852_v11  ;;  %v7854_v10 = vpop.eup %7853 }
 0x60d   :  { %v1644_v4 = vadd.f32 1.0, %v7854_v10 }
 0x60e   :  { %7855 = vrcp.f32 %v1637_v6 }
 0x618   :  { %v7856_v12 = vpop.eup %7855 }
 0x619   :  { %v1648_v9 = vmul.f32 %v7856_v12, %v1647_v5 }
 0x61b   :  { %v1649_v36 = vadd.f32 %v1648_v9, %v8486_v37 }
 0x61d   :  { %7857 = vtanh.f32 %v1649_v36 }
 0x61e   :  { %7859 = vrcp.f32 %v1644_v4 }
 0x627   :  { %v7858_v47 = vpop.eup %7857 }
 0x628   :  { %v1651_v24 = vsub.f32 %v1484_v40, %v7858_v47  ;;  %v7860_v46 = vpop.eup %7859 }
 0x62a   :  { %v1652_v58 = vmul.f32 %v7860_v46, %v1651_v24 }
 0x62c   :  { %v1653_v51 = vadd.f32 %v7858_v47, %v1652_v58 }
 0x62e   :  { %1654 = vst.msk [vmem:[#allocation4 + $0x28] sm:$0xff] %vm643_vm2, %v1653_v51  ;;  %6548 = vmatmul.mubr.msk.f32.vlgmr.msra.gmra.mrb[16].mxu0 %vm643_vm2, %v1653_v51  ;;  %6954 = vmatmul.mubr.msk.f32.vlgmr.msra.gmra.mrb[16].mxu1 %vm643_vm2, %v1653_v51 }
 0x62f   :  { %7364 = vmatpush1.bf16.msra.mxu0 %v8238_v13  ;;  %7371 = vmatpush3.bf16.msra.mxu1 %v8260_v19 }
 0x630   :  { %7366 = vmatprep.subr.bf16.mxu0 %v8248_v16  ;;  %7372 = vmatprep.subr.bf16.mxu1 %v9489_v3 }
 0x631   :  { %1894 = vmatprep.mubr.f32.mxu0 %v9490_v35  ;;  %6964 = vmatprep.mubr.msk.f32.mxu1 %vm8124_vm1, %v9490_v35 }
 0x633   :  { %7368 = vmatpush1.bf16.msra.mxu0 %v8264_v20  ;;  %7374 = vmatpush3.bf16.msra.mxu1 %v8281_v25 }
 0x634   :  { %7376 = vmatprep.subr.bf16.mxu0 %v8219_v7  ;;  %7383 = vmatprep.subr.bf16.mxu1 %v9489_v3 }
 0x701   :  { %v1727_v37 = vpop.f32.mrb[16].mxu0  ;;  %v1798_v0 = vpop.f32.mrb[16].mxu1 }
 0x702   :  { %v1802_v22 = vadd.f32 %v1727_v37, %v8492_v38  ;;  %v1729_v14 = vpop.f32.mrb[17].mxu0  ;;  %v6955_v62 = vpop.f32.mrb[17].mxu1  ;;  %v1816_v21 = vadd.f32 %v8638_v43, %v1798_v0 }
 0x703   :  { %v1809_v8 = vadd.f32 %v1729_v14, %v8510_v27 }
 0x704   :  { %v6550_v18 = vmul.f32 -1.442695, %v1802_v22 }
 0x705   :  { %v6551_v26 = vmul.f32 -1.442695, %v1809_v8 }
 0x706   :  { %7861 = vpow2.f32 %v6550_v18 }
 0x707   :  { %7863 = vpow2.f32 %v6551_v26 }
 0x710   :  { %v7862_v32 = vpop.eup %7861 }
 0x711   :  { %v1806_v60 = vadd.f32 1.0, %v7862_v32  ;;  %v7864_v40 = vpop.eup %7863 }
 0x712   :  { %v1813_v42 = vadd.f32 1.0, %v7864_v40 }
 0x713   :  { %7865 = vrcp.f32 %v1806_v60 }
 0x71d   :  { %v7866_v39 = vpop.eup %7865 }
 0x71e   :  { %v1817_v41 = vmul.f32 %v7866_v39, %v1816_v21 }
 0x720   :  { %v1818_v44 = vadd.f32 %v1817_v41, %v8499_v45 }
 0x722   :  { %7867 = vtanh.f32 %v1818_v44 }
 0x723   :  { %7869 = vrcp.f32 %v1813_v42 }
 0x72c   :  { %v7868_v38 = vpop.eup %7867 }
 0x72d   :  { %v1820_v15 = vsub.f32 %v1653_v51, %v7868_v38  ;;  %v7870_v27 = vpop.eup %7869 }
 0x72f   :  { %v1821_v54 = vmul.f32 %v7870_v27, %v1820_v15 }
 0x731   :  { %v1822_v59 = vadd.f32 %v7868_v38, %v1821_v54 }
 0x733   :  { %1823 = vst.msk [vmem:[#allocation4 + $0x30] sm:$0xff] %vm643_vm2, %v1822_v59  ;;  %6552 = vmatmul.mubr.msk.f32.vlgmr.msra.gmra.mrb[18].mxu0 %vm643_vm2, %v1822_v59  ;;  %6965 = vmatmul.mubr.msk.f32.vlgmr.msra.gmra.mrb[18].mxu1 %vm643_vm2, %v1822_v59 }
 0x734   :  { %7378 = vmatpush1.bf16.msra.mxu0 %v8238_v13  ;;  %7385 = vmatpush3.bf16.msra.mxu1 %v8260_v19 }
 0x735   :  { %7380 = vmatprep.subr.bf16.mxu0 %v8248_v16  ;;  %7386 = vmatprep.subr.bf16.mxu1 %v9489_v3 }
 0x736   :  { %2063 = vmatprep.mubr.f32.mxu0 %v9490_v35  ;;  %6975 = vmatprep.mubr.msk.f32.mxu1 %vm8124_vm1, %v9490_v35 }
 0x738   :  { %7382 = vmatpush1.bf16.msra.mxu0 %v8264_v20  ;;  %7388 = vmatpush3.bf16.msra.mxu1 %v8281_v25 }
 0x739   :  { %7390 = vmatprep.subr.bf16.mxu0 %v8219_v7  ;;  %7397 = vmatprep.subr.bf16.mxu1 %v9489_v3 }
 0x806   :  { %v1896_v45 = vpop.f32.mrb[18].mxu0  ;;  %v1967_v11 = vpop.f32.mrb[18].mxu1 }
 0x807   :  { %v1971_v6 = vadd.f32 %v1896_v45, %v8517_v29  ;;  %v1898_v10 = vpop.f32.mrb[19].mxu0  ;;  %v6966_v5 = vpop.f32.mrb[19].mxu1  ;;  %v1985_v46 = vadd.f32 %v8638_v43, %v1967_v11 }
 0x808   :  { %v1978_v12 = vadd.f32 %v1898_v10, %v8523_v33 }
 0x809   :  { %v6554_v9 = vmul.f32 -1.442695, %v1971_v6 }
 0x80a   :  { %v6555_v36 = vmul.f32 -1.442695, %v1978_v12 }
 0x80b   :  { %7871 = vpow2.f32 %v6554_v9 }
 0x80c   :  { %7873 = vpow2.f32 %v6555_v36 }
 0x815   :  { %v7872_v4 = vpop.eup %7871 }
 0x816   :  { %v1975_v47 = vadd.f32 1.0, %v7872_v4  ;;  %v7874_v24 = vpop.eup %7873 }
 0x817   :  { %v1982_v0 = vadd.f32 1.0, %v7874_v24 }
 0x818   :  { %7875 = vrcp.f32 %v1975_v47 }
 0x822   :  { %v7876_v58 = vpop.eup %7875 }
 0x823   :  { %v1986_v51 = vmul.f32 %v7876_v58, %v1985_v46 }
 0x825   :  { %v1987_v37 = vadd.f32 %v1986_v51, %v8520_v30 }
 0x827   :  { %7877 = vtanh.f32 %v1987_v37 }
 0x828   :  { %7879 = vrcp.f32 %v1982_v0 }
 0x831   :  { %v7878_v29 = vpop.eup %7877 }
 0x832   :  { %v1989_v22 = vsub.f32 %v1822_v59, %v7878_v29  ;;  %v7880_v33 = vpop.eup %7879 }
 0x834   :  { %v1990_v14 = vmul.f32 %v7880_v33, %v1989_v22 }
 0x836   :  { %v1991_v62 = vadd.f32 %v7878_v29, %v1990_v14 }
 0x838   :  { %1992 = vst.msk [vmem:[#allocation4 + $0x38] sm:$0xff] %vm643_vm2, %v1991_v62  ;;  %6556 = vmatmul.mubr.msk.f32.vlgmr.msra.gmra.mrb[20].mxu0 %vm643_vm2, %v1991_v62  ;;  %6976 = vmatmul.mubr.msk.f32.vlgmr.msra.gmra.mrb[20].mxu1 %vm643_vm2, %v1991_v62 }
 0x839   :  { %7392 = vmatpush1.bf16.msra.mxu0 %v8238_v13  ;;  %7399 = vmatpush3.bf16.msra.mxu1 %v8260_v19 }
 0x83a   :  { %7394 = vmatprep.subr.bf16.mxu0 %v8248_v16  ;;  %7400 = vmatprep.subr.bf16.mxu1 %v9489_v3 }
 0x83b   :  { %2232 = vmatprep.mubr.f32.mxu0 %v9490_v35  ;;  %6986 = vmatprep.mubr.msk.f32.mxu1 %vm8124_vm1, %v9490_v35 }
 0x83d   :  { %7396 = vmatpush1.bf16.msra.mxu0 %v8264_v20  ;;  %7402 = vmatpush3.bf16.msra.mxu1 %v8281_v25 }
 0x83e   :  { %7404 = vmatprep.subr.bf16.mxu0 %v8219_v7  ;;  %7411 = vmatprep.subr.bf16.mxu1 %v9489_v3 }
 0x90b   :  { %v2065_v30 = vpop.f32.mrb[20].mxu0  ;;  %v2136_v8 = vpop.f32.mrb[20].mxu1 }
 0x90c   :  { %v2140_v18 = vadd.f32 %v2065_v30, %v8528_v31  ;;  %v2067_v26 = vpop.f32.mrb[21].mxu0  ;;  %v6977_v32 = vpop.f32.mrb[21].mxu1  ;;  %v2154_v42 = vadd.f32 %v8638_v43, %v2136_v8 }
 0x90d   :  { %v2147_v60 = vadd.f32 %v2067_v26, %v8538_v17 }
 0x90e   :  { %v6558_v40 = vmul.f32 -1.442695, %v2140_v18 }
 0x90f   :  { %v6559_v21 = vmul.f32 -1.442695, %v2147_v60 }
 0x910   :  { %7881 = vpow2.f32 %v6558_v40 }
 0x911   :  { %7883 = vpow2.f32 %v6559_v21 }
 0x91a   :  { %v7882_v39 = vpop.eup %7881 }
 0x91b   :  { %v2144_v41 = vadd.f32 1.0, %v7882_v39  ;;  %v7884_v44 = vpop.eup %7883 }
 0x91c   :  { %v2151_v54 = vadd.f32 1.0, %v7884_v44 }
 0x91d   :  { %7885 = vrcp.f32 %v2144_v41 }
 0x927   :  { %v7886_v38 = vpop.eup %7885 }
 0x928   :  { %v2155_v15 = vmul.f32 %v7886_v38, %v2154_v42 }
 0x92a   :  { %v2156_v27 = vadd.f32 %v2155_v15, %v8531_v34 }
 0x92c   :  { %7887 = vtanh.f32 %v2156_v27 }
 0x92d   :  { %7889 = vrcp.f32 %v2151_v54 }
 0x936   :  { %v7888_v31 = vpop.eup %7887 }
 0x937   :  { %v2158_v59 = vsub.f32 %v1991_v62, %v7888_v31  ;;  %v7890_v17 = vpop.eup %7889 }
 0x939   :  { %v2159_v45 = vmul.f32 %v7890_v17, %v2158_v59  ;;  %v9491_v17 = vld [vmem:[#allocation8_spill] sm:$0xff] }
 0x93b   :  { %v2160_v11 = vadd.f32 %v7888_v31, %v2159_v45 }
 0x93d   :  { %2161 = vst.msk [vmem:[#allocation4 + $0x40] sm:$0xff] %vm643_vm2, %v2160_v11  ;;  %6560 = vmatmul.mubr.msk.f32.vlgmr.msra.gmra.mrb[22].mxu0 %vm643_vm2, %v2160_v11  ;;  %6987 = vmatmul.mubr.msk.f32.vlgmr.msra.gmra.mrb[22].mxu1 %vm643_vm2, %v2160_v11 }
 0x93e   :  { %7406 = vmatpush1.bf16.msra.mxu0 %v8238_v13  ;;  %7413 = vmatpush3.bf16.msra.mxu1 %v8260_v19 }
 0x93f   :  { %7408 = vmatprep.subr.bf16.mxu0 %v8248_v16  ;;  %7414 = vmatprep.subr.bf16.mxu1 %v9489_v3 }
 0x940   :  { %2401 = vmatprep.mubr.f32.mxu0 %v9490_v35  ;;  %6997 = vmatprep.mubr.msk.f32.mxu1 %vm8124_vm1, %v9490_v35 }
 0x942   :  { %7410 = vmatpush1.bf16.msra.mxu0 %v8264_v20  ;;  %7416 = vmatpush3.bf16.msra.mxu1 %v8281_v25 }
 0x943   :  { %7418 = vmatprep.subr.bf16.mxu0 %v8219_v7  ;;  %7425 = vmatprep.subr.bf16.mxu1 %v9489_v3 }
 0xa10   :  { %v2234_v34 = vpop.f32.mrb[22].mxu0  ;;  %v2305_v6 = vpop.f32.mrb[22].mxu1 }
 0xa11   :  { %v2309_v10 = vadd.f32 %v2234_v34, %v8547_v28  ;;  %v2236_v5 = vpop.f32.mrb[23].mxu0  ;;  %v6988_v12 = vpop.f32.mrb[23].mxu1  ;;  %v2323_v58 = vadd.f32 %v8638_v43, %v2305_v6 }
 0xa12   :  { %v2316_v9 = vadd.f32 %v2236_v5, %v8557_v50 }
 0xa13   :  { %v6562_v36 = vmul.f32 -1.442695, %v2309_v10 }
 0xa14   :  { %v6563_v4 = vmul.f32 -1.442695, %v2316_v9 }
 0xa15   :  { %7891 = vpow2.f32 %v6562_v36 }
 0xa16   :  { %7893 = vpow2.f32 %v6563_v4 }
 0xa1f   :  { %v7892_v47 = vpop.eup %7891 }
 0xa20   :  { %v2313_v24 = vadd.f32 1.0, %v7892_v47  ;;  %v7894_v46 = vpop.eup %7893 }
 0xa21   :  { %v2320_v29 = vadd.f32 1.0, %v7894_v46  ;;  %v9492_v46 = vld [vmem:[#allocation9_spill] sm:$0xff] }
 0xa22   :  { %7895 = vrcp.f32 %v2313_v24 }
 0xa2c   :  { %v7896_v51 = vpop.eup %7895 }
 0xa2d   :  { %v2324_v37 = vmul.f32 %v7896_v51, %v2323_v58 }
 0xa2f   :  { %v2325_v0 = vadd.f32 %v2324_v37, %v8550_v49 }
 0xa31   :  { %7897 = vtanh.f32 %v2325_v0 }
 0xa32   :  { %7899 = vrcp.f32 %v2320_v29 }
 0xa3b   :  { %v7898_v28 = vpop.eup %7897 }
 0xa3c   :  { %v2327_v22 = vsub.f32 %v2160_v11, %v7898_v28  ;;  %v7900_v50 = vpop.eup %7899 }
 0xa3e   :  { %v2328_v33 = vmul.f32 %v7900_v50, %v2327_v22 }
 0xa40   :  { %v2329_v14 = vadd.f32 %v7898_v28, %v2328_v33  ;;  %v9493_v33 = vld [vmem:[#allocation10_spill] sm:$0xff] }
 0xa42   :  { %2330 = vst.msk [vmem:[#allocation4 + $0x48] sm:$0xff] %vm643_vm2, %v2329_v14  ;;  %6564 = vmatmul.mubr.msk.f32.vlgmr.msra.gmra.mrb[24].mxu0 %vm643_vm2, %v2329_v14  ;;  %6998 = vmatmul.mubr.msk.f32.vlgmr.msra.gmra.mrb[24].mxu1 %vm643_vm2, %v2329_v14 }
 0xa43   :  { %7420 = vmatpush1.bf16.msra.mxu0 %v8238_v13  ;;  %7427 = vmatpush3.bf16.msra.mxu1 %v8260_v19 }
 0xa44   :  { %7422 = vmatprep.subr.bf16.mxu0 %v8248_v16  ;;  %7428 = vmatprep.subr.bf16.mxu1 %v9489_v3 }
 0xa45   :  { %2570 = vmatprep.mubr.f32.mxu0 %v9490_v35  ;;  %7008 = vmatprep.mubr.msk.f32.mxu1 %vm8124_vm1, %v9490_v35 }
 0xa47   :  { %7424 = vmatpush1.bf16.msra.mxu0 %v8264_v20  ;;  %7430 = vmatpush3.bf16.msra.mxu1 %v8281_v25 }
 0xa48   :  { %7432 = vmatprep.subr.bf16.mxu0 %v8219_v7  ;;  %7439 = vmatprep.subr.bf16.mxu1 %v9489_v3 }
 0xb15   :  { %v2403_v49 = vpop.f32.mrb[24].mxu0  ;;  %v2474_v62 = vpop.f32.mrb[24].mxu1 }
 0xb16   :  { %v2478_v30 = vadd.f32 %v2403_v49, %v8560_v61  ;;  %v2405_v8 = vpop.f32.mrb[25].mxu0  ;;  %v6999_v18 = vpop.f32.mrb[25].mxu1  ;;  %v2492_v41 = vadd.f32 %v8638_v43, %v2474_v62 }
 0xb17   :  { %v2485_v26 = vadd.f32 %v2405_v8, %v8568_v63 }
 0xb18   :  { %v6566_v32 = vmul.f32 -1.442695, %v2478_v30 }
 0xb19   :  { %v6567_v60 = vmul.f32 -1.442695, %v2485_v26 }
 0xb1a   :  { %7901 = vpow2.f32 %v6566_v32 }
 0xb1b   :  { %7903 = vpow2.f32 %v6567_v60 }
 0xb24   :  { %v7902_v40 = vpop.eup %7901 }
 0xb25   :  { %v2482_v21 = vadd.f32 1.0, %v7902_v40  ;;  %v7904_v39 = vpop.eup %7903 }
 0xb26   :  { %v2489_v15 = vadd.f32 1.0, %v7904_v39 }
 0xb27   :  { %7905 = vrcp.f32 %v2482_v21 }
 0xb31   :  { %v7906_v44 = vpop.eup %7905 }
 0xb32   :  { %v2493_v42 = vmul.f32 %v7906_v44, %v2492_v41 }
 0xb34   :  { %v2494_v38 = vadd.f32 %v2493_v42, %v8563_v2 }
 0xb36   :  { %7907 = vtanh.f32 %v2494_v38 }
 0xb37   :  { %7909 = vrcp.f32 %v2489_v15 }
 0xb40   :  { %v7908_v61 = vpop.eup %7907 }
 0xb41   :  { %v2496_v27 = vsub.f32 %v2329_v14, %v7908_v61  ;;  %v7910_v63 = vpop.eup %7909 }
 0xb43   :  { %v2497_v54 = vmul.f32 %v7910_v63, %v2496_v27 }
 0xb45   :  { %v2498_v31 = vadd.f32 %v7908_v61, %v2497_v54 }
 0xb47   :  { %2499 = vst.msk [vmem:[#allocation4 + $0x50] sm:$0xff] %vm643_vm2, %v2498_v31  ;;  %6568 = vmatmul.mubr.msk.f32.vlgmr.msra.gmra.mrb[26].mxu0 %vm643_vm2, %v2498_v31  ;;  %7009 = vmatmul.mubr.msk.f32.vlgmr.msra.gmra.mrb[26].mxu1 %vm643_vm2, %v2498_v31 }
 0xb48   :  { %7434 = vmatpush1.bf16.msra.mxu0 %v8238_v13  ;;  %7441 = vmatpush3.bf16.msra.mxu1 %v8260_v19 }
 0xb49   :  { %7436 = vmatprep.subr.bf16.mxu0 %v8248_v16  ;;  %7442 = vmatprep.subr.bf16.mxu1 %v9489_v3 }
 0xb4a   :  { %2739 = vmatprep.mubr.f32.mxu0 %v9490_v35  ;;  %7019 = vmatprep.mubr.msk.f32.mxu1 %vm8124_vm1, %v9490_v35 }
 0xb4c   :  { %7438 = vmatpush1.bf16.msra.mxu0 %v8264_v20  ;;  %7444 = vmatpush3.bf16.msra.mxu1 %v8281_v25 }
 0xb4d   :  { %7446 = vmatprep.subr.bf16.mxu0 %v8219_v7  ;;  %7453 = vmatprep.subr.bf16.mxu1 %v9489_v3 }
 0xc1a   :  { %v2572_v2 = vpop.f32.mrb[26].mxu0  ;;  %v2643_v59 = vpop.f32.mrb[26].mxu1 }
 0xc1b   :  { %v2647_v45 = vadd.f32 %v2572_v2, %v9491_v17  ;;  %v2574_v11 = vpop.f32.mrb[27].mxu0  ;;  %v7010_v34 = vpop.f32.mrb[27].mxu1  ;;  %v2661_v4 = vadd.f32 %v8638_v43, %v2643_v59 }
 0xc1c   :  { %v2654_v6 = vadd.f32 %v2574_v11, %v8587_v48 }
 0xc1d   :  { %v6570_v10 = vmul.f32 -1.442695, %v2647_v45 }
 0xc1e   :  { %v6571_v5 = vmul.f32 -1.442695, %v2654_v6 }
 0xc1f   :  { %7911 = vpow2.f32 %v6570_v10 }
 0xc20   :  { %7913 = vpow2.f32 %v6571_v5 }
 0xc29   :  { %v7912_v12 = vpop.eup %7911 }
 0xc2a   :  { %v2651_v9 = vadd.f32 1.0, %v7912_v12  ;;  %v7914_v36 = vpop.eup %7913 }
 0xc2b   :  { %v2658_v51 = vadd.f32 1.0, %v7914_v36 }
 0xc2c   :  { %7915 = vrcp.f32 %v2651_v9 }
 0xc36   :  { %v7916_v47 = vpop.eup %7915 }
 0xc37   :  { %v2662_v24 = vmul.f32 %v7916_v47, %v2661_v4 }
 0xc39   :  { %v2663_v58 = vadd.f32 %v2662_v24, %v9492_v46 }
 0xc3b   :  { %7917 = vtanh.f32 %v2663_v58 }
 0xc3c   :  { %7919 = vrcp.f32 %v2658_v51 }
 0xc45   :  { %v7918_v37 = vpop.eup %7917 }
 0xc46   :  { %v2665_v0 = vsub.f32 %v2498_v31, %v7918_v37  ;;  %v7920_v48 = vpop.eup %7919 }
 0xc48   :  { %v2666_v29 = vmul.f32 %v7920_v48, %v2665_v0  ;;  %v8900_v48 = vld [vmem:[%s9463_s6] ss:$0 sm:$0xff] }
 0xc4a   :  { %v2667_v28 = vadd.f32 %v7918_v37, %v2666_v29 }
 0xc4c   :  { %2668 = vst.msk [vmem:[#allocation4 + $0x58] sm:$0xff] %vm643_vm2, %v2667_v28  ;;  %6572 = vmatmul.mubr.msk.f32.vlgmr.msra.gmra.mrb[28].mxu0 %vm643_vm2, %v2667_v28  ;;  %7020 = vmatmul.mubr.msk.f32.vlgmr.msra.gmra.mrb[28].mxu1 %vm643_vm2, %v2667_v28 }
 0xc4d   :  { %7448 = vmatpush1.bf16.msra.mxu0 %v8238_v13  ;;  %7455 = vmatpush3.bf16.msra.mxu1 %v8260_v19 }
 0xc4e   :  { %7450 = vmatprep.subr.bf16.mxu0 %v8248_v16  ;;  %7456 = vmatprep.subr.bf16.mxu1 %v9489_v3 }
 0xc4f   :  { %2908 = vmatprep.mubr.f32.mxu0 %v9490_v35  ;;  %7030 = vmatprep.mubr.msk.f32.mxu1 %vm8124_vm1, %v9490_v35 }
 0xc51   :  { %7452 = vmatpush1.bf16.msra.mxu0 %v8264_v20  ;;  %7458 = vmatpush3.bf16.msra.mxu1 %v8281_v25 }
 0xc52   :  { %7460 = vmatprep.subr.bf16.mxu0 %v8219_v7  ;;  %7467 = vmatprep.subr.bf16.mxu1 %v9489_v3 }
 0xd1f   :  { %v2741_v22 = vpop.f32.mrb[28].mxu0  ;;  %v2812_v50 = vpop.f32.mrb[28].mxu1 }
 0xd20   :  { %v2816_v14 = vadd.f32 %v2741_v22, %v9493_v33  ;;  %v2743_v49 = vpop.f32.mrb[29].mxu0  ;;  %v7021_v62 = vpop.f32.mrb[29].mxu1  ;;  %v2830_v40 = vadd.f32 %v8638_v43, %v2812_v50  ;;  %v9494_v22 = vld [vmem:[#allocation12_spill] sm:$0xff] }
 0xd21   :  { %v2823_v30 = vadd.f32 %v2743_v49, %v8600_v57  ;;  %v3361_v49 = vld [vmem:[%s9464_s7] sm:$0xff]  ;;  %v3364_v62 = vld [vmem:[%s9464_s7 + $0x18] sm:$0xff] }
 0xd22   :  { %v6574_v8 = vmul.f32 -1.442695, %v2816_v14 }
 0xd23   :  { %v6575_v18 = vmul.f32 -1.442695, %v2823_v30 }
 0xd24   :  { %7921 = vpow2.f32 %v6574_v8  ;;  %v3368_v8 = vld [vmem:[%s9464_s7 + $0x38] sm:$0xff] }
 0xd25   :  { %7923 = vpow2.f32 %v6575_v18  ;;  %v3371_v18 = vld [vmem:[%s9464_s7 + $0x50] sm:$0xff] }
 0xd2e   :  { %v7922_v26 = vpop.eup %7921 }
 0xd2f   :  { %v2820_v32 = vadd.f32 1.0, %v7922_v26  ;;  %v7924_v60 = vpop.eup %7923 }
 0xd30   :  { %v2827_v44 = vadd.f32 1.0, %v7924_v60 }
 0xd31   :  { %7925 = vrcp.f32 %v2820_v32  ;;  %v7489_v32 = vpack.c.bf16 %v3364_v62, %v3361_v49 }
 0xd3b   :  { %v7926_v21 = vpop.eup %7925 }
 0xd3c   :  { %v2831_v39 = vmul.f32 %v7926_v21, %v2830_v40  ;;  %v7491_v40 = vpack.c.bf16 %v3371_v18, %v3368_v8  ;;  %v3367_v21 = vld [vmem:[%s9464_s7 + $0x30] sm:$0xff] }
 0xd3e   :  { %v2832_v41 = vadd.f32 %v2831_v39, %v8597_v53  ;;  %v3370_v39 = vld [vmem:[%s9464_s7 + $0x48] sm:$0xff] }
 0xd40   :  { %7927 = vtanh.f32 %v2832_v41  ;;  %v3793_v41 = vld [vmem:[%s9465_s8 + $0x8] sm:$0xff] }
 0xd41   :  { %7929 = vrcp.f32 %v2827_v44  ;;  %v3796_v44 = vld [vmem:[%s9465_s8 + $0x20] sm:$0xff] }
 0xd4a   :  { %v7928_v42 = vpop.eup %7927 }
 0xd4b   :  { %v2834_v38 = vsub.f32 %v2667_v28, %v7928_v42  ;;  %v7930_v57 = vpop.eup %7929 }
 0xd4d   :  { %v2835_v15 = vmul.f32 %v7930_v57, %v2834_v38  ;;  %v8936_v38 = vpack.c.bf16 %v3796_v44, %v3793_v41  ;;  %v3792_v57 = vld [vmem:[%s9465_s8] sm:$0xff] }
 0xd4f   :  { %v2836_v61 = vadd.f32 %v7928_v42, %v2835_v15  ;;  %v7493_v42 = vpack.c.bf16 %v3370_v39, %v3367_v21  ;;  %v3795_v15 = vld [vmem:[%s9465_s8 + $0x18] sm:$0xff] }
 0xd51   :  { %2837 = vst.msk [vmem:[#allocation4 + $0x60] sm:$0xff] %vm643_vm2, %v2836_v61  ;;  %6576 = vmatmul.mubr.msk.f32.vlgmr.msra.gmra.mrb[30].mxu0 %vm643_vm2, %v2836_v61  ;;  %7031 = vmatmul.mubr.msk.f32.vlgmr.msra.gmra.mrb[30].mxu1 %vm643_vm2, %v2836_v61 }
 0xd52   :  { %7462 = vmatpush1.bf16.msra.mxu0 %v8238_v13  ;;  %7469 = vmatpush3.bf16.msra.mxu1 %v8260_v19 }
 0xd53   :  { %7464 = vmatprep.subr.bf16.mxu0 %v8248_v16  ;;  %7470 = vmatprep.subr.bf16.mxu1 %v9489_v3 }
 0xd54   :  { %3077 = vmatprep.mubr.f32.mxu0 %v9490_v35  ;;  %7041 = vmatprep.mubr.msk.f32.mxu1 %vm8124_vm1, %v9490_v35 }
 0xd56   :  { %7466 = vmatpush1.bf16.msra.mxu0 %v8264_v20  ;;  %7472 = vmatpush3.bf16.msra.mxu1 %v8281_v25 }
 0xd57   :  { %7474 = vmatprep.subr.bf16.mxu0 %v8219_v7  ;;  %7481 = vmatprep.subr.bf16.mxu1 %v9489_v3 }
 0xe24   :  { %v2910_v53 = vpop.f32.mrb[30].mxu0  ;;  %v2981_v27 = vpop.f32.mrb[30].mxu1 }
 0xe25   :  { %v2985_v63 = vadd.f32 %v2910_v53, %v8603_v1  ;;  %v2912_v54 = vpop.f32.mrb[31].mxu0  ;;  %v7032_v31 = vpop.f32.mrb[31].mxu1  ;;  %v2999_v7 = vadd.f32 %v8638_v43, %v2981_v27  ;;  %v3802_v53 = vld [vmem:[%s9465_s8 + $0x50] sm:$0xff]  ;;  %v8952_v27 = vld [vmem:[#allocation4] sm:$0xff] }
 0xe26   :  { %v2992_v2 = vadd.f32 %v2912_v54, %v8613_v55  ;;  %v8957_v54 = vld [vmem:[#allocation4 + $0x60] sm:$0xff] }
 0xe27   :  { %v6578_v59 = vmul.f32 -1.442695, %v2985_v63  ;;  %v8955_v63 = vpack.c.bf16 %v3795_v15, %v3792_v57 }
 0xe28   :  { %v6579_v17 = vmul.f32 -1.442695, %v2992_v2  ;;  %v3798_v2 = vld [vmem:[%s9465_s8 + $0x30] sm:$0xff] }
 0xe29   :  { %7931 = vpow2.f32 %v6578_v59  ;;  %v3801_v59 = vld [vmem:[%s9465_s8 + $0x48] sm:$0xff] }
 0xe2a   :  { %7933 = vpow2.f32 %v6579_v17  ;;  %v8974_v17 = vpack.c.bf16 %v3801_v59, %v3798_v2  ;;  %v3800_v59 = vld [vmem:[%s9465_s8 + $0x40] sm:$0xff] }
 0xe33   :  { %v7932_v45 = vpop.eup %7931 }
 0xe34   :  { %v2989_v11 = vadd.f32 1.0, %v7932_v45  ;;  %v7934_v34 = vpop.eup %7933  ;;  %v8976_v45 = vld [vmem:[#allocation4 + $0x8] sm:$0xff] }
 0xe35   :  { %v2996_v12 = vadd.f32 1.0, %v7934_v34  ;;  %v8988_v34 = vld [vmem:[#allocation4 + $0x10] sm:$0xff] }
 0xe36   :  { %7935 = vrcp.f32 %v2989_v11 }
 0xe40   :  { %v7936_v6 = vpop.eup %7935 }
 0xe41   :  { %v3000_v10 = vmul.f32 %v7936_v6, %v2999_v7  ;;  %v8999_v6 = vld [vmem:[#allocation4 + $0x18] sm:$0xff] }
 0xe43   :  { %v3001_v5 = vadd.f32 %v3000_v10, %v8610_v52  ;;  %v3362_v52 = vld [vmem:[%s9464_s7 + $0x8] sm:$0xff]  ;;  %v9004_v10 = vld [vmem:[#allocation4 + $0x20] sm:$0xff] }
 0xe45   :  { %7937 = vtanh.f32 %v3001_v5  ;;  %v9009_v5 = vld [vmem:[#allocation4 + $0x28] sm:$0xff] }
 0xe46   :  { %7939 = vrcp.f32 %v2996_v12  ;;  %v9014_v12 = vld [vmem:[#allocation4 + $0x30] sm:$0xff] }
 0xe4f   :  { %v7938_v1 = vpop.eup %7937 }
 0xe50   :  { %v3003_v9 = vsub.f32 %v2836_v61, %v7938_v1  ;;  %v7940_v55 = vpop.eup %7939  ;;  %v3799_v61 = vld [vmem:[%s9465_s8 + $0x38] sm:$0xff] }
 0xe51   :  { %v8959_v31 = vpack.c.bf16 %v3802_v53, %v3799_v61  ;;  %v3797_v61 = vld [vmem:[%s9465_s8 + $0x28] sm:$0xff] }
 0xe52   :  { %v3004_v36 = vmul.f32 %v7940_v55, %v3003_v9  ;;  %v9024_v9 = vld [vmem:[#allocation4 + $0x40] sm:$0xff]  ;;  %v9029_v55 = vld [vmem:[#allocation4 + $0x48] sm:$0xff] }
 0xe54   :  { %v3005_v4 = vadd.f32 %v7938_v1, %v3004_v36  ;;  %v9019_v1 = vld [vmem:[#allocation4 + $0x38] sm:$0xff]  ;;  %v9034_v36 = vld [vmem:[#allocation4 + $0x50] sm:$0xff] }
 0xe56   :  { %3006 = vst.msk [vmem:[#allocation4 + $0x68] sm:$0xff] %vm643_vm2, %v3005_v4  ;;  %6580 = vmatmul.mubr.msk.f32.vlgmr.msra.gmra.mrb[32].mxu0 %vm643_vm2, %v3005_v4  ;;  %7042 = vmatmul.mubr.msk.f32.vlgmr.msra.gmra.mrb[32].mxu1 %vm643_vm2, %v3005_v4 }
 0xe57   :  { %7476 = vmatpush1.bf16.msra.mxu0 %v8238_v13  ;;  %7483 = vmatpush3.bf16.msra.mxu1 %v8260_v19  ;;  %v3365_v13 = vld [vmem:[%s9464_s7 + $0x20] sm:$0xff] }
 0xe58   :  { %7478 = vmatprep.subr.bf16.mxu0 %v8248_v16  ;;  %7484 = vmatprep.subr.bf16.mxu1 %v9489_v3  ;;  %v7487_v16 = vpack.c.bf16 %v3365_v13, %v3362_v52  ;;  %v3363_v52 = vld [vmem:[%s9464_s7 + $0x10] sm:$0xff]  ;;  %v3366_v13 = vld [vmem:[%s9464_s7 + $0x28] sm:$0xff] }
 0xe59   :  { %3246 = vmatprep.mubr.f32.mxu0 %v9490_v35  ;;  %7052 = vmatprep.mubr.msk.f32.mxu1 %vm8124_vm1, %v9490_v35 }
 0xe5b   :  { %7480 = vmatpush1.bf16.msra.mxu0 %v8264_v20  ;;  %7486 = vmatpush3.bf16.msra.mxu1 %v8281_v25 }
 0xe5c   :  { %7488 = vmatprep.subr.bf16.mxu0 %v7487_v16  ;;  %7727 = vmatprep.subr.bf16.mxu1 %v7487_v16  ;;  %v3369_v16 = vld [vmem:[%s9464_s7 + $0x40] sm:$0xff] }
 0xe5d   :  { %v8978_v11 = vld [vmem:[#allocation4 + $0x68] sm:$0xff] }
 0xf29   :  { %v3079_v19 = vpop.f32.mrb[32].mxu0  ;;  %v3150_v43 = vpop.f32.mrb[32].mxu1 }
 0xf2a   :  { %v3154_v47 = vadd.f32 %v3079_v19, %v8607_v23  ;;  %v3081_v24 = vpop.f32.mrb[33].mxu0  ;;  %v7043_v46 = vpop.f32.mrb[33].mxu1  ;;  %v3168_v29 = vadd.f32 %v8900_v48, %v3150_v43  ;;  %v7495_v19 = vpack.c.bf16 %v3366_v13, %v3363_v52  ;;  %v3372_v43 = vld [vmem:[%s9464_s7 + $0x58] sm:$0xff] }
 0xf2b   :  { %v3161_v20 = vadd.f32 %v3081_v24, %v8618_v56  ;;  %v3803_v52 = vld [vmem:[%s9465_s8 + $0x58] sm:$0xff] }
 0xf2c   :  { %v6582_v25 = vmul.f32 -1.442695, %v3154_v47  ;;  %v7499_v47 = vpack.c.bf16 %v3372_v43, %v3369_v16  ;;  %v9103_v13 = vpack.c.bf16 %v3803_v52, %v3800_v59  ;;  %v9193_v59 = vld [vmem:[%s9467_s10] ss:$0 sm:$0xff] }
 0xf2d   :  { %v6583_v58 = vmul.f32 -1.442695, %v3161_v20  ;;  %v9495_v20 = vld [vmem:[#allocation11_spill] sm:$0xff] }
 0xf2e   :  { %7941 = vpow2.f32 %v6582_v25 }
 0xf2f   :  { %7943 = vpow2.f32 %v6583_v58 }
 0xf38   :  { %v7942_v51 = vpop.eup %7941 }
 0xf39   :  { %v3158_v37 = vadd.f32 1.0, %v7942_v51  ;;  %v7944_v0 = vpop.eup %7943 }
 0xf3a   :  { %v3165_v56 = vadd.f32 1.0, %v7944_v0 }
 0xf3b   :  { %7945 = vrcp.f32 %v3158_v37  ;;  %v9496_v37 = vld [vmem:[#allocation13_spill] sm:$0xff] }
 0xf45   :  { %v7946_v23 = vpop.eup %7945 }
 0xf46   :  { %v3169_v28 = vmul.f32 %v7946_v23, %v3168_v29 }
 0xf48   :  { %v3170_v50 = vadd.f32 %v3169_v28, %v9494_v22 }
 0xf4a   :  { %7947 = vtanh.f32 %v3170_v50 }
 0xf4b   :  { %7949 = vrcp.f32 %v3165_v56 }
 0xf54   :  { %v7948_v33 = vpop.eup %7947 }
 0xf55   :  { %v3172_v14 = vsub.f32 %v3005_v4, %v7948_v33  ;;  %v7950_v30 = vpop.eup %7949  ;;  %v9039_v4 = vld [vmem:[#allocation4 + $0x58] sm:$0xff] }
 0xf57   :  { %v3173_v26 = vmul.f32 %v7950_v30, %v3172_v14 }
 0xf59   :  { %v8916_v60 = vadd.f32 %v7948_v33, %v3173_v26 }
 0xf5b   :  { %3175 = vst.msk [vmem:[#allocation4 + $0x70] sm:$0xff] %vm643_vm2, %v8916_v60  ;;  %6584 = vmatmul.mubr.msk.f32.vlgmr.msra.gmra.mrb[34].mxu0 %vm643_vm2, %v8916_v60  ;;  %7053 = vmatmul.mubr.msk.f32.vlgmr.msra.gmra.mrb[34].mxu1 %vm643_vm2, %v8916_v60 }
 0xf5c   :  { %7490 = vmatpush1.bf16.msra.mxu0 %v7489_v32  ;;  %7729 = vmatpush1.bf16.msra.mxu1 %v7489_v32  ;;  %v9497_v32 = vld [vmem:[#allocation14_spill] sm:$0xff] }
 0xf5d   :  { %7492 = vmatprep.subr.bf16.mxu0 %v7491_v40  ;;  %7728 = vmatprep.subr.bf16.mxu1 %v7491_v40 }
 0xf5e   :  { %3502 = vmatprep.mubr.f32.mxu0 %v9490_v35  ;;  %3574 = vmatprep.mubr.f32.mxu1 %v9490_v35 }
 0xf60   :  { %7494 = vmatpush1.bf16.msra.mxu0 %v7493_v42  ;;  %7730 = vmatpush1.bf16.msra.mxu1 %v7493_v42 }
 0xf61   :  { %7504 = vmatprep.subr.bf16.mxu0 %v8936_v38  ;;  %7496 = vmatprep.subr.bf16.mxu1 %v7495_v19 }
 0xf62   :  { %v8990_v7 = vld [vmem:[#allocation4 + $0x70] sm:$0xff] }
 0xf63   :  { %6588 = vmatmul.mubr.msk.f32.vlgmr.msra.gmra.mrb[36].mxu0 %vm643_vm2, %v8952_v27  ;;  %6600 = vmatmul.mubr.msk.f32.vlgmr.msra.gmra.mrb[36].mxu1 %vm643_vm2, %v8957_v54 }
 0xf64   :  { %3508 = vmatprep.mubr.f32.mxu0 %v9490_v35  ;;  %3580 = vmatprep.mubr.f32.mxu1 %v9490_v35 }
 0xf65   :  { %7506 = vmatpush1.bf16.msra.mxu0 %v8955_v63  ;;  %7498 = vmatpush3.bf16.msra.mxu1 %v7495_v19 }
 0xf66   :  { %7508 = vmatprep.subr.bf16.mxu0 %v8959_v31  ;;  %7500 = vmatprep.subr.bf16.mxu1 %v7499_v47 }
 0xf67   :  { %6589 = vmatmul.mubr.msk.f32.gmra.mrb[38].mxu0 %vm643_vm2, %v8976_v45  ;;  %6601 = vmatmul.mubr.msk.f32.gmra.mrb[38].mxu1 %vm643_vm2, %v8978_v11 }
 0xf68   :  { %3514 = vmatprep.mubr.f32.mxu0 %v9490_v35  ;;  %3586 = vmatprep.mubr.f32.mxu1 %v9490_v35 }
 0xf69   :  { %7510 = vmatpush1.bf16.msra.mxu0 %v8974_v17  ;;  %7502 = vmatpush3.bf16.msra.mxu1 %v7499_v47 }
 0xf6a   :  { %7518 = vmatprep.subr.bf16.mxu0 %v8936_v38  ;;  %7511 = vmatprep.subr.bf16.mxu1 %v9489_v3 }
 0xf6b   :  { %6590 = vmatmul.mubr.msk.f32.gmra.mrb[40].mxu0 %vm643_vm2, %v8988_v34  ;;  %6602 = vmatmul.mubr.msk.f32.gmra.mrb[40].mxu1 %vm643_vm2, %v8990_v7 }
 0xf6c   :  { %3520 = vmatprep.mubr.f32.mxu0 %v9490_v35  ;;  %3592 = vmatprep.mubr.f32.mxu1 %v9490_v35 }
 0xf6f   :  { %6591 = vmatmul.mubr.msk.f32.gmra.mrb[42].mxu0 %vm643_vm2, %v8999_v6 }
 0xf70   :  { %3526 = vmatprep.mubr.f32.mxu0 %v9490_v35 }
 0xf73   :  { %6592 = vmatmul.mubr.msk.f32.gmra.mrb[44].mxu0 %vm643_vm2, %v9004_v10 }
 0xf74   :  { %3532 = vmatprep.mubr.f32.mxu0 %v9490_v35 }
 0xf77   :  { %6593 = vmatmul.mubr.msk.f32.gmra.mrb[46].mxu0 %vm643_vm2, %v9009_v5 }
 0xf78   :  { %3538 = vmatprep.mubr.f32.mxu0 %v9490_v35 }
 0xf7b   :  { %6594 = vmatmul.mubr.msk.f32.gmra.mrb[48].mxu0 %vm643_vm2, %v9014_v12 }
 0xf7c   :  { %3544 = vmatprep.mubr.f32.mxu0 %v9490_v35 }
 0xf7f   :  { %6595 = vmatmul.mubr.msk.f32.gmra.mrb[50].mxu0 %vm643_vm2, %v9019_v1 }
 0xf80   :  { %3550 = vmatprep.mubr.f32.mxu0 %v9490_v35 }
 0xf83   :  { %6596 = vmatmul.mubr.msk.f32.gmra.mrb[52].mxu0 %vm643_vm2, %v9024_v9 }
 0xf84   :  { %3556 = vmatprep.mubr.f32.mxu0 %v9490_v35 }
 0xf87   :  { %6597 = vmatmul.mubr.msk.f32.gmra.mrb[54].mxu0 %vm643_vm2, %v9029_v55 }
 0xf88   :  { %3562 = vmatprep.mubr.f32.mxu0 %v9490_v35 }
 0xf8b   :  { %6598 = vmatmul.mubr.msk.f32.gmra.mrb[56].mxu0 %vm643_vm2, %v9034_v36 }
 0xf8c   :  { %3568 = vmatprep.mubr.f32.mxu0 %v9490_v35 }
 0xf8f   :  { %6599 = vmatmul.mubr.msk.f32.gmra.mrb[58].mxu0 %vm643_vm2, %v9039_v4 }
 0xf90   :  { %3878 = vmatprep.mubr.f32.mxu0 %v9490_v35 }
 0xf93   :  { %3879 = vmatmul.mubr.f32.vlgmr.msra.gmra.mrb[36].mxu0 %v9490_v35 }
 0xf94   :  { %7520 = vmatpush1.bf16.msra.mxu0 %v8955_v63  ;;  %4046 = vmatprep.mubr.f32.mxu0 %v9490_v35 }
 0xf95   :  { %7522 = vmatprep.subr.bf16.mxu0 %v8959_v31 }
 0xf98   :  { %7524 = vmatpush1.bf16.msra.mxu0 %v8974_v17 }
 0xf99   :  { %7532 = vmatprep.subr.bf16.mxu0 %v8936_v38 }
0x102e   :  { %v3248_v24 = vpop.f32.mrb[34].mxu0  ;;  %v3319_v46 = vpop.f32.mrb[34].mxu1 }
0x102f   :  { %v3323_v25 = vadd.f32 %v3248_v24, %v9495_v20  ;;  %v3250_v58 = vpop.f32.mrb[35].mxu0  ;;  %v7054_v51 = vpop.f32.mrb[35].mxu1  ;;  %v3337_v8 = vadd.f32 %v8900_v48, %v3319_v46  ;;  %v3794_v48 = vld [vmem:[%s9465_s8 + $0x10] sm:$0xff] }
0x1030   :  { %v3330_v0 = vadd.f32 %v3250_v58, %v9496_v37 }
0x1031   :  { %v6586_v29 = vmul.f32 -1.442695, %v3323_v25 }
0x1032   :  { %v6587_v50 = vmul.f32 -1.442695, %v3330_v0 }
0x1033   :  { %7951 = vpow2.f32 %v6586_v29 }
0x1034   :  { %7953 = vpow2.f32 %v6587_v50 }
0x1036   :  { %v9065_v23 = vpop.f32.mrb[36].mxu1 }
0x1037   :  { %v9067_v28 = vpop.f32.mrb[37].mxu1 }
0x103a   :  { %v9069_v22 = vpop.f32.mrb[38].mxu1 }
0x103b   :  { %v9071_v56 = vpop.f32.mrb[39].mxu1 }
0x103d   :  { %v7952_v33 = vpop.eup %7951 }
0x103e   :  { %v3327_v14 = vadd.f32 1.0, %v7952_v33  ;;  %v9073_v49 = vpop.f32.mrb[40].mxu1  ;;  %v7954_v30 = vpop.eup %7953 }
0x103f   :  { %v9075_v62 = vpop.f32.mrb[41].mxu1  ;;  %v3334_v21 = vadd.f32 1.0, %v7954_v30 }
0x1040   :  { %7955 = vrcp.f32 %v3327_v14 }
0x104a   :  { %v7956_v18 = vpop.eup %7955 }
0x104b   :  { %v3338_v26 = vmul.f32 %v7956_v18, %v3337_v8 }
0x104d   :  { %v3339_v40 = vadd.f32 %v3338_v26, %v9497_v32 }
0x104f   :  { %7957 = vtanh.f32 %v3339_v40 }
0x1050   :  { %7959 = vrcp.f32 %v3334_v21 }
0x1059   :  { %v7958_v39 = vpop.eup %7957 }
0x105a   :  { %v3341_v41 = vsub.f32 %v8916_v60, %v7958_v39  ;;  %v7960_v44 = vpop.eup %7959  ;;  %v9090_v60 = vpack.c.bf16 %v3797_v61, %v3794_v48 }
0x105c   :  { %v3342_v42 = vmul.f32 %v7960_v44, %v3341_v41 }
0x105e   :  { %v3343_v57 = vadd.f32 %v7958_v39, %v3342_v42 }
0x1060   :  { %3344 = vst.msk [vmem:[#allocation4 + $0x78] sm:$0xff] %vm643_vm2, %v3343_v57 }
0x1066   :  { %v3880_v15 = vpop.f32.mrb[36].mxu0 }
0x1067   :  { %v3882_v53 = vpop.f32.mrb[37].mxu0  ;;  %v3360_v2 = vld [vmem:[#allocation4 + $0x78] sm:$0xff] }
0x1068   :  { %6603 = vmatmul.mubr.msk.f32.gmra.mrb[42].mxu1 %vm643_vm2, %v3360_v2 }
0x1069   :  { %7063 = vmatprep.mubr.msk.f32.mxu1 %vm643_vm2, %v8952_v27  ;;  %v3373_v27 = vld [vmem:[%s9466_s9] sm:$0x7] }
0x106c   :  { %7064 = vmatmul.mubr.msk.f32.vlgmr.msra.gmra.mrb[44].mxu1 %vm643_vm2, %v8976_v45  ;;  %v9498_v45 = vld [vmem:[#allocation7_spill] sm:$0xff] }
0x106d   :  { %7066 = vmatprep.mubr.msk.f32.mxu1 %vm643_vm2, %v8988_v34  ;;  %7513 = vmatpush3.bf16.msra.mxu1 %v9090_v60  ;;  %v9499_v34 = vld [vmem:[#allocation6_spill] sm:$0xff] }
0x106e   :  { %7514 = vmatprep.subr.bf16.mxu1 %v9489_v3  ;;  %v9501_v58 = vsub.s32 1, %v9499_v34 }
0x1070   :  { %7067 = vmatmul.mubr.msk.f32.gmra.mrb[46].mxu1 %vm643_vm2, %v8999_v6  ;;  %v9167_v51 = vrot.slane %v3373_v27, %v9501_v58 }
0x1071   :  { %7069 = vmatprep.mubr.msk.f32.mxu1 %vm643_vm2, %v9004_v10  ;;  %7516 = vmatpush3.bf16.msra.mxu1 %v9103_v13 }
0x1072   :  { %7525 = vmatprep.subr.bf16.mxu1 %v9489_v3  ;;  %v7732_v50 = vadd.f32 %v3882_v53, %v9167_v51 }
0x1074   :  { %7070 = vmatmul.mubr.msk.f32.gmra.mrb[48].mxu1 %vm643_vm2, %v9009_v5  ;;  %v6622_v26 = vmul.f32 -1.442695, %v7732_v50 }
0x1075   :  { %7072 = vmatprep.mubr.msk.f32.mxu1 %vm643_vm2, %v9014_v12 }
0x1078   :  { %7073 = vmatmul.mubr.msk.f32.gmra.mrb[50].mxu1 %vm643_vm2, %v9019_v1 }
0x1079   :  { %7075 = vmatprep.mubr.msk.f32.mxu1 %vm643_vm2, %v9024_v9 }
0x107c   :  { %7076 = vmatmul.mubr.msk.f32.gmra.mrb[52].mxu1 %vm643_vm2, %v9029_v55 }
0x107d   :  { %7078 = vmatprep.mubr.msk.f32.mxu1 %vm643_vm2, %v9034_v36 }
0x1080   :  { %7079 = vmatmul.mubr.msk.f32.gmra.mrb[54].mxu1 %vm643_vm2, %v9039_v4 }
0x1081   :  { %7081 = vmatprep.mubr.msk.f32.mxu1 %vm643_vm2, %v8957_v54 }
0x1084   :  { %7082 = vmatmul.mubr.msk.f32.gmra.mrb[56].mxu1 %vm643_vm2, %v8978_v11  ;;  %v9148_v11 = vrot.slane %v3373_v27, %v9498_v45 }
0x1085   :  { %7084 = vmatprep.mubr.msk.f32.mxu1 %vm643_vm2, %v8990_v7  ;;  %v9500_v7 = vsub.s32 2, %v9499_v34 }
0x1086   :  { %v7731_v5 = vadd.f32 %v3880_v15, %v9148_v11 }
0x1087   :  { %v3386_v6 = vrot.slane %v3373_v27, %v9500_v7 }
0x1088   :  { %7085 = vmatmul.mubr.msk.f32.gmra.mrb[58].mxu1 %vm643_vm2, %v3360_v2  ;;  %v6621_v36 = vmul.f32 -1.442695, %v7731_v5 }
0x1089   :  { %7095 = vmatprep.mubr.msk.f32.mxu1 %vm8124_vm1, %v9490_v35 }
0x108a   :  { %7961 = vpow2.f32 %v6621_v36 }
0x108b   :  { %7963 = vpow2.f32 %v6622_v26 }
0x108c   :  { %7096 = vmatmul.mubr.f32.vlgmr.msra.gmra.mrb[60].mxu1 %v9490_v35 }
0x108d   :  { %7527 = vmatpush3.bf16.msra.mxu1 %v9090_v60  ;;  %7106 = vmatprep.mubr.msk.f32.mxu1 %vm8124_vm1, %v9490_v35 }
0x108e   :  { %7528 = vmatprep.subr.bf16.mxu1 %v9489_v3 }
0x1091   :  { %7530 = vmatpush3.bf16.msra.mxu1 %v9103_v13 }
0x1092   :  { %7539 = vmatprep.subr.bf16.mxu1 %v9489_v3 }
0x1094   :  { %v7962_v14 = vpop.eup %7961 }
0x1095   :  { %v3959_v32 = vadd.f32 1.0, %v7962_v14  ;;  %v7964_v27 = vpop.eup %7963 }
0x1097   :  { %7965 = vrcp.f32 %v3959_v32 }
0x10a1   :  { %v7966_v7 = vpop.eup %7965 }
0x113b   :  { %v9145_v54 = vpop.f32.mrb[42].mxu1 }
0x113c   :  { %v9152_v10 = vpop.f32.mrb[43].mxu1 }
0x113f   :  { %v7065_v12 = vpop.f32.mrb[44].mxu1 }
0x1140   :  { %v9155_v1 = vadd.f32 %v7065_v12, %v3386_v6  ;;  %v3665_v9 = vpop.f32.mrb[45].mxu1  ;;  %v3966_v12 = vadd.f32 1.0, %v7964_v27 }
0x1141   :  { %v3666_v55 = vadd.f32 %v3665_v9, %v3386_v6 }
0x1143   :  { %v7068_v4 = vpop.f32.mrb[46].mxu1 }
0x1144   :  { %v9157_v16 = vadd.f32 %v7068_v4, %v3386_v6  ;;  %v3675_v19 = vpop.f32.mrb[47].mxu1 }
0x1145   :  { %v9159_v43 = vadd.f32 %v3675_v19, %v3386_v6 }
0x1147   :  { %v7071_v47 = vpop.f32.mrb[48].mxu1 }
0x1148   :  { %v9161_v24 = vadd.f32 %v7071_v47, %v3386_v6  ;;  %v3685_v46 = vpop.f32.mrb[49].mxu1 }
0x1149   :  { %v9163_v20 = vadd.f32 %v3685_v46, %v3386_v6 }
0x114b   :  { %v7074_v25 = vpop.f32.mrb[50].mxu1 }
0x114c   :  { %v9169_v37 = vadd.f32 %v7074_v25, %v3386_v6  ;;  %v3695_v0 = vpop.f32.mrb[51].mxu1 }
0x114d   :  { %v9171_v29 = vadd.f32 %v3695_v0, %v3386_v6 }
0x114f   :  { %v7077_v33 = vpop.f32.mrb[52].mxu1 }
0x1150   :  { %v9174_v30 = vadd.f32 %v7077_v33, %v3386_v6  ;;  %v3705_v8 = vpop.f32.mrb[53].mxu1 }
0x1151   :  { %v9176_v18 = vadd.f32 %v3705_v8, %v3386_v6 }
0x1153   :  { %v7080_v40 = vpop.f32.mrb[54].mxu1 }
0x1154   :  { %v9178_v21 = vadd.f32 %v7080_v40, %v3386_v6  ;;  %v3715_v39 = vpop.f32.mrb[55].mxu1 }
0x1155   :  { %v9180_v41 = vadd.f32 %v3715_v39, %v3386_v6 }
0x1157   :  { %v7083_v44 = vpop.f32.mrb[56].mxu1 }
0x1158   :  { %v9182_v42 = vadd.f32 %v7083_v44, %v3386_v6  ;;  %v3725_v57 = vpop.f32.mrb[57].mxu1 }
0x1159   :  { %v9184_v15 = vadd.f32 %v3725_v57, %v3386_v6 }
0x115b   :  { %v7086_v48 = vpop.f32.mrb[58].mxu1 }
0x115c   :  { %v9186_v61 = vadd.f32 %v7086_v48, %v3386_v6  ;;  %v3735_v53 = vpop.f32.mrb[59].mxu1 }
0x115d   :  { %v9188_v2 = vadd.f32 %v3735_v53, %v3386_v6 }
0x115f   :  { %v3951_v52 = vpop.f32.mrb[60].mxu1 }
0x1160   :  { %v3969_v45 = vadd.f32 %v9193_v59, %v3951_v52  ;;  %v7097_v34 = vpop.f32.mrb[61].mxu1 }
0x1162   :  { %v3970_v5 = vmul.f32 %v7966_v7, %v3969_v45 }
0x1164   :  { %v3971_v9 = vadd.f32 %v3970_v5, %v3666_v55 }
0x1166   :  { %7967 = vtanh.f32 %v3971_v9 }
0x1167   :  { %7969 = vrcp.f32 %v3966_v12 }
0x1170   :  { %v7968_v36 = vpop.eup %7967 }
0x1171   :  { %v3973_v4 = vsub.f32 0.0, %v7968_v36  ;;  %v7970_v6 = vpop.eup %7969 }
0x1173   :  { %v3974_v19 = vmul.f32 %v7970_v6, %v3973_v4 }
0x1175   :  { %v3975_v47 = vadd.f32 %v7968_v36, %v3974_v19 }
0x1177   :  { %6623 = vmatmul.mubr.msk.f32.vlgmr.msra.gmra.mrb[38].mxu0 %vm643_vm2, %v3975_v47  ;;  %7107 = vmatmul.mubr.msk.f32.vlgmr.msra.gmra.mrb[62].mxu1 %vm643_vm2, %v3975_v47 }
0x1178   :  { %7534 = vmatpush1.bf16.msra.mxu0 %v8955_v63  ;;  %7541 = vmatpush3.bf16.msra.mxu1 %v9090_v60 }
0x1179   :  { %7536 = vmatprep.subr.bf16.mxu0 %v8959_v31  ;;  %7542 = vmatprep.subr.bf16.mxu1 %v9489_v3 }
0x117a   :  { %4214 = vmatprep.mubr.f32.mxu0 %v9490_v35  ;;  %7117 = vmatprep.mubr.msk.f32.mxu1 %vm8124_vm1, %v9490_v35 }
0x117c   :  { %7538 = vmatpush1.bf16.msra.mxu0 %v8974_v17  ;;  %7544 = vmatpush3.bf16.msra.mxu1 %v9103_v13 }
0x117d   :  { %7546 = vmatprep.subr.bf16.mxu0 %v8936_v38  ;;  %7553 = vmatprep.subr.bf16.mxu1 %v9489_v3 }
0x124a   :  { %v4048_v55 = vpop.f32.mrb[38].mxu0  ;;  %v4119_v46 = vpop.f32.mrb[62].mxu1 }
0x124b   :  { %v7733_v25 = vadd.f32 %v4048_v55, %v9148_v11  ;;  %v4050_v58 = vpop.f32.mrb[39].mxu0  ;;  %v7108_v0 = vpop.f32.mrb[63].mxu1  ;;  %v4137_v40 = vadd.f32 %v9193_v59, %v4119_v46 }
0x124c   :  { %v7734_v33 = vadd.f32 %v4050_v58, %v9167_v51 }
0x124d   :  { %v6625_v50 = vmul.f32 -1.442695, %v7733_v25 }
0x124e   :  { %v6626_v14 = vmul.f32 -1.442695, %v7734_v33 }
0x124f   :  { %7971 = vpow2.f32 %v6625_v50 }
0x1250   :  { %7973 = vpow2.f32 %v6626_v14 }
0x1259   :  { %v7972_v8 = vpop.eup %7971 }
0x125a   :  { %v4127_v26 = vadd.f32 1.0, %v7972_v8  ;;  %v7974_v32 = vpop.eup %7973 }
0x125b   :  { %v4134_v48 = vadd.f32 1.0, %v7974_v32 }
0x125c   :  { %7975 = vrcp.f32 %v4127_v26 }
0x1266   :  { %v7976_v39 = vpop.eup %7975 }
0x1267   :  { %v4138_v44 = vmul.f32 %v7976_v39, %v4137_v40 }
0x1269   :  { %v4139_v57 = vadd.f32 %v4138_v44, %v9155_v1 }
0x126b   :  { %7977 = vtanh.f32 %v4139_v57 }
0x126c   :  { %7979 = vrcp.f32 %v4134_v48 }
0x1275   :  { %v7978_v53 = vpop.eup %7977 }
0x1276   :  { %v4141_v52 = vsub.f32 %v3975_v47, %v7978_v53  ;;  %v7980_v27 = vpop.eup %7979 }
0x1278   :  { %v4142_v45 = vmul.f32 %v7980_v27, %v4141_v52 }
0x127a   :  { %v4143_v34 = vadd.f32 %v7978_v53, %v4142_v45 }
0x127c   :  { %6627 = vmatmul.mubr.msk.f32.vlgmr.msra.gmra.mrb[40].mxu0 %vm643_vm2, %v4143_v34  ;;  %7118 = vmatmul.mubr.msk.f32.vlgmr.msra.gmra.mrb[64].mxu1 %vm643_vm2, %v4143_v34 }
0x127d   :  { %7548 = vmatpush1.bf16.msra.mxu0 %v8955_v63  ;;  %7555 = vmatpush3.bf16.msra.mxu1 %v9090_v60 }
0x127e   :  { %7550 = vmatprep.subr.bf16.mxu0 %v8959_v31  ;;  %7556 = vmatprep.subr.bf16.mxu1 %v9489_v3 }
0x127f   :  { %4382 = vmatprep.mubr.f32.mxu0 %v9490_v35  ;;  %7128 = vmatprep.mubr.msk.f32.mxu1 %vm8124_vm1, %v9490_v35 }
0x1281   :  { %7552 = vmatpush1.bf16.msra.mxu0 %v8974_v17  ;;  %7558 = vmatpush3.bf16.msra.mxu1 %v9103_v13 }
0x1282   :  { %7560 = vmatprep.subr.bf16.mxu0 %v8936_v38  ;;  %7567 = vmatprep.subr.bf16.mxu1 %v9489_v3 }
0x134f   :  { %v4216_v1 = vpop.f32.mrb[40].mxu0  ;;  %v4287_v7 = vpop.f32.mrb[64].mxu1 }
0x1350   :  { %v7735_v5 = vadd.f32 %v4216_v1, %v9148_v11  ;;  %v4218_v12 = vpop.f32.mrb[41].mxu0  ;;  %v7119_v9 = vpop.f32.mrb[65].mxu1  ;;  %v4305_v46 = vadd.f32 %v9193_v59, %v4287_v7 }
0x1351   :  { %v7736_v4 = vadd.f32 %v4218_v12, %v9167_v51 }
0x1352   :  { %v6629_v36 = vmul.f32 -1.442695, %v7735_v5 }
0x1353   :  { %v6630_v6 = vmul.f32 -1.442695, %v7736_v4 }
0x1354   :  { %7981 = vpow2.f32 %v6629_v36 }
0x1355   :  { %7983 = vpow2.f32 %v6630_v6 }
0x135e   :  { %v7982_v19 = vpop.eup %7981 }
0x135f   :  { %v4295_v47 = vadd.f32 1.0, %v7982_v19  ;;  %v7984_v55 = vpop.eup %7983 }
0x1360   :  { %v4302_v50 = vadd.f32 1.0, %v7984_v55 }
0x1361   :  { %7985 = vrcp.f32 %v4295_v47 }
0x136b   :  { %v7986_v25 = vpop.eup %7985 }
0x136c   :  { %v4306_v58 = vmul.f32 %v7986_v25, %v4305_v46 }
0x136e   :  { %v4307_v0 = vadd.f32 %v4306_v58, %v9159_v43 }
0x1370   :  { %7987 = vtanh.f32 %v4307_v0 }
0x1371   :  { %7989 = vrcp.f32 %v4302_v50 }
0x137a   :  { %v7988_v33 = vpop.eup %7987 }
0x137b   :  { %v4309_v14 = vsub.f32 %v4143_v34, %v7988_v33  ;;  %v7990_v8 = vpop.eup %7989 }
0x137d   :  { %v4310_v26 = vmul.f32 %v7990_v8, %v4309_v14 }
0x137f   :  { %v4311_v32 = vadd.f32 %v7988_v33, %v4310_v26 }
0x1381   :  { %6631 = vmatmul.mubr.msk.f32.vlgmr.msra.gmra.mrb[42].mxu0 %vm643_vm2, %v4311_v32  ;;  %7129 = vmatmul.mubr.msk.f32.vlgmr.msra.gmra.mrb[66].mxu1 %vm643_vm2, %v4311_v32 }
0x1382   :  { %7562 = vmatpush1.bf16.msra.mxu0 %v8955_v63  ;;  %7569 = vmatpush3.bf16.msra.mxu1 %v9090_v60 }
0x1383   :  { %7564 = vmatprep.subr.bf16.mxu0 %v8959_v31  ;;  %7570 = vmatprep.subr.bf16.mxu1 %v9489_v3 }
0x1384   :  { %4550 = vmatprep.mubr.f32.mxu0 %v9490_v35  ;;  %7139 = vmatprep.mubr.msk.f32.mxu1 %vm8124_vm1, %v9490_v35 }
0x1386   :  { %7566 = vmatpush1.bf16.msra.mxu0 %v8974_v17  ;;  %7572 = vmatpush3.bf16.msra.mxu1 %v9103_v13 }
0x1387   :  { %7574 = vmatprep.subr.bf16.mxu0 %v8936_v38  ;;  %7581 = vmatprep.subr.bf16.mxu1 %v9489_v3 }
0x1454   :  { %v4384_v43 = vpop.f32.mrb[42].mxu0  ;;  %v4455_v40 = vpop.f32.mrb[66].mxu1 }
0x1455   :  { %v7737_v39 = vadd.f32 %v4384_v43, %v9148_v11  ;;  %v4386_v44 = vpop.f32.mrb[43].mxu0  ;;  %v7130_v57 = vpop.f32.mrb[67].mxu1  ;;  %v4473_v1 = vadd.f32 %v9193_v59, %v4455_v40 }
0x1456   :  { %v7738_v53 = vadd.f32 %v4386_v44, %v9167_v51 }
0x1457   :  { %v6633_v48 = vmul.f32 -1.442695, %v7737_v39 }
0x1458   :  { %v6634_v52 = vmul.f32 -1.442695, %v7738_v53 }
0x1459   :  { %7991 = vpow2.f32 %v6633_v48 }
0x145a   :  { %7993 = vpow2.f32 %v6634_v52 }
0x1463   :  { %v7992_v27 = vpop.eup %7991 }
0x1464   :  { %v4463_v45 = vadd.f32 1.0, %v7992_v27  ;;  %v7994_v34 = vpop.eup %7993 }
0x1465   :  { %v4470_v9 = vadd.f32 1.0, %v7994_v34 }
0x1466   :  { %7995 = vrcp.f32 %v4463_v45 }
0x1470   :  { %v7996_v7 = vpop.eup %7995 }
0x1471   :  { %v4474_v5 = vmul.f32 %v7996_v7, %v4473_v1 }
0x1473   :  { %v4475_v12 = vadd.f32 %v4474_v5, %v9157_v16 }
0x1475   :  { %7997 = vtanh.f32 %v4475_v12 }
0x1476   :  { %7999 = vrcp.f32 %v4470_v9 }
0x147f   :  { %v7998_v36 = vpop.eup %7997 }
0x1480   :  { %v4477_v4 = vsub.f32 %v4311_v32, %v7998_v36  ;;  %v8000_v6 = vpop.eup %7999 }
0x1482   :  { %v4478_v19 = vmul.f32 %v8000_v6, %v4477_v4 }
0x1484   :  { %v4479_v47 = vadd.f32 %v7998_v36, %v4478_v19 }
0x1486   :  { %6635 = vmatmul.mubr.msk.f32.vlgmr.msra.gmra.mrb[44].mxu0 %vm643_vm2, %v4479_v47  ;;  %7140 = vmatmul.mubr.msk.f32.vlgmr.msra.gmra.mrb[68].mxu1 %vm643_vm2, %v4479_v47 }
0x1487   :  { %7576 = vmatpush1.bf16.msra.mxu0 %v8955_v63  ;;  %7583 = vmatpush3.bf16.msra.mxu1 %v9090_v60 }
0x1488   :  { %7578 = vmatprep.subr.bf16.mxu0 %v8959_v31  ;;  %7584 = vmatprep.subr.bf16.mxu1 %v9489_v3 }
0x1489   :  { %4718 = vmatprep.mubr.f32.mxu0 %v9490_v35  ;;  %7150 = vmatprep.mubr.msk.f32.mxu1 %vm8124_vm1, %v9490_v35 }
0x148b   :  { %7580 = vmatpush1.bf16.msra.mxu0 %v8974_v17  ;;  %7586 = vmatpush3.bf16.msra.mxu1 %v9103_v13 }
0x148c   :  { %7588 = vmatprep.subr.bf16.mxu0 %v8936_v38  ;;  %7595 = vmatprep.subr.bf16.mxu1 %v9489_v3 }
0x1559   :  { %v4552_v16 = vpop.f32.mrb[44].mxu0  ;;  %v4623_v55 = vpop.f32.mrb[68].mxu1 }
0x155a   :  { %v7739_v46 = vadd.f32 %v4552_v16, %v9148_v11  ;;  %v4554_v25 = vpop.f32.mrb[45].mxu0  ;;  %v7141_v58 = vpop.f32.mrb[69].mxu1  ;;  %v4641_v32 = vadd.f32 %v9193_v59, %v4623_v55 }
0x155b   :  { %v7740_v50 = vadd.f32 %v4554_v25, %v9167_v51 }
0x155c   :  { %v6637_v0 = vmul.f32 -1.442695, %v7739_v46 }
0x155d   :  { %v6638_v33 = vmul.f32 -1.442695, %v7740_v50 }
0x155e   :  { %8001 = vpow2.f32 %v6637_v0 }
0x155f   :  { %8003 = vpow2.f32 %v6638_v33 }
0x1568   :  { %v8002_v14 = vpop.eup %8001 }
0x1569   :  { %v4631_v8 = vadd.f32 1.0, %v8002_v14  ;;  %v8004_v26 = vpop.eup %8003 }
0x156a   :  { %v4638_v44 = vadd.f32 1.0, %v8004_v26 }
0x156b   :  { %8005 = vrcp.f32 %v4631_v8 }
0x1575   :  { %v8006_v43 = vpop.eup %8005 }
0x1576   :  { %v4642_v40 = vmul.f32 %v8006_v43, %v4641_v32 }
0x1578   :  { %v4643_v39 = vadd.f32 %v4642_v40, %v9163_v20 }
0x157a   :  { %8007 = vtanh.f32 %v4643_v39 }
0x157b   :  { %8009 = vrcp.f32 %v4638_v44 }
0x1584   :  { %v8008_v57 = vpop.eup %8007 }
0x1585   :  { %v4645_v48 = vsub.f32 %v4479_v47, %v8008_v57  ;;  %v8010_v53 = vpop.eup %8009 }
0x1587   :  { %v4646_v52 = vmul.f32 %v8010_v53, %v4645_v48 }
0x1589   :  { %v4647_v27 = vadd.f32 %v8008_v57, %v4646_v52 }
0x158b   :  { %6639 = vmatmul.mubr.msk.f32.vlgmr.msra.gmra.mrb[46].mxu0 %vm643_vm2, %v4647_v27  ;;  %7151 = vmatmul.mubr.msk.f32.vlgmr.msra.gmra.mrb[70].mxu1 %vm643_vm2, %v4647_v27 }
0x158c   :  { %7590 = vmatpush1.bf16.msra.mxu0 %v8955_v63  ;;  %7597 = vmatpush3.bf16.msra.mxu1 %v9090_v60 }
0x158d   :  { %7592 = vmatprep.subr.bf16.mxu0 %v8959_v31  ;;  %7598 = vmatprep.subr.bf16.mxu1 %v9489_v3 }
0x158e   :  { %4886 = vmatprep.mubr.f32.mxu0 %v9490_v35  ;;  %7161 = vmatprep.mubr.msk.f32.mxu1 %vm8124_vm1, %v9490_v35 }
0x1590   :  { %7594 = vmatpush1.bf16.msra.mxu0 %v8974_v17  ;;  %7600 = vmatpush3.bf16.msra.mxu1 %v9103_v13 }
0x1591   :  { %7602 = vmatprep.subr.bf16.mxu0 %v8936_v38  ;;  %7609 = vmatprep.subr.bf16.mxu1 %v9489_v3 }
0x165e   :  { %v4720_v20 = vpop.f32.mrb[46].mxu0  ;;  %v4791_v45 = vpop.f32.mrb[70].mxu1 }
0x165f   :  { %v7741_v34 = vadd.f32 %v4720_v20, %v9148_v11  ;;  %v4722_v1 = vpop.f32.mrb[47].mxu0  ;;  %v7152_v7 = vpop.f32.mrb[71].mxu1  ;;  %v4809_v19 = vadd.f32 %v9193_v59, %v4791_v45 }
0x1660   :  { %v7742_v12 = vadd.f32 %v4722_v1, %v9167_v51 }
0x1661   :  { %v6641_v5 = vmul.f32 -1.442695, %v7741_v34 }
0x1662   :  { %v6642_v9 = vmul.f32 -1.442695, %v7742_v12 }
0x1663   :  { %8011 = vpow2.f32 %v6641_v5 }
0x1664   :  { %8013 = vpow2.f32 %v6642_v9 }
0x166d   :  { %v8012_v36 = vpop.eup %8011 }
0x166e   :  { %v4799_v4 = vadd.f32 1.0, %v8012_v36  ;;  %v8014_v6 = vpop.eup %8013 }
0x166f   :  { %v4806_v46 = vadd.f32 1.0, %v8014_v6 }
0x1670   :  { %8015 = vrcp.f32 %v4799_v4 }
0x167a   :  { %v8016_v47 = vpop.eup %8015 }
0x167b   :  { %v4810_v16 = vmul.f32 %v8016_v47, %v4809_v19 }
0x167d   :  { %v4811_v55 = vadd.f32 %v4810_v16, %v9161_v24 }
0x167f   :  { %8017 = vtanh.f32 %v4811_v55 }
0x1680   :  { %8019 = vrcp.f32 %v4806_v46 }
0x1689   :  { %v8018_v25 = vpop.eup %8017 }
0x168a   :  { %v4813_v58 = vsub.f32 %v4647_v27, %v8018_v25  ;;  %v8020_v0 = vpop.eup %8019 }
0x168c   :  { %v4814_v50 = vmul.f32 %v8020_v0, %v4813_v58 }
0x168e   :  { %v4815_v33 = vadd.f32 %v8018_v25, %v4814_v50 }
0x1690   :  { %6643 = vmatmul.mubr.msk.f32.vlgmr.msra.gmra.mrb[48].mxu0 %vm643_vm2, %v4815_v33  ;;  %7162 = vmatmul.mubr.msk.f32.vlgmr.msra.gmra.mrb[72].mxu1 %vm643_vm2, %v4815_v33 }
0x1691   :  { %7604 = vmatpush1.bf16.msra.mxu0 %v8955_v63  ;;  %7611 = vmatpush3.bf16.msra.mxu1 %v9090_v60 }
0x1692   :  { %7606 = vmatprep.subr.bf16.mxu0 %v8959_v31  ;;  %7612 = vmatprep.subr.bf16.mxu1 %v9489_v3 }
0x1693   :  { %5054 = vmatprep.mubr.f32.mxu0 %v9490_v35  ;;  %7172 = vmatprep.mubr.msk.f32.mxu1 %vm8124_vm1, %v9490_v35 }
0x1695   :  { %7608 = vmatpush1.bf16.msra.mxu0 %v8974_v17  ;;  %7614 = vmatpush3.bf16.msra.mxu1 %v9103_v13 }
0x1696   :  { %7616 = vmatprep.subr.bf16.mxu0 %v8936_v38  ;;  %7623 = vmatprep.subr.bf16.mxu1 %v9489_v3 }
0x1763   :  { %v4888_v24 = vpop.f32.mrb[48].mxu0  ;;  %v4959_v14 = vpop.f32.mrb[72].mxu1 }
0x1764   :  { %v7743_v8 = vadd.f32 %v4888_v24, %v9148_v11  ;;  %v4890_v26 = vpop.f32.mrb[49].mxu0  ;;  %v7163_v32 = vpop.f32.mrb[73].mxu1  ;;  %v4977_v53 = vadd.f32 %v9193_v59, %v4959_v14 }
0x1765   :  { %v7744_v40 = vadd.f32 %v4890_v26, %v9167_v51 }
0x1766   :  { %v6645_v43 = vmul.f32 -1.442695, %v7743_v8 }
0x1767   :  { %v6646_v39 = vmul.f32 -1.442695, %v7744_v40 }
0x1768   :  { %8021 = vpow2.f32 %v6645_v43 }
0x1769   :  { %8023 = vpow2.f32 %v6646_v39 }
0x1772   :  { %v8022_v44 = vpop.eup %8021 }
0x1773   :  { %v4967_v57 = vadd.f32 1.0, %v8022_v44  ;;  %v8024_v48 = vpop.eup %8023 }
0x1774   :  { %v4974_v45 = vadd.f32 1.0, %v8024_v48 }
0x1775   :  { %8025 = vrcp.f32 %v4967_v57 }
0x177f   :  { %v8026_v52 = vpop.eup %8025 }
0x1780   :  { %v4978_v27 = vmul.f32 %v8026_v52, %v4977_v53 }
0x1782   :  { %v4979_v20 = vadd.f32 %v4978_v27, %v9171_v29 }
0x1784   :  { %8027 = vtanh.f32 %v4979_v20 }
0x1785   :  { %8029 = vrcp.f32 %v4974_v45 }
0x178e   :  { %v8028_v34 = vpop.eup %8027 }
0x178f   :  { %v4981_v1 = vsub.f32 %v4815_v33, %v8028_v34  ;;  %v8030_v7 = vpop.eup %8029 }
0x1791   :  { %v4982_v5 = vmul.f32 %v8030_v7, %v4981_v1 }
0x1793   :  { %v4983_v12 = vadd.f32 %v8028_v34, %v4982_v5 }
0x1795   :  { %6647 = vmatmul.mubr.msk.f32.vlgmr.msra.gmra.mrb[50].mxu0 %vm643_vm2, %v4983_v12  ;;  %7173 = vmatmul.mubr.msk.f32.vlgmr.msra.gmra.mrb[74].mxu1 %vm643_vm2, %v4983_v12 }
0x1796   :  { %7618 = vmatpush1.bf16.msra.mxu0 %v8955_v63  ;;  %7625 = vmatpush3.bf16.msra.mxu1 %v9090_v60 }
0x1797   :  { %7620 = vmatprep.subr.bf16.mxu0 %v8959_v31  ;;  %7626 = vmatprep.subr.bf16.mxu1 %v9489_v3 }
0x1798   :  { %5222 = vmatprep.mubr.f32.mxu0 %v9490_v35  ;;  %7183 = vmatprep.mubr.msk.f32.mxu1 %vm8124_vm1, %v9490_v35 }
0x179a   :  { %7622 = vmatpush1.bf16.msra.mxu0 %v8974_v17  ;;  %7628 = vmatpush3.bf16.msra.mxu1 %v9103_v13 }
0x179b   :  { %7630 = vmatprep.subr.bf16.mxu0 %v8936_v38  ;;  %7637 = vmatprep.subr.bf16.mxu1 %v9489_v3 }
0x1868   :  { %v5056_v29 = vpop.f32.mrb[50].mxu0  ;;  %v5127_v9 = vpop.f32.mrb[74].mxu1 }
0x1869   :  { %v7745_v36 = vadd.f32 %v5056_v29, %v9148_v11  ;;  %v5058_v4 = vpop.f32.mrb[51].mxu0  ;;  %v7174_v6 = vpop.f32.mrb[75].mxu1  ;;  %v5145_v58 = vadd.f32 %v9193_v59, %v5127_v9 }
0x186a   :  { %v7746_v47 = vadd.f32 %v5058_v4, %v9167_v51 }
0x186b   :  { %v6649_v19 = vmul.f32 -1.442695, %v7745_v36 }
0x186c   :  { %v6650_v16 = vmul.f32 -1.442695, %v7746_v47 }
0x186d   :  { %8031 = vpow2.f32 %v6649_v19 }
0x186e   :  { %8033 = vpow2.f32 %v6650_v16 }
0x1877   :  { %v8032_v55 = vpop.eup %8031 }
0x1878   :  { %v5135_v46 = vadd.f32 1.0, %v8032_v55  ;;  %v8034_v25 = vpop.eup %8033 }
0x1879   :  { %v5142_v24 = vadd.f32 1.0, %v8034_v25 }
0x187a   :  { %8035 = vrcp.f32 %v5135_v46 }
0x1884   :  { %v8036_v0 = vpop.eup %8035 }
0x1885   :  { %v5146_v50 = vmul.f32 %v8036_v0, %v5145_v58 }
0x1887   :  { %v5147_v33 = vadd.f32 %v5146_v50, %v9169_v37 }
0x1889   :  { %8037 = vtanh.f32 %v5147_v33 }
0x188a   :  { %8039 = vrcp.f32 %v5142_v24 }
0x1893   :  { %v8038_v14 = vpop.eup %8037 }
0x1894   :  { %v5149_v8 = vsub.f32 %v4983_v12, %v8038_v14  ;;  %v8040_v26 = vpop.eup %8039 }
0x1896   :  { %v5150_v32 = vmul.f32 %v8040_v26, %v5149_v8 }
0x1898   :  { %v5151_v43 = vadd.f32 %v8038_v14, %v5150_v32 }
0x189a   :  { %6651 = vmatmul.mubr.msk.f32.vlgmr.msra.gmra.mrb[52].mxu0 %vm643_vm2, %v5151_v43  ;;  %7184 = vmatmul.mubr.msk.f32.vlgmr.msra.gmra.mrb[76].mxu1 %vm643_vm2, %v5151_v43 }
0x189b   :  { %7632 = vmatpush1.bf16.msra.mxu0 %v8955_v63  ;;  %7639 = vmatpush3.bf16.msra.mxu1 %v9090_v60 }
0x189c   :  { %7634 = vmatprep.subr.bf16.mxu0 %v8959_v31  ;;  %7640 = vmatprep.subr.bf16.mxu1 %v9489_v3 }
0x189d   :  { %5390 = vmatprep.mubr.f32.mxu0 %v9490_v35  ;;  %7194 = vmatprep.mubr.msk.f32.mxu1 %vm8124_vm1, %v9490_v35 }
0x189f   :  { %7636 = vmatpush1.bf16.msra.mxu0 %v8974_v17  ;;  %7642 = vmatpush3.bf16.msra.mxu1 %v9103_v13 }
0x18a0   :  { %7644 = vmatprep.subr.bf16.mxu0 %v8936_v38  ;;  %7651 = vmatprep.subr.bf16.mxu1 %v9489_v3 }
0x196d   :  { %v5224_v37 = vpop.f32.mrb[52].mxu0  ;;  %v5295_v40 = vpop.f32.mrb[76].mxu1 }
0x196e   :  { %v7747_v39 = vadd.f32 %v5224_v37, %v9148_v11  ;;  %v5226_v44 = vpop.f32.mrb[53].mxu0  ;;  %v7185_v57 = vpop.f32.mrb[77].mxu1  ;;  %v5313_v34 = vadd.f32 %v9193_v59, %v5295_v40 }
0x196f   :  { %v7748_v53 = vadd.f32 %v5226_v44, %v9167_v51 }
0x1970   :  { %v6653_v48 = vmul.f32 -1.442695, %v7747_v39 }
0x1971   :  { %v6654_v52 = vmul.f32 -1.442695, %v7748_v53 }
0x1972   :  { %8041 = vpow2.f32 %v6653_v48 }
0x1973   :  { %8043 = vpow2.f32 %v6654_v52 }
0x197c   :  { %v8042_v27 = vpop.eup %8041 }
0x197d   :  { %v5303_v20 = vadd.f32 1.0, %v8042_v27  ;;  %v8044_v45 = vpop.eup %8043 }
0x197e   :  { %v5310_v12 = vadd.f32 1.0, %v8044_v45 }
0x197f   :  { %8045 = vrcp.f32 %v5303_v20 }
0x1989   :  { %v8046_v1 = vpop.eup %8045 }
0x198a   :  { %v5314_v7 = vmul.f32 %v8046_v1, %v5313_v34 }
0x198c   :  { %v5315_v5 = vadd.f32 %v5314_v7, %v9176_v18 }
0x198e   :  { %8047 = vtanh.f32 %v5315_v5 }
0x198f   :  { %8049 = vrcp.f32 %v5310_v12 }
0x1998   :  { %v8048_v29 = vpop.eup %8047 }
0x1999   :  { %v5317_v9 = vsub.f32 %v5151_v43, %v8048_v29  ;;  %v8050_v36 = vpop.eup %8049 }
0x199b   :  { %v5318_v4 = vmul.f32 %v8050_v36, %v5317_v9 }
0x199d   :  { %v5319_v6 = vadd.f32 %v8048_v29, %v5318_v4 }
0x199f   :  { %6655 = vmatmul.mubr.msk.f32.vlgmr.msra.gmra.mrb[54].mxu0 %vm643_vm2, %v5319_v6  ;;  %7195 = vmatmul.mubr.msk.f32.vlgmr.msra.gmra.mrb[78].mxu1 %vm643_vm2, %v5319_v6 }
0x19a0   :  { %7646 = vmatpush1.bf16.msra.mxu0 %v8955_v63  ;;  %7653 = vmatpush3.bf16.msra.mxu1 %v9090_v60 }
0x19a1   :  { %7648 = vmatprep.subr.bf16.mxu0 %v8959_v31  ;;  %7654 = vmatprep.subr.bf16.mxu1 %v9489_v3 }
0x19a2   :  { %5558 = vmatprep.mubr.f32.mxu0 %v9490_v35  ;;  %7205 = vmatprep.mubr.msk.f32.mxu1 %vm8124_vm1, %v9490_v35 }
0x19a4   :  { %7650 = vmatpush1.bf16.msra.mxu0 %v8974_v17  ;;  %7656 = vmatpush3.bf16.msra.mxu1 %v9103_v13 }
0x19a5   :  { %7658 = vmatprep.subr.bf16.mxu0 %v8936_v38  ;;  %7665 = vmatprep.subr.bf16.mxu1 %v9489_v3 }
0x1a72   :  { %v5392_v18 = vpop.f32.mrb[54].mxu0  ;;  %v5463_v19 = vpop.f32.mrb[78].mxu1 }
0x1a73   :  { %v7749_v47 = vadd.f32 %v5392_v18, %v9148_v11  ;;  %v5394_v16 = vpop.f32.mrb[55].mxu0  ;;  %v7196_v55 = vpop.f32.mrb[79].mxu1  ;;  %v5481_v24 = vadd.f32 %v9193_v59, %v5463_v19 }
0x1a74   :  { %v7750_v25 = vadd.f32 %v5394_v16, %v9167_v51 }
0x1a75   :  { %v6657_v46 = vmul.f32 -1.442695, %v7749_v47 }
0x1a76   :  { %v6658_v58 = vmul.f32 -1.442695, %v7750_v25 }
0x1a77   :  { %8051 = vpow2.f32 %v6657_v46 }
0x1a78   :  { %8053 = vpow2.f32 %v6658_v58 }
0x1a81   :  { %v8052_v0 = vpop.eup %8051 }
0x1a82   :  { %v5471_v50 = vadd.f32 1.0, %v8052_v0  ;;  %v8054_v33 = vpop.eup %8053 }
0x1a83   :  { %v5478_v32 = vadd.f32 1.0, %v8054_v33 }
0x1a84   :  { %8055 = vrcp.f32 %v5471_v50 }
0x1a8e   :  { %v8056_v14 = vpop.eup %8055 }
0x1a8f   :  { %v5482_v8 = vmul.f32 %v8056_v14, %v5481_v24 }
0x1a91   :  { %v5483_v26 = vadd.f32 %v5482_v8, %v9174_v30 }
0x1a93   :  { %8057 = vtanh.f32 %v5483_v26 }
0x1a94   :  { %8059 = vrcp.f32 %v5478_v32 }
0x1a9d   :  { %v8058_v43 = vpop.eup %8057 }
0x1a9e   :  { %v5485_v37 = vsub.f32 %v5319_v6, %v8058_v43  ;;  %v8060_v40 = vpop.eup %8059 }
0x1aa0   :  { %v5486_v39 = vmul.f32 %v8060_v40, %v5485_v37 }
0x1aa2   :  { %v5487_v44 = vadd.f32 %v8058_v43, %v5486_v39 }
0x1aa4   :  { %6659 = vmatmul.mubr.msk.f32.vlgmr.msra.gmra.mrb[56].mxu0 %vm643_vm2, %v5487_v44  ;;  %7206 = vmatmul.mubr.msk.f32.vlgmr.msra.gmra.mrb[80].mxu1 %vm643_vm2, %v5487_v44 }
0x1aa5   :  { %7660 = vmatpush1.bf16.msra.mxu0 %v8955_v63  ;;  %7667 = vmatpush3.bf16.msra.mxu1 %v9090_v60 }
0x1aa6   :  { %7662 = vmatprep.subr.bf16.mxu0 %v8959_v31  ;;  %7668 = vmatprep.subr.bf16.mxu1 %v9489_v3 }
0x1aa7   :  { %5726 = vmatprep.mubr.f32.mxu0 %v9490_v35  ;;  %7216 = vmatprep.mubr.msk.f32.mxu1 %vm8124_vm1, %v9490_v35 }
0x1aa9   :  { %7664 = vmatpush1.bf16.msra.mxu0 %v8974_v17  ;;  %7670 = vmatpush3.bf16.msra.mxu1 %v9103_v13 }
0x1aaa   :  { %7672 = vmatprep.subr.bf16.mxu0 %v8936_v38  ;;  %7679 = vmatprep.subr.bf16.mxu1 %v9489_v3 }
0x1b77   :  { %v5560_v30 = vpop.f32.mrb[56].mxu0  ;;  %v5631_v57 = vpop.f32.mrb[80].mxu1 }
0x1b78   :  { %v7751_v48 = vadd.f32 %v5560_v30, %v9148_v11  ;;  %v5562_v53 = vpop.f32.mrb[57].mxu0  ;;  %v7207_v52 = vpop.f32.mrb[81].mxu1  ;;  %v5649_v5 = vadd.f32 %v9193_v59, %v5631_v57 }
0x1b79   :  { %v7752_v20 = vadd.f32 %v5562_v53, %v9167_v51 }
0x1b7a   :  { %v6661_v27 = vmul.f32 -1.442695, %v7751_v48  ;;  %v3579_v48 = vadd.f32 %v9067_v28, %v9167_v51 }
0x1b7b   :  { %v6662_v45 = vmul.f32 -1.442695, %v7752_v20 }
0x1b7c   :  { %8061 = vpow2.f32 %v6661_v27 }
0x1b7d   :  { %8063 = vpow2.f32 %v6662_v45 }
0x1b86   :  { %v8062_v34 = vpop.eup %8061 }
0x1b87   :  { %v5639_v1 = vadd.f32 1.0, %v8062_v34  ;;  %v8064_v7 = vpop.eup %8063 }
0x1b88   :  { %v5646_v36 = vadd.f32 1.0, %v8064_v7 }
0x1b89   :  { %8065 = vrcp.f32 %v5639_v1 }
0x1b93   :  { %v8066_v12 = vpop.eup %8065 }
0x1b94   :  { %v5650_v29 = vmul.f32 %v8066_v12, %v5649_v5 }
0x1b96   :  { %v5651_v9 = vadd.f32 %v5650_v29, %v9180_v41 }
0x1b98   :  { %8067 = vtanh.f32 %v5651_v9 }
0x1b99   :  { %8069 = vrcp.f32 %v5646_v36 }
0x1ba2   :  { %v8068_v4 = vpop.eup %8067 }
0x1ba3   :  { %v5653_v6 = vsub.f32 %v5487_v44, %v8068_v4  ;;  %v8070_v18 = vpop.eup %8069 }
0x1ba5   :  { %v5654_v19 = vmul.f32 %v8070_v18, %v5653_v6 }
0x1ba7   :  { %v5655_v47 = vadd.f32 %v8068_v4, %v5654_v19 }
0x1ba9   :  { %6663 = vmatmul.mubr.msk.f32.vlgmr.msra.gmra.mrb[58].mxu0 %vm643_vm2, %v5655_v47  ;;  %7217 = vmatmul.mubr.msk.f32.vlgmr.msra.gmra.mrb[82].mxu1 %vm643_vm2, %v5655_v47 }
0x1baa   :  { %7674 = vmatpush1.bf16.msra.mxu0 %v8955_v63  ;;  %7681 = vmatpush3.bf16.msra.mxu1 %v9090_v60 }
0x1bab   :  { %7676 = vmatprep.subr.bf16.mxu0 %v8959_v31  ;;  %7682 = vmatprep.subr.bf16.mxu1 %v9489_v3 }
0x1bac   :  { %5894 = vmatprep.mubr.f32.mxu0 %v9490_v35  ;;  %7227 = vmatprep.mubr.msk.f32.mxu1 %vm8124_vm1, %v9490_v35 }
0x1bae   :  { %7678 = vmatpush1.bf16.msra.mxu0 %v8974_v17  ;;  %7684 = vmatpush3.bf16.msra.mxu1 %v9103_v13 }
0x1baf   :  { %7686 = vmatprep.subr.bf16.mxu0 %v8936_v38  ;;  %7693 = vmatprep.subr.bf16.mxu1 %v9489_v3 }
0x1c7c   :  { %v5728_v41 = vpop.f32.mrb[58].mxu0  ;;  %v5799_v16 = vpop.f32.mrb[82].mxu1 }
0x1c7d   :  { %v7753_v55 = vadd.f32 %v5728_v41, %v9148_v11  ;;  %v5730_v46 = vpop.f32.mrb[59].mxu0  ;;  %v7218_v25 = vpop.f32.mrb[83].mxu1  ;;  %v5817_v8 = vadd.f32 %v9193_v59, %v5799_v16  ;;  %v3585_v16 = vadd.f32 %v9071_v56, %v9167_v51 }
0x1c7e   :  { %v7754_v0 = vadd.f32 %v5730_v46, %v9167_v51 }
0x1c7f   :  { %v6665_v58 = vmul.f32 -1.442695, %v7753_v55 }
0x1c80   :  { %v6666_v50 = vmul.f32 -1.442695, %v7754_v0 }
0x1c81   :  { %8071 = vpow2.f32 %v6665_v58 }
0x1c82   :  { %8073 = vpow2.f32 %v6666_v50 }
0x1c8b   :  { %v8072_v33 = vpop.eup %8071 }
0x1c8c   :  { %v5807_v24 = vadd.f32 1.0, %v8072_v33  ;;  %v8074_v14 = vpop.eup %8073 }
0x1c8d   :  { %v5814_v37 = vadd.f32 1.0, %v8074_v14 }
0x1c8e   :  { %8075 = vrcp.f32 %v5807_v24 }
0x1c98   :  { %v8076_v26 = vpop.eup %8075 }
0x1c99   :  { %v5818_v32 = vmul.f32 %v8076_v26, %v5817_v8 }
0x1c9b   :  { %v5819_v43 = vadd.f32 %v5818_v32, %v9178_v21  ;;  %v3577_v21 = vadd.f32 %v9065_v23, %v9148_v11 }
0x1c9d   :  { %8077 = vtanh.f32 %v5819_v43 }
0x1c9e   :  { %8079 = vrcp.f32 %v5814_v37 }
0x1ca7   :  { %v8078_v40 = vpop.eup %8077 }
0x1ca8   :  { %v5821_v39 = vsub.f32 %v5655_v47, %v8078_v40  ;;  %v8080_v44 = vpop.eup %8079 }
0x1caa   :  { %v5822_v30 = vmul.f32 %v8080_v44, %v5821_v39 }
0x1cac   :  { %v5823_v57 = vadd.f32 %v8078_v40, %v5822_v30 }
0x1cae   :  { %6667 = vmatmul.mubr.msk.f32.vlgmr.msra.gmra.mrb[60].mxu0 %vm643_vm2, %v5823_v57  ;;  %7228 = vmatmul.mubr.msk.f32.vlgmr.msra.gmra.mrb[84].mxu1 %vm643_vm2, %v5823_v57 }
0x1caf   :  { %7688 = vmatpush1.bf16.msra.mxu0 %v8955_v63  ;;  %7695 = vmatpush3.bf16.msra.mxu1 %v9090_v60 }
0x1cb0   :  { %7690 = vmatprep.subr.bf16.mxu0 %v8959_v31  ;;  %7696 = vmatprep.subr.bf16.mxu1 %v9489_v3 }
0x1cb1   :  { %6062 = vmatprep.mubr.f32.mxu0 %v9490_v35  ;;  %7238 = vmatprep.mubr.msk.f32.mxu1 %vm8124_vm1, %v9490_v35 }
0x1cb3   :  { %7692 = vmatpush1.bf16.msra.mxu0 %v8974_v17  ;;  %7698 = vmatpush3.bf16.msra.mxu1 %v9103_v13 }
0x1cb4   :  { %7700 = vmatprep.subr.bf16.mxu0 %v8936_v38  ;;  %7707 = vmatprep.subr.bf16.mxu1 %v9489_v3 }
0x1d81   :  { %v5896_v53 = vpop.f32.mrb[60].mxu0  ;;  %v5967_v52 = vpop.f32.mrb[84].mxu1 }
0x1d82   :  { %v5971_v27 = vadd.f32 %v5896_v53, %v3577_v21  ;;  %v5898_v20 = vpop.f32.mrb[61].mxu0  ;;  %v7229_v45 = vpop.f32.mrb[85].mxu1  ;;  %v5985_v9 = vadd.f32 %v9193_v59, %v5967_v52 }
0x1d83   :  { %v5978_v34 = vadd.f32 %v5898_v20, %v3579_v48 }
0x1d84   :  { %v6669_v1 = vmul.f32 -1.442695, %v5971_v27 }
0x1d85   :  { %v6670_v7 = vmul.f32 -1.442695, %v5978_v34 }
0x1d86   :  { %8081 = vpow2.f32 %v6669_v1 }
0x1d87   :  { %8083 = vpow2.f32 %v6670_v7 }
0x1d90   :  { %v8082_v5 = vpop.eup %8081 }
0x1d91   :  { %v5975_v12 = vadd.f32 1.0, %v8082_v5  ;;  %v8084_v29 = vpop.eup %8083 }
0x1d92   :  { %v5982_v4 = vadd.f32 1.0, %v8084_v29  ;;  %v18_v29 = vstv %s9468_s12 }
0x1d93   :  { %8085 = vrcp.f32 %v5975_v12  ;;  %19 = vst [vmem:[#allocation5] sm:$0x1] %v18_v29 }
0x1d9d   :  { %v8086_v23 = vpop.eup %8085 }
0x1d9e   :  { %v5986_v36 = vmul.f32 %v8086_v23, %v5985_v9  ;;  %v3597_v9 = vadd.f32 %v9152_v10, %v9167_v51 }
0x1da0   :  { %v5987_v28 = vadd.f32 %v5986_v36, %v9184_v15  ;;  %v3583_v15 = vadd.f32 %v9069_v22, %v9148_v11 }
0x1da2   :  { %8087 = vtanh.f32 %v5987_v28 }
0x1da3   :  { %8089 = vrcp.f32 %v5982_v4 }
0x1dac   :  { %v8088_v6 = vpop.eup %8087 }
0x1dad   :  { %v5989_v18 = vsub.f32 %v5823_v57, %v8088_v6  ;;  %v8090_v19 = vpop.eup %8089 }
0x1daf   :  { %v5990_v47 = vmul.f32 %v8090_v19, %v5989_v18 }
0x1db1   :  { %v5991_v41 = vadd.f32 %v8088_v6, %v5990_v47 }
0x1db3   :  { %6671 = vmatmul.mubr.msk.f32.vlgmr.msra.gmra.mrb[62].mxu0 %vm643_vm2, %v5991_v41  ;;  %7239 = vmatmul.mubr.msk.f32.vlgmr.msra.gmra.mrb[86].mxu1 %vm643_vm2, %v5991_v41 }
0x1db4   :  { %7702 = vmatpush1.bf16.msra.mxu0 %v8955_v63  ;;  %7709 = vmatpush3.bf16.msra.mxu1 %v9090_v60 }
0x1db5   :  { %7704 = vmatprep.subr.bf16.mxu0 %v8959_v31  ;;  %7710 = vmatprep.subr.bf16.mxu1 %v9489_v3 }
0x1db6   :  { %6230 = vmatprep.mubr.f32.mxu0 %v9490_v35  ;;  %7249 = vmatprep.mubr.msk.f32.mxu1 %vm8124_vm1, %v9490_v35 }
0x1db8   :  { %7706 = vmatpush1.bf16.msra.mxu0 %v8974_v17  ;;  %7712 = vmatpush3.bf16.msra.mxu1 %v9103_v13 }
0x1db9   :  { %7714 = vmatprep.subr.bf16.mxu0 %v8936_v38  ;;  %7721 = vmatprep.subr.bf16.mxu1 %v9489_v3 }
0x1e86   :  { %v6064_v55 = vpop.f32.mrb[62].mxu0  ;;  %v6135_v46 = vpop.f32.mrb[86].mxu1 }
0x1e87   :  { %v6139_v25 = vadd.f32 %v6064_v55, %v3583_v15  ;;  %v6066_v58 = vpop.f32.mrb[63].mxu0  ;;  %v7240_v0 = vpop.f32.mrb[87].mxu1  ;;  %v6153_v26 = vadd.f32 %v9193_v59, %v6135_v46 }
0x1e88   :  { %v6146_v50 = vadd.f32 %v6066_v58, %v3585_v16 }
0x1e89   :  { %v6673_v33 = vmul.f32 -1.442695, %v6139_v25 }
0x1e8a   :  { %v6674_v24 = vmul.f32 -1.442695, %v6146_v50  ;;  %v6683_v50 = vld [vmem:[%s9469_s11] ss:$0 sm:$0xff] }
0x1e8b   :  { %8091 = vpow2.f32 %v6673_v33 }
0x1e8c   :  { %8093 = vpow2.f32 %v6674_v24 }
0x1e95   :  { %v8092_v14 = vpop.eup %8091 }
0x1e96   :  { %v6143_v8 = vadd.f32 1.0, %v8092_v14  ;;  %v8094_v38 = vpop.eup %8093 }
0x1e97   :  { %v6150_v43 = vadd.f32 1.0, %v8094_v38 }
0x1e98   :  { %8095 = vrcp.f32 %v6143_v8  ;;  %v6684_v8 = vld [vmem:[#allocation5] ss:$0 sm:$0xff] }
0x1ea2   :  { %v8096_v22 = vpop.eup %8095 }
0x1ea3   :  { %v6154_v32 = vmul.f32 %v8096_v22, %v6153_v26 }
0x1ea5   :  { %v6155_v56 = vadd.f32 %v6154_v32, %v9182_v42  ;;  %v3589_v42 = vadd.f32 %v9073_v49, %v9148_v11  ;;  %v8122_v49 = vld [vmem:[%s9467_s10] ss:$0 sm:$0xff] }
0x1ea7   :  { %8097 = vtanh.f32 %v6155_v56 }
0x1ea8   :  { %8099 = vrcp.f32 %v6150_v43 }
0x1eb1   :  { %v8098_v37 = vpop.eup %8097 }
0x1eb2   :  { %v6157_v40 = vsub.f32 %v5991_v41, %v8098_v37  ;;  %v8100_v39 = vpop.eup %8099 }
0x1eb4   :  { %v6158_v44 = vmul.f32 %v8100_v39, %v6157_v40 }
0x1eb6   :  { %v6159_v30 = vadd.f32 %v8098_v37, %v6158_v44 }
0x1eb8   :  { %6675 = vmatmul.mubr.msk.f32.vlgmr.msra.gmra.mrb[64].mxu0 %vm643_vm2, %v6159_v30  ;;  %7250 = vmatmul.mubr.msk.f32.vlgmr.msra.gmra.mrb[88].mxu1 %vm643_vm2, %v6159_v30 }
0x1eb9   :  { %7716 = vmatpush1.bf16.msra.mxu0 %v8955_v63  ;;  %7723 = vmatpush3.bf16.msra.mxu1 %v9090_v60  ;;  %v3591_v63 = vadd.f32 %v9075_v62, %v9167_v51 }
0x1eba   :  { %7718 = vmatprep.subr.bf16.mxu0 %v8959_v31  ;;  %7724 = vmatprep.subr.bf16.mxu1 %v9489_v3 }
0x1ebb   :  { %6398 = vmatprep.mubr.f32.mxu0 %v9490_v35  ;;  %7260 = vmatprep.mubr.msk.f32.mxu1 %vm8124_vm1, %v9490_v35 }
0x1ebd   :  { %7720 = vmatpush1.bf16.msra.mxu0 %v8974_v17  ;;  %7726 = vmatpush3.bf16.msra.mxu1 %v9103_v13 }
0x1f8b   :  { %v6232_v60 = vpop.f32.mrb[64].mxu0  ;;  %v6303_v59 = vpop.f32.mrb[88].mxu1 }
0x1f8c   :  { %v6307_v31 = vadd.f32 %v6232_v60, %v3589_v42  ;;  %v6234_v57 = vpop.f32.mrb[65].mxu0  ;;  %v7251_v3 = vpop.f32.mrb[89].mxu1  ;;  %v6321_v13 = vadd.f32 %v8122_v49, %v6303_v59 }
0x1f8d   :  { %v6314_v21 = vadd.f32 %v6234_v57, %v3591_v63 }
0x1f8e   :  { %v6677_v48 = vmul.f32 -1.442695, %v6307_v31 }
0x1f8f   :  { %v6678_v53 = vmul.f32 -1.442695, %v6314_v21 }
0x1f90   :  { %8101 = vpow2.f32 %v6677_v48 }
0x1f91   :  { %8103 = vpow2.f32 %v6678_v53 }
0x1f9a   :  { %v8102_v35 = vpop.eup %8101 }
0x1f9b   :  { %v6311_v52 = vadd.f32 1.0, %v8102_v35  ;;  %v8104_v17 = vpop.eup %8103 }
0x1f9c   :  { %v6318_v45 = vadd.f32 1.0, %v8104_v17 }
0x1f9d   :  { %8105 = vrcp.f32 %v6311_v52 }
0x1fa7   :  { %v8106_v62 = vpop.eup %8105 }
0x1fa8   :  { %v6322_v27 = vmul.f32 %v8106_v62, %v6321_v13 }
0x1faa   :  { %v6323_v20 = vadd.f32 %v6322_v27, %v9188_v2  ;;  %v3595_v2 = vadd.f32 %v9145_v54, %v9148_v11 }
0x1fac   :  { %8107 = vtanh.f32 %v6323_v20 }
0x1fad   :  { %8109 = vrcp.f32 %v6318_v45 }
0x1fb6   :  { %v8108_v34 = vpop.eup %8107 }
0x1fb7   :  { %v6325_v1 = vsub.f32 %v6159_v30, %v8108_v34  ;;  %v8110_v7 = vpop.eup %8109 }
0x1fb9   :  { %v6326_v5 = vmul.f32 %v8110_v7, %v6325_v1 }
0x1fbb   :  { %v6327_v12 = vadd.f32 %v8108_v34, %v6326_v5 }
0x1fbd   :  { %6679 = vmatmul.mubr.msk.f32.vlgmr.msra.gmra.mrb[66].mxu0 %vm643_vm2, %v6327_v12  ;;  %7261 = vmatmul.mubr.msk.f32.vlgmr.msra.gmra.mrb[90].mxu1 %vm643_vm2, %v6327_v12 }
0x2090   :  { %v6400_v23 = vpop.f32.mrb[66].mxu0  ;;  %v6471_v36 = vpop.f32.mrb[90].mxu1 }
0x2091   :  { %v6475_v28 = vadd.f32 %v6400_v23, %v3595_v2  ;;  %v6402_v4 = vpop.f32.mrb[67].mxu0  ;;  %v7262_v6 = vpop.f32.mrb[91].mxu1  ;;  %v6489_v55 = vadd.f32 %v8122_v49, %v6471_v36 }
0x2092   :  { %v6482_v18 = vadd.f32 %v6402_v4, %v3597_v9 }
0x2093   :  { %v6681_v19 = vmul.f32 -1.442695, %v6475_v28 }
0x2094   :  { %v6682_v47 = vmul.f32 -1.442695, %v6482_v18 }
0x2095   :  { %8111 = vpow2.f32 %v6681_v19 }
0x2096   :  { %8113 = vpow2.f32 %v6682_v47 }
0x209f   :  { %v8112_v41 = vpop.eup %8111 }
0x20a0   :  { %v6479_v15 = vadd.f32 1.0, %v8112_v41  ;;  %v8114_v16 = vpop.eup %8113 }
0x20a1   :  { %v6486_v10 = vadd.f32 1.0, %v8114_v16 }
0x20a2   :  { %8115 = vrcp.f32 %v6479_v15 }
0x20ac   :  { %v8116_v46 = vpop.eup %8115 }
0x20ad   :  { %v6490_v54 = vmul.f32 %v8116_v46, %v6489_v55 }
0x20af   :  { %v6491_v11 = vadd.f32 %v6490_v54, %v9186_v61 }
0x20b1   :  { %8117 = vtanh.f32 %v6491_v11 }
0x20b2   :  { %8119 = vrcp.f32 %v6486_v10 }
0x20bb   :  { %v8118_v51 = vpop.eup %8117 }
0x20bc   :  { %v6493_v25 = vsub.f32 %v6327_v12, %v8118_v51  ;;  %v8120_v58 = vpop.eup %8119 }
0x20be   :  { %v6494_v0 = vmul.f32 %v8120_v58, %v6493_v25 }
0x20c0   :  { %v6495_v33 = vadd.f32 %v8118_v51, %v6494_v0 }
0x20c2   :  { %v6503_v24 = vmul.f32 %v6683_v50, %v6495_v33 }
0x20c4   :  { %v6504_v14 = vsel %vm643_vm2, %v6503_v24, 0.0 }
0x20c5   :  { %6505 = vadd.xlane.f32.xlu0 %v6504_v14 }
0x2152   :  { %v6506_v38 = vpop.xlane.xlu0 %6505 }
0x2153   :  { %v6514_v61 = vadd.f32 %v6684_v8, %v6506_v38 }
0x2155   :  { %6516 = vst.msk [vmem:[%s9470_s13] sm:$0xff] %vm6515_vm3, %v6514_v61 }

</bundles_post_ra>
